<compile_context>
chip_gen: v6e
topology: v6e:2x2x1
jax: 0.10.0
libtpu: 0.0.40
codegen_flags: <defaults>
</compile_context>

<pallas_src>
import functools

import jax
import jax.numpy as jnp
import numpy as np
from jax.experimental import pallas as pl
from jax.experimental.pallas import tpu as pltpu


def _round_up(x: int, m: int) -> int:
    return ((x + m - 1) // m) * m


# ----------------------------------------------------------------------------
# Generic tiled Linear kernel (bf16 MXU inputs, f32 accumulation + f32 bias).
# Used for (a) the hoisted LSTM input projection of both directions at once,
# and (b) the final output Linear (num_labels padded to 128 lanes).
# ----------------------------------------------------------------------------
def _linear_kernel(x_ref, w_ref, b_ref, o_ref):
    o_ref[...] = (jnp.dot(x_ref[...], w_ref[...],
                          preferred_element_type=jnp.float32) + b_ref[...])


def linear_pallas(x, w_t, b, *, row_block=512):
    """x: (R, K) float (cast to bf16), w_t: (K, N) bf16, b: (1, N) f32 -> (R, N) f32."""
    R, K = x.shape
    N = w_t.shape[1]
    rb = _round_up(R, 8) if R <= row_block else row_block
    R_pad = _round_up(R, rb)
    x_p = x.astype(jnp.bfloat16)
    if R_pad != R:
        x_p = jnp.pad(x_p, ((0, R_pad - R), (0, 0)))
    out = pl.pallas_call(
        _linear_kernel,
        out_shape=jax.ShapeDtypeStruct((R_pad, N), jnp.float32),
        grid_spec=pltpu.PrefetchScalarGridSpec(
            num_scalar_prefetch=0,
            grid=(R_pad // rb,),
            in_specs=[pl.BlockSpec((rb, K), lambda i: (i, 0)),
                      pl.BlockSpec((K, N), lambda i: (0, 0)),
                      pl.BlockSpec((1, N), lambda i: (0, 0))],
            out_specs=pl.BlockSpec((rb, N), lambda i: (i, 0))),
        compiler_params=pltpu.CompilerParams(
            dimension_semantics=("parallel",)),
    )(x_p, w_t, b)
    return out[:R] if R_pad != R else out


# ----------------------------------------------------------------------------
# Fused bidirectional LSTM recurrence kernel (one layer, both directions).
# gates_x (input projection + bias) is precomputed; only h @ W_hh^T + gate
# nonlinearities + length masking run per timestep.
# ----------------------------------------------------------------------------
def _bidir_lstm_kernel(len_ref, gxf_ref, gxb_ref, whhf_ref, whhb_ref,
                       yf_ref, yb_ref, hfN_ref, cfN_ref, hbN_ref, cbN_ref,
                       hf_scr, cf_scr, hb_scr, cb_scr, *, Tc, H_pad):
    c_idx = pl.program_id(0)
    n_chunks = pl.num_programs(0)

    @pl.when(c_idx == 0)
    def _():
        hf_scr[...] = jnp.zeros_like(hf_scr)
        cf_scr[...] = jnp.zeros_like(cf_scr)
        hb_scr[...] = jnp.zeros_like(hb_scr)
        cb_scr[...] = jnp.zeros_like(cb_scr)

    lens = len_ref[...]                      # (B_pad, 1) int32
    base_f = c_idx * Tc                      # global time of local step 0 (fwd chunk)
    base_b = (n_chunks - 1 - c_idx) * Tc     # global time of local step 0 (bwd chunk)

    def cell(gates, c_prev):
        i_g = jax.nn.sigmoid(gates[:, 0 * H_pad:1 * H_pad])
        f_g = jax.nn.sigmoid(gates[:, 1 * H_pad:2 * H_pad])
        g_g = jnp.tanh(gates[:, 2 * H_pad:3 * H_pad])
        o_g = jax.nn.sigmoid(gates[:, 3 * H_pad:4 * H_pad])
        c_new = f_g * c_prev + i_g * g_g
        h_new = o_g * jnp.tanh(c_new)
        return h_new, c_new

    def step(s, carry):
        h_f, c_f, h_b, c_b = carry
        # ---- forward direction, global time base_f + s
        g_f = gxf_ref[s] + jnp.dot(h_f.astype(jnp.bfloat16), whhf_ref[...],
                                   preferred_element_type=jnp.float32)
        hn_f, cn_f = cell(g_f, c_f)
        m_f = (base_f + s) < lens
        h_f = jnp.where(m_f, hn_f, h_f)
        c_f = jnp.where(m_f, cn_f, c_f)
        yf_ref[s] = jnp.where(m_f, hn_f, 0.0)
        # ---- backward direction, global time base_b + (Tc - 1 - s)
        sb = Tc - 1 - s
        g_b = gxb_ref[sb] + jnp.dot(h_b.astype(jnp.bfloat16), whhb_ref[...],
                                    preferred_element_type=jnp.float32)
        hn_b, cn_b = cell(g_b, c_b)
        m_b = (base_b + sb) < lens
        h_b = jnp.where(m_b, hn_b, h_b)
        c_b = jnp.where(m_b, cn_b, c_b)
        yb_ref[sb] = jnp.where(m_b, hn_b, 0.0)
        return h_f, c_f, h_b, c_b

    init = (hf_scr[...], cf_scr[...], hb_scr[...], cb_scr[...])
    h_f, c_f, h_b, c_b = jax.lax.fori_loop(0, Tc, step, init, unroll=True)
    hf_scr[...] = h_f
    cf_scr[...] = c_f
    hb_scr[...] = h_b
    cb_scr[...] = c_b

    @pl.when(c_idx == n_chunks - 1)
    def _():
        hfN_ref[...] = h_f
        cfN_ref[...] = c_f
        hbN_ref[...] = h_b
        cbN_ref[...] = c_b


def bidir_lstm_layer(gx, lens, whh_f_t, whh_b_t, *, Tc, H_pad):
    """gx: (T_pad, B_pad, 8*H_pad) f32 pre-projected gates (+bias), last dim laid
    out as [forward 4*H_pad | backward 4*H_pad]; lens: (B_pad, 1) int32;
    whh_*_t: (H_pad, 4*H_pad) bf16.  Returns y_f, y_b, h_f, c_f, h_b, c_b."""
    T_pad, B_pad, _ = gx.shape
    n_chunks = T_pad // Tc
    G = 4 * H_pad

    kernel = functools.partial(_bidir_lstm_kernel, Tc=Tc, H_pad=H_pad)
    const2 = lambda c: (0, 0)
    fwd_t = lambda c: (c, 0, 0)
    bwd_t = lambda c: (n_chunks - 1 - c, 0, 0)
    bwd_gx = lambda c: (n_chunks - 1 - c, 0, 1)   # backward half of gx (last-dim block 1)

    state = jax.ShapeDtypeStruct((B_pad, H_pad), jnp.float32)
    return pl.pallas_call(
        kernel,
        out_shape=(jax.ShapeDtypeStruct((T_pad, B_pad, H_pad), jnp.float32),
                   jax.ShapeDtypeStruct((T_pad, B_pad, H_pad), jnp.float32),
                   state, state, state, state),
        grid_spec=pltpu.PrefetchScalarGridSpec(
            num_scalar_prefetch=0,
            grid=(n_chunks,),
            in_specs=[
                pl.BlockSpec((B_pad, 1), const2),         # lengths
                pl.BlockSpec((Tc, B_pad, G), fwd_t),      # gates_x, forward half
                pl.BlockSpec((Tc, B_pad, G), bwd_gx),     # gates_x, backward half
                # TODO(synk): at large H, single-buffer these resident weights and
                # re-derive Tc / vmem_limit_bytes per generation (64 MiB on v7x).
                pl.BlockSpec((H_pad, G), const2),         # W_hh_f^T (bf16)
                pl.BlockSpec((H_pad, G), const2),         # W_hh_b^T (bf16)
            ],
            out_specs=(
                pl.BlockSpec((Tc, B_pad, H_pad), fwd_t),  # y_f
                pl.BlockSpec((Tc, B_pad, H_pad), bwd_t),  # y_b
                pl.BlockSpec((B_pad, H_pad), const2),     # final h_f
                pl.BlockSpec((B_pad, H_pad), const2),     # final c_f
                pl.BlockSpec((B_pad, H_pad), const2),     # final h_b
                pl.BlockSpec((B_pad, H_pad), const2),     # final c_b
            ),
            scratch_shapes=[pltpu.VMEM((B_pad, H_pad), jnp.float32)] * 4),
        compiler_params=pltpu.CompilerParams(
            dimension_semantics=("arbitrary",)),          # serial recurrence
        # TODO(synk): on v7x, map the two directions onto the two TensorCores
        # (leading 'parallel' grid axis / pl.core_map) instead of fusing here.
    )(lens, gx, gx, whh_f_t, whh_b_t)


# ----------------------------------------------------------------------------
# Weight preparation: transpose, pad gate/hidden dims to lane-aligned sizes,
# concatenate directions, cast matmul operands to bf16.  Done ONCE.
# ----------------------------------------------------------------------------
def _pad_gate_axis(a, H, H_pad):
    """Last axis is 4*H; expand to 4*H_pad, gate g placed at [g*H_pad, g*H_pad+H)."""
    if H_pad == H:
        return a
    parts = jnp.split(a, 4, axis=-1)
    pad = [(0, 0)] * (a.ndim - 1) + [(0, H_pad - H)]
    return jnp.concatenate([jnp.pad(p, pad) for p in parts], axis=-1)


def _pad_bidir_rows(w_t, H, H_pad):
    """Rows are [fwd(0..H) | bwd(0..H)] -> (2*H_pad, N) with zero padding."""
    if H_pad == H:
        return w_t
    pad = ((0, H_pad - H), (0, 0))
    return jnp.concatenate([jnp.pad(w_t[:H], pad), jnp.pad(w_t[H:], pad)], axis=0)


def prepare_params(params):
    n_layers = params["n_layers"]
    H = params["w_hh_l0_f"].shape[1]
    H_pad = _round_up(H, 128)
    L = params["w_out"].shape[0]
    L_pad = _round_up(L, 128)
    prep = {"n_layers": n_layers, "H": H, "H_pad": H_pad, "L": L, "L_pad": L_pad,
            "embedding": jnp.asarray(params["embedding"], jnp.float32)}
    for l in range(n_layers):
        wih_parts, b_parts = [], []
        for tag in ("f", "b"):
            w_ih = jnp.asarray(params[f"w_ih_l{l}_{tag}"], jnp.float32)   # (4H, I)
            w_hh = jnp.asarray(params[f"w_hh_l{l}_{tag}"], jnp.float32)   # (4H, H)
            bias = (params[f"b_ih_l{l}_{tag}"]
                    + params[f"b_hh_l{l}_{tag}"]).astype(jnp.float32)     # (4H,)
            wih_t = _pad_gate_axis(w_ih.T, H, H_pad)                      # (I, 4H_pad)
            if l > 0:
                wih_t = _pad_bidir_rows(wih_t, H, H_pad)                  # (2H_pad, 4H_pad)
            whh_t = _pad_gate_axis(w_hh.T, H, H_pad)                      # (H, 4H_pad)
            whh_t = jnp.pad(whh_t, ((0, H_pad - H), (0, 0)))              # (H_pad, 4H_pad)
            b_pad = _pad_gate_axis(bias.reshape(1, -1), H, H_pad)         # (1, 4H_pad)
            wih_parts.append(wih_t)
            b_parts.append(b_pad)
            prep[f"whh_{tag}_{l}"] = whh_t.astype(jnp.bfloat16)
        prep[f"wih_{l}"] = jnp.concatenate(wih_parts, axis=1).astype(jnp.bfloat16)
        prep[f"bias_{l}"] = jnp.concatenate(b_parts, axis=1)              # f32
    w_out_t = _pad_bidir_rows(jnp.asarray(params["w_out"], jnp.float32).T, H, H_pad)
    prep["w_out"] = jnp.pad(w_out_t, ((0, 0), (0, L_pad - L))).astype(jnp.bfloat16)
    prep["b_out"] = jnp.pad(params["b_out"].astype(jnp.float32).reshape(1, -1),
                            ((0, 0), (0, L_pad - L)))
    return prep


# ----------------------------------------------------------------------------
# Full BLSTM forward
# ----------------------------------------------------------------------------
def blstm_forward(prep, input_seqs, input_lengths):
    """input_seqs: (T, B) int32; input_lengths: (B,) int32 (descending).

    Returns (outputs, (h_n, c_n)) matching the PyTorch module:
      outputs: (T, B, num_labels); h_n, c_n: (n_layers*2, B, hidden_size)
    """
    T, B = input_seqs.shape
    n_layers = prep["n_layers"]
    H, H_pad = prep["H"], prep["H_pad"]
    L, L_pad = prep["L"], prep["L_pad"]
    B_pad = _round_up(B, 8)
    Tc = T if T < 32 else 32                 # time chunk per grid step
    T_pad = _round_up(T, Tc)

    # Embedding gather (glue, plain JAX).
    x = jnp.take(prep["embedding"], input_seqs, axis=0)              # (T, B, E)
    # TODO(synk): training-mode dropout (embedding_dropout / inter-layer
    # nn.Dropout) not implemented; eval mode => identity.
    x = jnp.pad(x, ((0, T_pad - T), (0, B_pad - B), (0, 0)))
    lens = jnp.pad(input_lengths.astype(jnp.int32), (0, B_pad - B))
    lens = lens.reshape(B_pad, 1)            # padded rows: length 0 => always masked

    hs, cs = [], []
    for l in range(n_layers):
        K = x.shape[-1]
        # Hoisted input projection for BOTH directions at once, bias folded in.
        gx = linear_pallas(x.reshape(T_pad * B_pad, K),
                           prep[f"wih_{l}"], prep[f"bias_{l}"])
        gx = gx.reshape(T_pad, B_pad, 8 * H_pad)
        y_f, y_b, h_f, c_f, h_b, c_b = bidir_lstm_layer(
            gx, lens, prep[f"whh_f_{l}"], prep[f"whh_b_{l}"], Tc=Tc, H_pad=H_pad)
        x = jnp.concatenate([y_f, y_b], axis=-1)                     # (T_pad, B_pad, 2H_pad)
        hs += [h_f[:B, :H], h_b[:B, :H]]
        cs += [c_f[:B, :H], c_b[:B, :H]]

    out2d = linear_pallas(x.reshape(T_pad * B_pad, 2 * H_pad),
                          prep["w_out"], prep["b_out"])              # (.., L_pad)
    outputs = out2d.reshape(T_pad, B_pad, L_pad)[:T, :B, :L]
    return outputs, (jnp.stack(hs, 0), jnp.stack(cs, 0))


# ----------------------------------------------------------------------------
# Pure-JAX reference (correctness check).  bf16=True mirrors the kernel's
# bf16-input / f32-accumulate matmuls; bf16=False is the pure-f32 semantics
# of the original PyTorch module.
# ----------------------------------------------------------------------------
def _lstm_dir_ref(gates_x, lengths, w_hh, reverse, mm):
    T, B, G = gates_x.shape
    H = G // 4
    whh_t = w_hh.T

    def step(carry, inp):
        h, c = carry
        gx_t, t = inp
        gates = gx_t + mm(h, whh_t)
        i = jax.nn.sigmoid(gates[:, :H])
        f = jax.nn.sigmoid(gates[:, H:2 * H])
        g = jnp.tanh(gates[:, 2 * H:3 * H])
        o = jax.nn.sigmoid(gates[:, 3 * H:])
        c_new = f * c + i * g
        h_new = o * jnp.tanh(c_new)
        m = (t < lengths)[:, None]
        return (jnp.where(m, h_new, h), jnp.where(m, c_new, c)), jnp.where(m, h_new, 0.0)

    ts = jnp.arange(T)
    xs, tss = (gates_x[::-1], ts[::-1]) if reverse else (gates_x, ts)
    (hN, cN), ys = jax.lax.scan(step, (jnp.zeros((B, H), jnp.float32),
                                       jnp.zeros((B, H), jnp.float32)), (xs, tss))
    return (ys[::-1] if reverse else ys), hN, cN


def blstm_forward_ref(params, input_seqs, input_lengths, *, bf16=True):
    if bf16:
        mm = lambda a, b: jnp.dot(a.astype(jnp.bfloat16), b.astype(jnp.bfloat16),
                                  preferred_element_type=jnp.float32)
    else:
        mm = lambda a, b: jnp.dot(a, b, preferred_element_type=jnp.float32)
    x = jnp.take(params["embedding"], input_seqs, axis=0)
    hs, cs = [], []
    for l in range(params["n_layers"]):
        ys = []
        for tag, rev in (("f", False), ("b", True)):
            bias = params[f"b_ih_l{l}_{tag}"] + params[f"b_hh_l{l}_{tag}"]
            gates_x = mm(x, params[f"w_ih_l{l}_{tag}"].T) + bias
            y, hN, cN = _lstm_dir_ref(gates_x, input_lengths,
                                      params[f"w_hh_l{l}_{tag}"], rev, mm)
            ys.append(y)
            hs.append(hN)
            cs.append(cN)
        x = jnp.concatenate(ys, axis=-1)
    out = mm(x, params["w_out"].T) + params["b_out"]
    return out, (jnp.stack(hs, 0), jnp.stack(cs, 0))


# ----------------------------------------------------------------------------
# Deterministic parameter init (shapes from the module's __init__)
# ----------------------------------------------------------------------------
def init_params(key, vocab_size, input_size, hidden_size, num_labels, n_layers):
    params = {"n_layers": n_layers}
    scale = 1.0 / np.sqrt(hidden_size)

    def u(key, shape):
        return jax.random.uniform(key, shape, jnp.float32, -scale, scale)

    keys = jax.random.split(key, 4 + n_layers * 2 * 4 + 2)
    ki = iter(keys)
    params["embedding"] = jax.random.normal(next(ki), (vocab_size, input_size),
                                            jnp.float32) * 0.1
    for l in range(n_layers):
        in_sz = input_size if l == 0 else 2 * hidden_size
        for tag in ("f", "b"):
            params[f"w_ih_l{l}_{tag}"] = u(next(ki), (4 * hidden_size, in_sz))
            params[f"w_hh_l{l}_{tag}"] = u(next(ki), (4 * hidden_size, hidden_size))
            params[f"b_ih_l{l}_{tag}"] = u(next(ki), (4 * hidden_size,))
            params[f"b_hh_l{l}_{tag}"] = u(next(ki), (4 * hidden_size,))
    params["w_out"] = u(next(ki), (num_labels, 2 * hidden_size))
    params["b_out"] = u(next(ki), (num_labels,))
    return params


if __name__ == "__main__":
    vocab_size, input_size, hidden_size = 50, 16, 32
    num_labels, n_layers = 5, 2
    T, B = 8, 2

    key = jax.random.PRNGKey(0)
    k_par, k_seq = jax.random.split(key)
    params = init_params(k_par, vocab_size, input_size, hidden_size,
                         num_labels, n_layers)
    prep = prepare_params(params)

    input_seqs = jax.random.randint(k_seq, (T, B), 0, vocab_size, jnp.int32)
    input_lengths = jnp.array([8, 5], dtype=jnp.int32)   # descending, as packed

    fwd = jax.jit(lambda seqs, lens: blstm_forward(prep, seqs, lens))
    outputs, (h_n, c_n) = fwd(input_seqs, input_lengths)
    jax.block_until_ready((outputs, h_n, c_n))

    # Tight check vs a reference that mirrors the kernel's bf16 MXU inputs.
    out_ref, (h_ref, c_ref) = blstm_forward_ref(params, input_seqs, input_lengths,
                                                bf16=True)
    np.testing.assert_allclose(np.asarray(outputs), np.asarray(out_ref),
                               rtol=1e-3, atol=1e-3)
    np.testing.assert_allclose(np.asarray(h_n), np.asarray(h_ref),
                               rtol=1e-3, atol=1e-3)
    np.testing.assert_allclose(np.asarray(c_n), np.asarray(c_ref),
                               rtol=1e-3, atol=1e-3)

    # Loose check vs the pure-f32 semantics of the original module.
    out_f32, (h_f32, c_f32) = blstm_forward_ref(params, input_seqs, input_lengths,
                                                bf16=False)
    np.testing.assert_allclose(np.asarray(outputs), np.asarray(out_f32),
                               rtol=2e-2, atol=2e-2)
    np.testing.assert_allclose(np.asarray(h_n), np.asarray(h_f32),
                               rtol=2e-2, atol=2e-2)
    np.testing.assert_allclose(np.asarray(c_n), np.asarray(c_f32),
                               rtol=2e-2, atol=2e-2)

    assert outputs.shape == (T, B, num_labels)
    assert h_n.shape == (n_layers * 2, B, hidden_size)
    assert c_n.shape == (n_layers * 2, B, hidden_size)
    print("KERNEL_OK")
</pallas_src>

<mosaic_0001>
module attributes {stable_mosaic.version = 11 : i64} {
  func.func @_linear_kernel(%arg0: i32, %arg1: memref<64x256xbf16, #tpu.memory_space<vmem>>, %arg2: memref<256x1024xbf16, #tpu.memory_space<vmem>>, %arg3: memref<1x1024xf32, #tpu.memory_space<vmem>>, %arg4: memref<64x1024xf32, #tpu.memory_space<vmem>>) attributes {dimension_semantics = [#tpu.dimension_semantics<parallel>], iteration_bounds = array<i64: 1>, scalar_prefetch = 0 : i64, scratch_operands = 0 : i64, tpu.core_type = #tpu.core_type<tc>, window_params = [{transform_indices = @transform_0, window_bounds = array<i64: 64, 256>}, {pipeline_mode = #tpu.pipeline_mode<synchronous>, transform_indices = @transform_1, window_bounds = array<i64: 256, 1024>}, {pipeline_mode = #tpu.pipeline_mode<synchronous>, transform_indices = @transform_2, window_bounds = array<i64: 1, 1024>}, {transform_indices = @transform_3, window_bounds = array<i64: 64, 1024>}]} {
    %c0 = arith.constant 0 : index
    %c0_0 = arith.constant 0 : index
    %0 = vector.load %arg1[%c0, %c0_0] : memref<64x256xbf16, #tpu.memory_space<vmem>>, vector<64x256xbf16>
    %c0_1 = arith.constant 0 : index
    %c0_2 = arith.constant 0 : index
    %1 = vector.load %arg2[%c0_1, %c0_2] : memref<256x1024xbf16, #tpu.memory_space<vmem>>, vector<256x1024xbf16>
    %cst = arith.constant dense<0.000000e+00> : vector<64x1024xf32>
    %2 = tpu.matmul %0, %1, %cst {dimension_numbers = #tpu.dot_dimension_numbers<[1], [0], [0], [1], [0, 0, 1, 1], [], []>} : vector<64x256xbf16>, vector<256x1024xbf16>, vector<64x1024xf32> -> vector<64x1024xf32>
    %c0_3 = arith.constant 0 : index
    %c0_4 = arith.constant 0 : index
    %3 = vector.load %arg3[%c0_3, %c0_4] : memref<1x1024xf32, #tpu.memory_space<vmem>>, vector<1x1024xf32>
    %4 = vector.broadcast %3 : vector<1x1024xf32> to vector<64x1024xf32>
    %5 = arith.addf %2, %4 : vector<64x1024xf32>
    %c0_5 = arith.constant 0 : index
    %c0_6 = arith.constant 0 : index
    %6 = vector.load %arg4[%c0_5, %c0_6] : memref<64x1024xf32, #tpu.memory_space<vmem>>, vector<64x1024xf32>
    tpu.vector_store %arg4[%c0_5, %c0_6], %5 {strides = array<i32>} : memref<64x1024xf32, #tpu.memory_space<vmem>>, vector<64x1024xf32>,
    return
  }
  func.func @transform_0(%arg0: i32) -> (i32, i32) {
    %c0_i32 = arith.constant 0 : i32
    %c0_i32_0 = arith.constant 0 : i32
    return %arg0, %c0_i32 : i32, i32
  }
  func.func @transform_1(%arg0: i32) -> (i32, i32) {
    %c0_i32 = arith.constant 0 : i32
    %c0_i32_0 = arith.constant 0 : i32
    %c0_i32_1 = arith.constant 0 : i32
    return %c0_i32, %c0_i32_0 : i32, i32
  }
  func.func @transform_2(%arg0: i32) -> (i32, i32) {
    %c0_i32 = arith.constant 0 : i32
    %c0_i32_0 = arith.constant 0 : i32
    %c0_i32_1 = arith.constant 0 : i32
    return %c0_i32, %c0_i32_0 : i32, i32
  }
  func.func @transform_3(%arg0: i32) -> (i32, i32) {
    %c0_i32 = arith.constant 0 : i32
    %c0_i32_0 = arith.constant 0 : i32
    return %arg0, %c0_i32 : i32, i32
  }
}

module attributes {stable_mosaic.version = 11 : i64} {
  func.func @_bidir_lstm_kernel(%arg0: i32, %arg1: memref<8x1xi32, #tpu.memory_space<vmem>>, %arg2: memref<8x8x512xf32, #tpu.memory_space<vmem>>, %arg3: memref<8x8x512xf32, #tpu.memory_space<vmem>>, %arg4: memref<128x512xbf16, #tpu.memory_space<vmem>>, %arg5: memref<128x512xbf16, #tpu.memory_space<vmem>>, %arg6: memref<8x8x128xf32, #tpu.memory_space<vmem>>, %arg7: memref<8x8x128xf32, #tpu.memory_space<vmem>>, %arg8: memref<8x128xf32, #tpu.memory_space<vmem>>, %arg9: memref<8x128xf32, #tpu.memory_space<vmem>>, %arg10: memref<8x128xf32, #tpu.memory_space<vmem>>, %arg11: memref<8x128xf32, #tpu.memory_space<vmem>>, %arg12: memref<8x128xf32, #tpu.memory_space<vmem>>, %arg13: memref<8x128xf32, #tpu.memory_space<vmem>>, %arg14: memref<8x128xf32, #tpu.memory_space<vmem>>, %arg15: memref<8x128xf32, #tpu.memory_space<vmem>>) attributes {dimension_semantics = [#tpu.dimension_semantics<arbitrary>], iteration_bounds = array<i64: 1>, scalar_prefetch = 0 : i64, scratch_operands = 4 : i64, tpu.core_type = #tpu.core_type<tc>, window_params = [{pipeline_mode = #tpu.pipeline_mode<synchronous>, transform_indices = @transform_0, window_bounds = array<i64: 8, 1>}, {transform_indices = @transform_1, window_bounds = array<i64: 8, 8, 512>}, {transform_indices = @transform_2, window_bounds = array<i64: 8, 8, 512>}, {pipeline_mode = #tpu.pipeline_mode<synchronous>, transform_indices = @transform_3, window_bounds = array<i64: 128, 512>}, {pipeline_mode = #tpu.pipeline_mode<synchronous>, transform_indices = @transform_4, window_bounds = array<i64: 128, 512>}, {transform_indices = @transform_5, window_bounds = array<i64: 8, 8, 128>}, {transform_indices = @transform_6, window_bounds = array<i64: 8, 8, 128>}, {pipeline_mode = #tpu.pipeline_mode<synchronous>, transform_indices = @transform_7, window_bounds = array<i64: 8, 128>}, {pipeline_mode = #tpu.pipeline_mode<synchronous>, transform_indices = @transform_8, window_bounds = array<i64: 8, 128>}, {pipeline_mode = #tpu.pipeline_mode<synchronous>, transform_indices = @transform_9, window_bounds = array<i64: 8, 128>}, {pipeline_mode = #tpu.pipeline_mode<synchronous>, transform_indices = @transform_10, window_bounds = array<i64: 8, 128>}]} {
    %c0_i32 = arith.constant 0 : i32
    %0 = arith.cmpi eq, %arg0, %c0_i32 : i32
    %1 = arith.extui %0 : i1 to i32
    %c0_i32_0 = arith.constant 0 : i32
    %2 = arith.cmpi ne, %1, %c0_i32_0 : i32
    scf.if %2 {
      %cst_207 = arith.constant 0.000000e+00 : f32
      %810 = vector.broadcast %cst_207 : f32 to vector<8x128xf32>
      %c0_208 = arith.constant 0 : index
      %c0_209 = arith.constant 0 : index
      %811 = vector.load %arg12[%c0_208, %c0_209] : memref<8x128xf32, #tpu.memory_space<vmem>>, vector<8x128xf32>
      tpu.vector_store %arg12[%c0_208, %c0_209], %810 {strides = array<i32>} : memref<8x128xf32, #tpu.memory_space<vmem>>, vector<8x128xf32>,
      %cst_210 = arith.constant 0.000000e+00 : f32
      %812 = vector.broadcast %cst_210 : f32 to vector<8x128xf32>
      %c0_211 = arith.constant 0 : index
      %c0_212 = arith.constant 0 : index
      %813 = vector.load %arg13[%c0_211, %c0_212] : memref<8x128xf32, #tpu.memory_space<vmem>>, vector<8x128xf32>
      tpu.vector_store %arg13[%c0_211, %c0_212], %812 {strides = array<i32>} : memref<8x128xf32, #tpu.memory_space<vmem>>, vector<8x128xf32>,
      %cst_213 = arith.constant 0.000000e+00 : f32
      %814 = vector.broadcast %cst_213 : f32 to vector<8x128xf32>
      %c0_214 = arith.constant 0 : index
      %c0_215 = arith.constant 0 : index
      %815 = vector.load %arg14[%c0_214, %c0_215] : memref<8x128xf32, #tpu.memory_space<vmem>>, vector<8x128xf32>
      tpu.vector_store %arg14[%c0_214, %c0_215], %814 {strides = array<i32>} : memref<8x128xf32, #tpu.memory_space<vmem>>, vector<8x128xf32>,
      %cst_216 = arith.constant 0.000000e+00 : f32
      %816 = vector.broadcast %cst_216 : f32 to vector<8x128xf32>
      %c0_217 = arith.constant 0 : index
      %c0_218 = arith.constant 0 : index
      %817 = vector.load %arg15[%c0_217, %c0_218] : memref<8x128xf32, #tpu.memory_space<vmem>>, vector<8x128xf32>
      tpu.vector_store %arg15[%c0_217, %c0_218], %816 {strides = array<i32>} : memref<8x128xf32, #tpu.memory_space<vmem>>, vector<8x128xf32>,
    } else {
    }
    %c0 = arith.constant 0 : index
    %c0_1 = arith.constant 0 : index
    %3 = vector.load %arg1[%c0, %c0_1] : memref<8x1xi32, #tpu.memory_space<vmem>>, vector<8x1xi32>
    %c8_i32 = arith.constant 8 : i32
    %4 = arith.muli %arg0, %c8_i32 : i32
    %c0_i32_2 = arith.constant 0 : i32
    %5 = arith.subi %c0_i32_2, %arg0 : i32
    %c8_i32_3 = arith.constant 8 : i32
    %6 = arith.muli %5, %c8_i32_3 : i32
    %c0_4 = arith.constant 0 : index
    %c0_5 = arith.constant 0 : index
    %7 = vector.load %arg12[%c0_4, %c0_5] : memref<8x128xf32, #tpu.memory_space<vmem>>, vector<8x128xf32>
    %c0_6 = arith.constant 0 : index
    %c0_7 = arith.constant 0 : index
    %8 = vector.load %arg13[%c0_6, %c0_7] : memref<8x128xf32, #tpu.memory_space<vmem>>, vector<8x128xf32>
    %c0_8 = arith.constant 0 : index
    %c0_9 = arith.constant 0 : index
    %9 = vector.load %arg14[%c0_8, %c0_9] : memref<8x128xf32, #tpu.memory_space<vmem>>, vector<8x128xf32>
    %c0_10 = arith.constant 0 : index
    %c0_11 = arith.constant 0 : index
    %10 = vector.load %arg15[%c0_10, %c0_11] : memref<8x128xf32, #tpu.memory_space<vmem>>, vector<8x128xf32>
    %c0_i32_12 = arith.constant 0 : i32
    %11 = arith.index_cast %c0_i32_12 : i32 to index
    %c0_13 = arith.constant 0 : index
    %c0_14 = arith.constant 0 : index
    %12 = vector.load %arg2[%11, %c0_13, %c0_14] : memref<8x8x512xf32, #tpu.memory_space<vmem>>, vector<1x8x512xf32>
    %13 = vector.shape_cast %12 : vector<1x8x512xf32> to vector<8x512xf32>
    %14 = arith.truncf %7 : vector<8x128xf32> to vector<8x128xbf16>
    %c0_15 = arith.constant 0 : index
    %c0_16 = arith.constant 0 : index
    %15 = vector.load %arg4[%c0_15, %c0_16] : memref<128x512xbf16, #tpu.memory_space<vmem>>, vector<128x512xbf16>
    %cst = arith.constant dense<0.000000e+00> : vector<8x512xf32>
    %16 = tpu.matmul %14, %15, %cst {dimension_numbers = #tpu.dot_dimension_numbers<[1], [0], [0], [1], [0, 0, 1, 1], [], []>} : vector<8x128xbf16>, vector<128x512xbf16>, vector<8x512xf32> -> vector<8x512xf32>
    %17 = arith.addf %13, %16 : vector<8x512xf32>
    %18 = vector.extract_strided_slice %17 {offsets = [0, 0], sizes = [8, 128], strides = [1, 1]} : vector<8x512xf32> to vector<8x128xf32>
    %19 = arith.negf %18 : vector<8x128xf32>
    %20 = math.exp %19 : vector<8x128xf32>
    %cst_17 = arith.constant 1.000000e+00 : f32
    %21 = vector.broadcast %cst_17 : f32 to vector<8x128xf32>
    %22 = arith.addf %21, %20 : vector<8x128xf32>
    %23 = arith.divf %21, %22 : vector<8x128xf32>
    %24 = vector.extract_strided_slice %17 {offsets = [0, 128], sizes = [8, 128], strides = [1, 1]} : vector<8x512xf32> to vector<8x128xf32>
    %25 = arith.negf %24 : vector<8x128xf32>
    %26 = math.exp %25 : vector<8x128xf32>
    %cst_18 = arith.constant 1.000000e+00 : f32
    %27 = vector.broadcast %cst_18 : f32 to vector<8x128xf32>
    %28 = arith.addf %27, %26 : vector<8x128xf32>
    %29 = arith.divf %27, %28 : vector<8x128xf32>
    %30 = vector.extract_strided_slice %17 {offsets = [0, 256], sizes = [8, 128], strides = [1, 1]} : vector<8x512xf32> to vector<8x128xf32>
    %31 = math.tanh %30 : vector<8x128xf32>
    %32 = vector.extract_strided_slice %17 {offsets = [0, 384], sizes = [8, 128], strides = [1, 1]} : vector<8x512xf32> to vector<8x128xf32>
    %33 = arith.negf %32 : vector<8x128xf32>
    %34 = math.exp %33 : vector<8x128xf32>
    %cst_19 = arith.constant 1.000000e+00 : f32
    %35 = vector.broadcast %cst_19 : f32 to vector<8x128xf32>
    %36 = arith.addf %35, %34 : vector<8x128xf32>
    %37 = arith.divf %35, %36 : vector<8x128xf32>
    %38 = arith.mulf %29, %8 : vector<8x128xf32>
    %39 = arith.mulf %23, %31 : vector<8x128xf32>
    %40 = arith.addf %38, %39 : vector<8x128xf32>
    %41 = math.tanh %40 : vector<8x128xf32>
    %42 = arith.mulf %37, %41 : vector<8x128xf32>
    %43 = arith.addi %4, %c0_i32_12 : i32
    %44 = vector.broadcast %43 : i32 to vector<8x1xi32>
    %45 = arith.cmpi slt, %44, %3 : vector<8x1xi32>
    %46 = vector.shape_cast %45 : vector<8x1xi1> to vector<8x1xi1>
    %47 = vector.broadcast %46 : vector<8x1xi1> to vector<8x128xi1>
    %48 = arith.select %47, %42, %7 : vector<8x128xi1>, vector<8x128xf32>
    %49 = vector.shape_cast %45 : vector<8x1xi1> to vector<8x1xi1>
    %50 = vector.broadcast %49 : vector<8x1xi1> to vector<8x128xi1>
    %51 = arith.select %50, %40, %8 : vector<8x128xi1>, vector<8x128xf32>
    %cst_20 = arith.constant 0.000000e+00 : f32
    %52 = vector.shape_cast %45 : vector<8x1xi1> to vector<8x1xi1>
    %53 = vector.broadcast %52 : vector<8x1xi1> to vector<8x128xi1>
    %54 = vector.broadcast %cst_20 : f32 to vector<8x128xf32>
    %55 = arith.select %53, %42, %54 : vector<8x128xi1>, vector<8x128xf32>
    %56 = arith.index_cast %c0_i32_12 : i32 to index
    %c0_21 = arith.constant 0 : index
    %c0_22 = arith.constant 0 : index
    %57 = vector.load %arg6[%56, %c0_21, %c0_22] : memref<8x8x128xf32, #tpu.memory_space<vmem>>, vector<1x8x128xf32>
    %58 = vector.shape_cast %57 : vector<1x8x128xf32> to vector<8x128xf32>
    %59 = vector.shape_cast %55 : vector<8x128xf32> to vector<1x8x128xf32>
    tpu.vector_store %arg6[%56, %c0_21, %c0_22], %59 {strides = array<i32>} : memref<8x8x128xf32, #tpu.memory_space<vmem>>, vector<1x8x128xf32>,
    %c7_i32 = arith.constant 7 : i32
    %60 = arith.subi %c7_i32, %c0_i32_12 : i32
    %61 = arith.index_cast %60 : i32 to index
    %c0_23 = arith.constant 0 : index
    %c0_24 = arith.constant 0 : index
    %62 = vector.load %arg3[%61, %c0_23, %c0_24] : memref<8x8x512xf32, #tpu.memory_space<vmem>>, vector<1x8x512xf32>
    %63 = vector.shape_cast %62 : vector<1x8x512xf32> to vector<8x512xf32>
    %64 = arith.truncf %9 : vector<8x128xf32> to vector<8x128xbf16>
    %c0_25 = arith.constant 0 : index
    %c0_26 = arith.constant 0 : index
    %65 = vector.load %arg5[%c0_25, %c0_26] : memref<128x512xbf16, #tpu.memory_space<vmem>>, vector<128x512xbf16>
    %cst_27 = arith.constant dense<0.000000e+00> : vector<8x512xf32>
    %66 = tpu.matmul %64, %65, %cst_27 {dimension_numbers = #tpu.dot_dimension_numbers<[1], [0], [0], [1], [0, 0, 1, 1], [], []>} : vector<8x128xbf16>, vector<128x512xbf16>, vector<8x512xf32> -> vector<8x512xf32>
    %67 = arith.addf %63, %66 : vector<8x512xf32>
    %68 = vector.extract_strided_slice %67 {offsets = [0, 0], sizes = [8, 128], strides = [1, 1]} : vector<8x512xf32> to vector<8x128xf32>
    %69 = arith.negf %68 : vector<8x128xf32>
    %70 = math.exp %69 : vector<8x128xf32>
    %cst_28 = arith.constant 1.000000e+00 : f32
    %71 = vector.broadcast %cst_28 : f32 to vector<8x128xf32>
    %72 = arith.addf %71, %70 : vector<8x128xf32>
    %73 = arith.divf %71, %72 : vector<8x128xf32>
    %74 = vector.extract_strided_slice %67 {offsets = [0, 128], sizes = [8, 128], strides = [1, 1]} : vector<8x512xf32> to vector<8x128xf32>
    %75 = arith.negf %74 : vector<8x128xf32>
    %76 = math.exp %75 : vector<8x128xf32>
    %cst_29 = arith.constant 1.000000e+00 : f32
    %77 = vector.broadcast %cst_29 : f32 to vector<8x128xf32>
    %78 = arith.addf %77, %76 : vector<8x128xf32>
    %79 = arith.divf %77, %78 : vector<8x128xf32>
    %80 = vector.extract_strided_slice %67 {offsets = [0, 256], sizes = [8, 128], strides = [1, 1]} : vector<8x512xf32> to vector<8x128xf32>
    %81 = math.tanh %80 : vector<8x128xf32>
    %82 = vector.extract_strided_slice %67 {offsets = [0, 384], sizes = [8, 128], strides = [1, 1]} : vector<8x512xf32> to vector<8x128xf32>
    %83 = arith.negf %82 : vector<8x128xf32>
    %84 = math.exp %83 : vector<8x128xf32>
    %cst_30 = arith.constant 1.000000e+00 : f32
    %85 = vector.broadcast %cst_30 : f32 to vector<8x128xf32>
    %86 = arith.addf %85, %84 : vector<8x128xf32>
    %87 = arith.divf %85, %86 : vector<8x128xf32>
    %88 = arith.mulf %79, %10 : vector<8x128xf32>
    %89 = arith.mulf %73, %81 : vector<8x128xf32>
    %90 = arith.addf %88, %89 : vector<8x128xf32>
    %91 = math.tanh %90 : vector<8x128xf32>
    %92 = arith.mulf %87, %91 : vector<8x128xf32>
    %93 = arith.addi %6, %60 : i32
    %94 = vector.broadcast %93 : i32 to vector<8x1xi32>
    %95 = arith.cmpi slt, %94, %3 : vector<8x1xi32>
    %96 = vector.shape_cast %95 : vector<8x1xi1> to vector<8x1xi1>
    %97 = vector.broadcast %96 : vector<8x1xi1> to vector<8x128xi1>
    %98 = arith.select %97, %92, %9 : vector<8x128xi1>, vector<8x128xf32>
    %99 = vector.shape_cast %95 : vector<8x1xi1> to vector<8x1xi1>
    %100 = vector.broadcast %99 : vector<8x1xi1> to vector<8x128xi1>
    %101 = arith.select %100, %90, %10 : vector<8x128xi1>, vector<8x128xf32>
    %cst_31 = arith.constant 0.000000e+00 : f32
    %102 = vector.shape_cast %95 : vector<8x1xi1> to vector<8x1xi1>
    %103 = vector.broadcast %102 : vector<8x1xi1> to vector<8x128xi1>
    %104 = vector.broadcast %cst_31 : f32 to vector<8x128xf32>
    %105 = arith.select %103, %92, %104 : vector<8x128xi1>, vector<8x128xf32>
    %106 = arith.index_cast %60 : i32 to index
    %c0_32 = arith.constant 0 : index
    %c0_33 = arith.constant 0 : index
    %107 = vector.load %arg7[%106, %c0_32, %c0_33] : memref<8x8x128xf32, #tpu.memory_space<vmem>>, vector<1x8x128xf32>
    %108 = vector.shape_cast %107 : vector<1x8x128xf32> to vector<8x128xf32>
    %109 = vector.shape_cast %105 : vector<8x128xf32> to vector<1x8x128xf32>
    tpu.vector_store %arg7[%106, %c0_32, %c0_33], %109 {strides = array<i32>} : memref<8x8x128xf32, #tpu.memory_space<vmem>>, vector<1x8x128xf32>,
    %c1_i32 = arith.constant 1 : i32
    %110 = arith.index_cast %c1_i32 : i32 to index
    %c0_34 = arith.constant 0 : index
    %c0_35 = arith.constant 0 : index
    %111 = vector.load %arg2[%110, %c0_34, %c0_35] : memref<8x8x512xf32, #tpu.memory_space<vmem>>, vector<1x8x512xf32>
    %112 = vector.shape_cast %111 : vector<1x8x512xf32> to vector<8x512xf32>
    %113 = arith.truncf %48 : vector<8x128xf32> to vector<8x128xbf16>
    %c0_36 = arith.constant 0 : index
    %c0_37 = arith.constant 0 : index
    %114 = vector.load %arg4[%c0_36, %c0_37] : memref<128x512xbf16, #tpu.memory_space<vmem>>, vector<128x512xbf16>
    %cst_38 = arith.constant dense<0.000000e+00> : vector<8x512xf32>
    %115 = tpu.matmul %113, %114, %cst_38 {dimension_numbers = #tpu.dot_dimension_numbers<[1], [0], [0], [1], [0, 0, 1, 1], [], []>} : vector<8x128xbf16>, vector<128x512xbf16>, vector<8x512xf32> -> vector<8x512xf32>
    %116 = arith.addf %112, %115 : vector<8x512xf32>
    %117 = vector.extract_strided_slice %116 {offsets = [0, 0], sizes = [8, 128], strides = [1, 1]} : vector<8x512xf32> to vector<8x128xf32>
    %118 = arith.negf %117 : vector<8x128xf32>
    %119 = math.exp %118 : vector<8x128xf32>
    %cst_39 = arith.constant 1.000000e+00 : f32
    %120 = vector.broadcast %cst_39 : f32 to vector<8x128xf32>
    %121 = arith.addf %120, %119 : vector<8x128xf32>
    %122 = arith.divf %120, %121 : vector<8x128xf32>
    %123 = vector.extract_strided_slice %116 {offsets = [0, 128], sizes = [8, 128], strides = [1, 1]} : vector<8x512xf32> to vector<8x128xf32>
    %124 = arith.negf %123 : vector<8x128xf32>
    %125 = math.exp %124 : vector<8x128xf32>
    %cst_40 = arith.constant 1.000000e+00 : f32
    %126 = vector.broadcast %cst_40 : f32 to vector<8x128xf32>
    %127 = arith.addf %126, %125 : vector<8x128xf32>
    %128 = arith.divf %126, %127 : vector<8x128xf32>
    %129 = vector.extract_strided_slice %116 {offsets = [0, 256], sizes = [8, 128], strides = [1, 1]} : vector<8x512xf32> to vector<8x128xf32>
    %130 = math.tanh %129 : vector<8x128xf32>
    %131 = vector.extract_strided_slice %116 {offsets = [0, 384], sizes = [8, 128], strides = [1, 1]} : vector<8x512xf32> to vector<8x128xf32>
    %132 = arith.negf %131 : vector<8x128xf32>
    %133 = math.exp %132 : vector<8x128xf32>
    %cst_41 = arith.constant 1.000000e+00 : f32
    %134 = vector.broadcast %cst_41 : f32 to vector<8x128xf32>
    %135 = arith.addf %134, %133 : vector<8x128xf32>
    %136 = arith.divf %134, %135 : vector<8x128xf32>
    %137 = arith.mulf %128, %51 : vector<8x128xf32>
    %138 = arith.mulf %122, %130 : vector<8x128xf32>
    %139 = arith.addf %137, %138 : vector<8x128xf32>
    %140 = math.tanh %139 : vector<8x128xf32>
    %141 = arith.mulf %136, %140 : vector<8x128xf32>
    %142 = arith.addi %4, %c1_i32 : i32
    %143 = vector.broadcast %142 : i32 to vector<8x1xi32>
    %144 = arith.cmpi slt, %143, %3 : vector<8x1xi32>
    %145 = vector.shape_cast %144 : vector<8x1xi1> to vector<8x1xi1>
    %146 = vector.broadcast %145 : vector<8x1xi1> to vector<8x128xi1>
    %147 = arith.select %146, %141, %48 : vector<8x128xi1>, vector<8x128xf32>
    %148 = vector.shape_cast %144 : vector<8x1xi1> to vector<8x1xi1>
    %149 = vector.broadcast %148 : vector<8x1xi1> to vector<8x128xi1>
    %150 = arith.select %149, %139, %51 : vector<8x128xi1>, vector<8x128xf32>
    %cst_42 = arith.constant 0.000000e+00 : f32
    %151 = vector.shape_cast %144 : vector<8x1xi1> to vector<8x1xi1>
    %152 = vector.broadcast %151 : vector<8x1xi1> to vector<8x128xi1>
    %153 = vector.broadcast %cst_42 : f32 to vector<8x128xf32>
    %154 = arith.select %152, %141, %153 : vector<8x128xi1>, vector<8x128xf32>
    %155 = arith.index_cast %c1_i32 : i32 to index
    %c0_43 = arith.constant 0 : index
    %c0_44 = arith.constant 0 : index
    %156 = vector.load %arg6[%155, %c0_43, %c0_44] : memref<8x8x128xf32, #tpu.memory_space<vmem>>, vector<1x8x128xf32>
    %157 = vector.shape_cast %156 : vector<1x8x128xf32> to vector<8x128xf32>
    %158 = vector.shape_cast %154 : vector<8x128xf32> to vector<1x8x128xf32>
    tpu.vector_store %arg6[%155, %c0_43, %c0_44], %158 {strides = array<i32>} : memref<8x8x128xf32, #tpu.memory_space<vmem>>, vector<1x8x128xf32>,
    %c7_i32_45 = arith.constant 7 : i32
    %159 = arith.subi %c7_i32_45, %c1_i32 : i32
    %160 = arith.index_cast %159 : i32 to index
    %c0_46 = arith.constant 0 : index
    %c0_47 = arith.constant 0 : index
    %161 = vector.load %arg3[%160, %c0_46, %c0_47] : memref<8x8x512xf32, #tpu.memory_space<vmem>>, vector<1x8x512xf32>
    %162 = vector.shape_cast %161 : vector<1x8x512xf32> to vector<8x512xf32>
    %163 = arith.truncf %98 : vector<8x128xf32> to vector<8x128xbf16>
    %c0_48 = arith.constant 0 : index
    %c0_49 = arith.constant 0 : index
    %164 = vector.load %arg5[%c0_48, %c0_49] : memref<128x512xbf16, #tpu.memory_space<vmem>>, vector<128x512xbf16>
    %cst_50 = arith.constant dense<0.000000e+00> : vector<8x512xf32>
    %165 = tpu.matmul %163, %164, %cst_50 {dimension_numbers = #tpu.dot_dimension_numbers<[1], [0], [0], [1], [0, 0, 1, 1], [], []>} : vector<8x128xbf16>, vector<128x512xbf16>, vector<8x512xf32> -> vector<8x512xf32>
    %166 = arith.addf %162, %165 : vector<8x512xf32>
    %167 = vector.extract_strided_slice %166 {offsets = [0, 0], sizes = [8, 128], strides = [1, 1]} : vector<8x512xf32> to vector<8x128xf32>
    %168 = arith.negf %167 : vector<8x128xf32>
    %169 = math.exp %168 : vector<8x128xf32>
    %cst_51 = arith.constant 1.000000e+00 : f32
    %170 = vector.broadcast %cst_51 : f32 to vector<8x128xf32>
    %171 = arith.addf %170, %169 : vector<8x128xf32>
    %172 = arith.divf %170, %171 : vector<8x128xf32>
    %173 = vector.extract_strided_slice %166 {offsets = [0, 128], sizes = [8, 128], strides = [1, 1]} : vector<8x512xf32> to vector<8x128xf32>
    %174 = arith.negf %173 : vector<8x128xf32>
    %175 = math.exp %174 : vector<8x128xf32>
    %cst_52 = arith.constant 1.000000e+00 : f32
    %176 = vector.broadcast %cst_52 : f32 to vector<8x128xf32>
    %177 = arith.addf %176, %175 : vector<8x128xf32>
    %178 = arith.divf %176, %177 : vector<8x128xf32>
    %179 = vector.extract_strided_slice %166 {offsets = [0, 256], sizes = [8, 128], strides = [1, 1]} : vector<8x512xf32> to vector<8x128xf32>
    %180 = math.tanh %179 : vector<8x128xf32>
    %181 = vector.extract_strided_slice %166 {offsets = [0, 384], sizes = [8, 128], strides = [1, 1]} : vector<8x512xf32> to vector<8x128xf32>
    %182 = arith.negf %181 : vector<8x128xf32>
    %183 = math.exp %182 : vector<8x128xf32>
    %cst_53 = arith.constant 1.000000e+00 : f32
    %184 = vector.broadcast %cst_53 : f32 to vector<8x128xf32>
    %185 = arith.addf %184, %183 : vector<8x128xf32>
    %186 = arith.divf %184, %185 : vector<8x128xf32>
    %187 = arith.mulf %178, %101 : vector<8x128xf32>
    %188 = arith.mulf %172, %180 : vector<8x128xf32>
    %189 = arith.addf %187, %188 : vector<8x128xf32>
    %190 = math.tanh %189 : vector<8x128xf32>
    %191 = arith.mulf %186, %190 : vector<8x128xf32>
    %192 = arith.addi %6, %159 : i32
    %193 = vector.broadcast %192 : i32 to vector<8x1xi32>
    %194 = arith.cmpi slt, %193, %3 : vector<8x1xi32>
    %195 = vector.shape_cast %194 : vector<8x1xi1> to vector<8x1xi1>
    %196 = vector.broadcast %195 : vector<8x1xi1> to vector<8x128xi1>
    %197 = arith.select %196, %191, %98 : vector<8x128xi1>, vector<8x128xf32>
    %198 = vector.shape_cast %194 : vector<8x1xi1> to vector<8x1xi1>
    %199 = vector.broadcast %198 : vector<8x1xi1> to vector<8x128xi1>
    %200 = arith.select %199, %189, %101 : vector<8x128xi1>, vector<8x128xf32>
    %cst_54 = arith.constant 0.000000e+00 : f32
    %201 = vector.shape_cast %194 : vector<8x1xi1> to vector<8x1xi1>
    %202 = vector.broadcast %201 : vector<8x1xi1> to vector<8x128xi1>
    %203 = vector.broadcast %cst_54 : f32 to vector<8x128xf32>
    %204 = arith.select %202, %191, %203 : vector<8x128xi1>, vector<8x128xf32>
    %205 = arith.index_cast %159 : i32 to index
    %c0_55 = arith.constant 0 : index
    %c0_56 = arith.constant 0 : index
    %206 = vector.load %arg7[%205, %c0_55, %c0_56] : memref<8x8x128xf32, #tpu.memory_space<vmem>>, vector<1x8x128xf32>
    %207 = vector.shape_cast %206 : vector<1x8x128xf32> to vector<8x128xf32>
    %208 = vector.shape_cast %204 : vector<8x128xf32> to vector<1x8x128xf32>
    tpu.vector_store %arg7[%205, %c0_55, %c0_56], %208 {strides = array<i32>} : memref<8x8x128xf32, #tpu.memory_space<vmem>>, vector<1x8x128xf32>,
    %c2_i32 = arith.constant 2 : i32
    %209 = arith.index_cast %c2_i32 : i32 to index
    %c0_57 = arith.constant 0 : index
    %c0_58 = arith.constant 0 : index
    %210 = vector.load %arg2[%209, %c0_57, %c0_58] : memref<8x8x512xf32, #tpu.memory_space<vmem>>, vector<1x8x512xf32>
    %211 = vector.shape_cast %210 : vector<1x8x512xf32> to vector<8x512xf32>
    %212 = arith.truncf %147 : vector<8x128xf32> to vector<8x128xbf16>
    %c0_59 = arith.constant 0 : index
    %c0_60 = arith.constant 0 : index
    %213 = vector.load %arg4[%c0_59, %c0_60] : memref<128x512xbf16, #tpu.memory_space<vmem>>, vector<128x512xbf16>
    %cst_61 = arith.constant dense<0.000000e+00> : vector<8x512xf32>
    %214 = tpu.matmul %212, %213, %cst_61 {dimension_numbers = #tpu.dot_dimension_numbers<[1], [0], [0], [1], [0, 0, 1, 1], [], []>} : vector<8x128xbf16>, vector<128x512xbf16>, vector<8x512xf32> -> vector<8x512xf32>
    %215 = arith.addf %211, %214 : vector<8x512xf32>
    %216 = vector.extract_strided_slice %215 {offsets = [0, 0], sizes = [8, 128], strides = [1, 1]} : vector<8x512xf32> to vector<8x128xf32>
    %217 = arith.negf %216 : vector<8x128xf32>
    %218 = math.exp %217 : vector<8x128xf32>
    %cst_62 = arith.constant 1.000000e+00 : f32
    %219 = vector.broadcast %cst_62 : f32 to vector<8x128xf32>
    %220 = arith.addf %219, %218 : vector<8x128xf32>
    %221 = arith.divf %219, %220 : vector<8x128xf32>
    %222 = vector.extract_strided_slice %215 {offsets = [0, 128], sizes = [8, 128], strides = [1, 1]} : vector<8x512xf32> to vector<8x128xf32>
    %223 = arith.negf %222 : vector<8x128xf32>
    %224 = math.exp %223 : vector<8x128xf32>
    %cst_63 = arith.constant 1.000000e+00 : f32
    %225 = vector.broadcast %cst_63 : f32 to vector<8x128xf32>
    %226 = arith.addf %225, %224 : vector<8x128xf32>
    %227 = arith.divf %225, %226 : vector<8x128xf32>
    %228 = vector.extract_strided_slice %215 {offsets = [0, 256], sizes = [8, 128], strides = [1, 1]} : vector<8x512xf32> to vector<8x128xf32>
    %229 = math.tanh %228 : vector<8x128xf32>
    %230 = vector.extract_strided_slice %215 {offsets = [0, 384], sizes = [8, 128], strides = [1, 1]} : vector<8x512xf32> to vector<8x128xf32>
    %231 = arith.negf %230 : vector<8x128xf32>
    %232 = math.exp %231 : vector<8x128xf32>
    %cst_64 = arith.constant 1.000000e+00 : f32
    %233 = vector.broadcast %cst_64 : f32 to vector<8x128xf32>
    %234 = arith.addf %233, %232 : vector<8x128xf32>
    %235 = arith.divf %233, %234 : vector<8x128xf32>
    %236 = arith.mulf %227, %150 : vector<8x128xf32>
    %237 = arith.mulf %221, %229 : vector<8x128xf32>
    %238 = arith.addf %236, %237 : vector<8x128xf32>
    %239 = math.tanh %238 : vector<8x128xf32>
    %240 = arith.mulf %235, %239 : vector<8x128xf32>
    %241 = arith.addi %4, %c2_i32 : i32
    %242 = vector.broadcast %241 : i32 to vector<8x1xi32>
    %243 = arith.cmpi slt, %242, %3 : vector<8x1xi32>
    %244 = vector.shape_cast %243 : vector<8x1xi1> to vector<8x1xi1>
    %245 = vector.broadcast %244 : vector<8x1xi1> to vector<8x128xi1>
    %246 = arith.select %245, %240, %147 : vector<8x128xi1>, vector<8x128xf32>
    %247 = vector.shape_cast %243 : vector<8x1xi1> to vector<8x1xi1>
    %248 = vector.broadcast %247 : vector<8x1xi1> to vector<8x128xi1>
    %249 = arith.select %248, %238, %150 : vector<8x128xi1>, vector<8x128xf32>
    %cst_65 = arith.constant 0.000000e+00 : f32
    %250 = vector.shape_cast %243 : vector<8x1xi1> to vector<8x1xi1>
    %251 = vector.broadcast %250 : vector<8x1xi1> to vector<8x128xi1>
    %252 = vector.broadcast %cst_65 : f32 to vector<8x128xf32>
    %253 = arith.select %251, %240, %252 : vector<8x128xi1>, vector<8x128xf32>
    %254 = arith.index_cast %c2_i32 : i32 to index
    %c0_66 = arith.constant 0 : index
    %c0_67 = arith.constant 0 : index
    %255 = vector.load %arg6[%254, %c0_66, %c0_67] : memref<8x8x128xf32, #tpu.memory_space<vmem>>, vector<1x8x128xf32>
    %256 = vector.shape_cast %255 : vector<1x8x128xf32> to vector<8x128xf32>
    %257 = vector.shape_cast %253 : vector<8x128xf32> to vector<1x8x128xf32>
    tpu.vector_store %arg6[%254, %c0_66, %c0_67], %257 {strides = array<i32>} : memref<8x8x128xf32, #tpu.memory_space<vmem>>, vector<1x8x128xf32>,
    %c7_i32_68 = arith.constant 7 : i32
    %258 = arith.subi %c7_i32_68, %c2_i32 : i32
    %259 = arith.index_cast %258 : i32 to index
    %c0_69 = arith.constant 0 : index
    %c0_70 = arith.constant 0 : index
    %260 = vector.load %arg3[%259, %c0_69, %c0_70] : memref<8x8x512xf32, #tpu.memory_space<vmem>>, vector<1x8x512xf32>
    %261 = vector.shape_cast %260 : vector<1x8x512xf32> to vector<8x512xf32>
    %262 = arith.truncf %197 : vector<8x128xf32> to vector<8x128xbf16>
    %c0_71 = arith.constant 0 : index
    %c0_72 = arith.constant 0 : index
    %263 = vector.load %arg5[%c0_71, %c0_72] : memref<128x512xbf16, #tpu.memory_space<vmem>>, vector<128x512xbf16>
    %cst_73 = arith.constant dense<0.000000e+00> : vector<8x512xf32>
    %264 = tpu.matmul %262, %263, %cst_73 {dimension_numbers = #tpu.dot_dimension_numbers<[1], [0], [0], [1], [0, 0, 1, 1], [], []>} : vector<8x128xbf16>, vector<128x512xbf16>, vector<8x512xf32> -> vector<8x512xf32>
    %265 = arith.addf %261, %264 : vector<8x512xf32>
    %266 = vector.extract_strided_slice %265 {offsets = [0, 0], sizes = [8, 128], strides = [1, 1]} : vector<8x512xf32> to vector<8x128xf32>
    %267 = arith.negf %266 : vector<8x128xf32>
    %268 = math.exp %267 : vector<8x128xf32>
    %cst_74 = arith.constant 1.000000e+00 : f32
    %269 = vector.broadcast %cst_74 : f32 to vector<8x128xf32>
    %270 = arith.addf %269, %268 : vector<8x128xf32>
    %271 = arith.divf %269, %270 : vector<8x128xf32>
    %272 = vector.extract_strided_slice %265 {offsets = [0, 128], sizes = [8, 128], strides = [1, 1]} : vector<8x512xf32> to vector<8x128xf32>
    %273 = arith.negf %272 : vector<8x128xf32>
    %274 = math.exp %273 : vector<8x128xf32>
    %cst_75 = arith.constant 1.000000e+00 : f32
    %275 = vector.broadcast %cst_75 : f32 to vector<8x128xf32>
    %276 = arith.addf %275, %274 : vector<8x128xf32>
    %277 = arith.divf %275, %276 : vector<8x128xf32>
    %278 = vector.extract_strided_slice %265 {offsets = [0, 256], sizes = [8, 128], strides = [1, 1]} : vector<8x512xf32> to vector<8x128xf32>
    %279 = math.tanh %278 : vector<8x128xf32>
    %280 = vector.extract_strided_slice %265 {offsets = [0, 384], sizes = [8, 128], strides = [1, 1]} : vector<8x512xf32> to vector<8x128xf32>
    %281 = arith.negf %280 : vector<8x128xf32>
    %282 = math.exp %281 : vector<8x128xf32>
    %cst_76 = arith.constant 1.000000e+00 : f32
    %283 = vector.broadcast %cst_76 : f32 to vector<8x128xf32>
    %284 = arith.addf %283, %282 : vector<8x128xf32>
    %285 = arith.divf %283, %284 : vector<8x128xf32>
    %286 = arith.mulf %277, %200 : vector<8x128xf32>
    %287 = arith.mulf %271, %279 : vector<8x128xf32>
    %288 = arith.addf %286, %287 : vector<8x128xf32>
    %289 = math.tanh %288 : vector<8x128xf32>
    %290 = arith.mulf %285, %289 : vector<8x128xf32>
    %291 = arith.addi %6, %258 : i32
    %292 = vector.broadcast %291 : i32 to vector<8x1xi32>
    %293 = arith.cmpi slt, %292, %3 : vector<8x1xi32>
    %294 = vector.shape_cast %293 : vector<8x1xi1> to vector<8x1xi1>
    %295 = vector.broadcast %294 : vector<8x1xi1> to vector<8x128xi1>
    %296 = arith.select %295, %290, %197 : vector<8x128xi1>, vector<8x128xf32>
    %297 = vector.shape_cast %293 : vector<8x1xi1> to vector<8x1xi1>
    %298 = vector.broadcast %297 : vector<8x1xi1> to vector<8x128xi1>
    %299 = arith.select %298, %288, %200 : vector<8x128xi1>, vector<8x128xf32>
    %cst_77 = arith.constant 0.000000e+00 : f32
    %300 = vector.shape_cast %293 : vector<8x1xi1> to vector<8x1xi1>
    %301 = vector.broadcast %300 : vector<8x1xi1> to vector<8x128xi1>
    %302 = vector.broadcast %cst_77 : f32 to vector<8x128xf32>
    %303 = arith.select %301, %290, %302 : vector<8x128xi1>, vector<8x128xf32>
    %304 = arith.index_cast %258 : i32 to index
    %c0_78 = arith.constant 0 : index
    %c0_79 = arith.constant 0 : index
    %305 = vector.load %arg7[%304, %c0_78, %c0_79] : memref<8x8x128xf32, #tpu.memory_space<vmem>>, vector<1x8x128xf32>
    %306 = vector.shape_cast %305 : vector<1x8x128xf32> to vector<8x128xf32>
    %307 = vector.shape_cast %303 : vector<8x128xf32> to vector<1x8x128xf32>
    tpu.vector_store %arg7[%304, %c0_78, %c0_79], %307 {strides = array<i32>} : memref<8x8x128xf32, #tpu.memory_space<vmem>>, vector<1x8x128xf32>,
    %c3_i32 = arith.constant 3 : i32
    %308 = arith.index_cast %c3_i32 : i32 to index
    %c0_80 = arith.constant 0 : index
    %c0_81 = arith.constant 0 : index
    %309 = vector.load %arg2[%308, %c0_80, %c0_81] : memref<8x8x512xf32, #tpu.memory_space<vmem>>, vector<1x8x512xf32>
    %310 = vector.shape_cast %309 : vector<1x8x512xf32> to vector<8x512xf32>
    %311 = arith.truncf %246 : vector<8x128xf32> to vector<8x128xbf16>
    %c0_82 = arith.constant 0 : index
    %c0_83 = arith.constant 0 : index
    %312 = vector.load %arg4[%c0_82, %c0_83] : memref<128x512xbf16, #tpu.memory_space<vmem>>, vector<128x512xbf16>
    %cst_84 = arith.constant dense<0.000000e+00> : vector<8x512xf32>
    %313 = tpu.matmul %311, %312, %cst_84 {dimension_numbers = #tpu.dot_dimension_numbers<[1], [0], [0], [1], [0, 0, 1, 1], [], []>} : vector<8x128xbf16>, vector<128x512xbf16>, vector<8x512xf32> -> vector<8x512xf32>
    %314 = arith.addf %310, %313 : vector<8x512xf32>
    %315 = vector.extract_strided_slice %314 {offsets = [0, 0], sizes = [8, 128], strides = [1, 1]} : vector<8x512xf32> to vector<8x128xf32>
    %316 = arith.negf %315 : vector<8x128xf32>
    %317 = math.exp %316 : vector<8x128xf32>
    %cst_85 = arith.constant 1.000000e+00 : f32
    %318 = vector.broadcast %cst_85 : f32 to vector<8x128xf32>
    %319 = arith.addf %318, %317 : vector<8x128xf32>
    %320 = arith.divf %318, %319 : vector<8x128xf32>
    %321 = vector.extract_strided_slice %314 {offsets = [0, 128], sizes = [8, 128], strides = [1, 1]} : vector<8x512xf32> to vector<8x128xf32>
    %322 = arith.negf %321 : vector<8x128xf32>
    %323 = math.exp %322 : vector<8x128xf32>
    %cst_86 = arith.constant 1.000000e+00 : f32
    %324 = vector.broadcast %cst_86 : f32 to vector<8x128xf32>
    %325 = arith.addf %324, %323 : vector<8x128xf32>
    %326 = arith.divf %324, %325 : vector<8x128xf32>
    %327 = vector.extract_strided_slice %314 {offsets = [0, 256], sizes = [8, 128], strides = [1, 1]} : vector<8x512xf32> to vector<8x128xf32>
    %328 = math.tanh %327 : vector<8x128xf32>
    %329 = vector.extract_strided_slice %314 {offsets = [0, 384], sizes = [8, 128], strides = [1, 1]} : vector<8x512xf32> to vector<8x128xf32>
    %330 = arith.negf %329 : vector<8x128xf32>
    %331 = math.exp %330 : vector<8x128xf32>
    %cst_87 = arith.constant 1.000000e+00 : f32
    %332 = vector.broadcast %cst_87 : f32 to vector<8x128xf32>
    %333 = arith.addf %332, %331 : vector<8x128xf32>
    %334 = arith.divf %332, %333 : vector<8x128xf32>
    %335 = arith.mulf %326, %249 : vector<8x128xf32>
    %336 = arith.mulf %320, %328 : vector<8x128xf32>
    %337 = arith.addf %335, %336 : vector<8x128xf32>
    %338 = math.tanh %337 : vector<8x128xf32>
    %339 = arith.mulf %334, %338 : vector<8x128xf32>
    %340 = arith.addi %4, %c3_i32 : i32
    %341 = vector.broadcast %340 : i32 to vector<8x1xi32>
    %342 = arith.cmpi slt, %341, %3 : vector<8x1xi32>
    %343 = vector.shape_cast %342 : vector<8x1xi1> to vector<8x1xi1>
    %344 = vector.broadcast %343 : vector<8x1xi1> to vector<8x128xi1>
    %345 = arith.select %344, %339, %246 : vector<8x128xi1>, vector<8x128xf32>
    %346 = vector.shape_cast %342 : vector<8x1xi1> to vector<8x1xi1>
    %347 = vector.broadcast %346 : vector<8x1xi1> to vector<8x128xi1>
    %348 = arith.select %347, %337, %249 : vector<8x128xi1>, vector<8x128xf32>
    %cst_88 = arith.constant 0.000000e+00 : f32
    %349 = vector.shape_cast %342 : vector<8x1xi1> to vector<8x1xi1>
    %350 = vector.broadcast %349 : vector<8x1xi1> to vector<8x128xi1>
    %351 = vector.broadcast %cst_88 : f32 to vector<8x128xf32>
    %352 = arith.select %350, %339, %351 : vector<8x128xi1>, vector<8x128xf32>
    %353 = arith.index_cast %c3_i32 : i32 to index
    %c0_89 = arith.constant 0 : index
    %c0_90 = arith.constant 0 : index
    %354 = vector.load %arg6[%353, %c0_89, %c0_90] : memref<8x8x128xf32, #tpu.memory_space<vmem>>, vector<1x8x128xf32>
    %355 = vector.shape_cast %354 : vector<1x8x128xf32> to vector<8x128xf32>
    %356 = vector.shape_cast %352 : vector<8x128xf32> to vector<1x8x128xf32>
    tpu.vector_store %arg6[%353, %c0_89, %c0_90], %356 {strides = array<i32>} : memref<8x8x128xf32, #tpu.memory_space<vmem>>, vector<1x8x128xf32>,
    %c7_i32_91 = arith.constant 7 : i32
    %357 = arith.subi %c7_i32_91, %c3_i32 : i32
    %358 = arith.index_cast %357 : i32 to index
    %c0_92 = arith.constant 0 : index
    %c0_93 = arith.constant 0 : index
    %359 = vector.load %arg3[%358, %c0_92, %c0_93] : memref<8x8x512xf32, #tpu.memory_space<vmem>>, vector<1x8x512xf32>
    %360 = vector.shape_cast %359 : vector<1x8x512xf32> to vector<8x512xf32>
    %361 = arith.truncf %296 : vector<8x128xf32> to vector<8x128xbf16>
    %c0_94 = arith.constant 0 : index
    %c0_95 = arith.constant 0 : index
    %362 = vector.load %arg5[%c0_94, %c0_95] : memref<128x512xbf16, #tpu.memory_space<vmem>>, vector<128x512xbf16>
    %cst_96 = arith.constant dense<0.000000e+00> : vector<8x512xf32>
    %363 = tpu.matmul %361, %362, %cst_96 {dimension_numbers = #tpu.dot_dimension_numbers<[1], [0], [0], [1], [0, 0, 1, 1], [], []>} : vector<8x128xbf16>, vector<128x512xbf16>, vector<8x512xf32> -> vector<8x512xf32>
    %364 = arith.addf %360, %363 : vector<8x512xf32>
    %365 = vector.extract_strided_slice %364 {offsets = [0, 0], sizes = [8, 128], strides = [1, 1]} : vector<8x512xf32> to vector<8x128xf32>
    %366 = arith.negf %365 : vector<8x128xf32>
    %367 = math.exp %366 : vector<8x128xf32>
    %cst_97 = arith.constant 1.000000e+00 : f32
    %368 = vector.broadcast %cst_97 : f32 to vector<8x128xf32>
    %369 = arith.addf %368, %367 : vector<8x128xf32>
    %370 = arith.divf %368, %369 : vector<8x128xf32>
    %371 = vector.extract_strided_slice %364 {offsets = [0, 128], sizes = [8, 128], strides = [1, 1]} : vector<8x512xf32> to vector<8x128xf32>
    %372 = arith.negf %371 : vector<8x128xf32>
    %373 = math.exp %372 : vector<8x128xf32>
    %cst_98 = arith.constant 1.000000e+00 : f32
    %374 = vector.broadcast %cst_98 : f32 to vector<8x128xf32>
    %375 = arith.addf %374, %373 : vector<8x128xf32>
    %376 = arith.divf %374, %375 : vector<8x128xf32>
    %377 = vector.extract_strided_slice %364 {offsets = [0, 256], sizes = [8, 128], strides = [1, 1]} : vector<8x512xf32> to vector<8x128xf32>
    %378 = math.tanh %377 : vector<8x128xf32>
    %379 = vector.extract_strided_slice %364 {offsets = [0, 384], sizes = [8, 128], strides = [1, 1]} : vector<8x512xf32> to vector<8x128xf32>
    %380 = arith.negf %379 : vector<8x128xf32>
    %381 = math.exp %380 : vector<8x128xf32>
    %cst_99 = arith.constant 1.000000e+00 : f32
    %382 = vector.broadcast %cst_99 : f32 to vector<8x128xf32>
    %383 = arith.addf %382, %381 : vector<8x128xf32>
    %384 = arith.divf %382, %383 : vector<8x128xf32>
    %385 = arith.mulf %376, %299 : vector<8x128xf32>
    %386 = arith.mulf %370, %378 : vector<8x128xf32>
    %387 = arith.addf %385, %386 : vector<8x128xf32>
    %388 = math.tanh %387 : vector<8x128xf32>
    %389 = arith.mulf %384, %388 : vector<8x128xf32>
    %390 = arith.addi %6, %357 : i32
    %391 = vector.broadcast %390 : i32 to vector<8x1xi32>
    %392 = arith.cmpi slt, %391, %3 : vector<8x1xi32>
    %393 = vector.shape_cast %392 : vector<8x1xi1> to vector<8x1xi1>
    %394 = vector.broadcast %393 : vector<8x1xi1> to vector<8x128xi1>
    %395 = arith.select %394, %389, %296 : vector<8x128xi1>, vector<8x128xf32>
    %396 = vector.shape_cast %392 : vector<8x1xi1> to vector<8x1xi1>
    %397 = vector.broadcast %396 : vector<8x1xi1> to vector<8x128xi1>
    %398 = arith.select %397, %387, %299 : vector<8x128xi1>, vector<8x128xf32>
    %cst_100 = arith.constant 0.000000e+00 : f32
    %399 = vector.shape_cast %392 : vector<8x1xi1> to vector<8x1xi1>
    %400 = vector.broadcast %399 : vector<8x1xi1> to vector<8x128xi1>
    %401 = vector.broadcast %cst_100 : f32 to vector<8x128xf32>
    %402 = arith.select %400, %389, %401 : vector<8x128xi1>, vector<8x128xf32>
    %403 = arith.index_cast %357 : i32 to index
    %c0_101 = arith.constant 0 : index
    %c0_102 = arith.constant 0 : index
    %404 = vector.load %arg7[%403, %c0_101, %c0_102] : memref<8x8x128xf32, #tpu.memory_space<vmem>>, vector<1x8x128xf32>
    %405 = vector.shape_cast %404 : vector<1x8x128xf32> to vector<8x128xf32>
    %406 = vector.shape_cast %402 : vector<8x128xf32> to vector<1x8x128xf32>
    tpu.vector_store %arg7[%403, %c0_101, %c0_102], %406 {strides = array<i32>} : memref<8x8x128xf32, #tpu.memory_space<vmem>>, vector<1x8x128xf32>,
    %c4_i32 = arith.constant 4 : i32
    %407 = arith.index_cast %c4_i32 : i32 to index
    %c0_103 = arith.constant 0 : index
    %c0_104 = arith.constant 0 : index
    %408 = vector.load %arg2[%407, %c0_103, %c0_104] : memref<8x8x512xf32, #tpu.memory_space<vmem>>, vector<1x8x512xf32>
    %409 = vector.shape_cast %408 : vector<1x8x512xf32> to vector<8x512xf32>
    %410 = arith.truncf %345 : vector<8x128xf32> to vector<8x128xbf16>
    %c0_105 = arith.constant 0 : index
    %c0_106 = arith.constant 0 : index
    %411 = vector.load %arg4[%c0_105, %c0_106] : memref<128x512xbf16, #tpu.memory_space<vmem>>, vector<128x512xbf16>
    %cst_107 = arith.constant dense<0.000000e+00> : vector<8x512xf32>
    %412 = tpu.matmul %410, %411, %cst_107 {dimension_numbers = #tpu.dot_dimension_numbers<[1], [0], [0], [1], [0, 0, 1, 1], [], []>} : vector<8x128xbf16>, vector<128x512xbf16>, vector<8x512xf32> -> vector<8x512xf32>
    %413 = arith.addf %409, %412 : vector<8x512xf32>
    %414 = vector.extract_strided_slice %413 {offsets = [0, 0], sizes = [8, 128], strides = [1, 1]} : vector<8x512xf32> to vector<8x128xf32>
    %415 = arith.negf %414 : vector<8x128xf32>
    %416 = math.exp %415 : vector<8x128xf32>
    %cst_108 = arith.constant 1.000000e+00 : f32
    %417 = vector.broadcast %cst_108 : f32 to vector<8x128xf32>
    %418 = arith.addf %417, %416 : vector<8x128xf32>
    %419 = arith.divf %417, %418 : vector<8x128xf32>
    %420 = vector.extract_strided_slice %413 {offsets = [0, 128], sizes = [8, 128], strides = [1, 1]} : vector<8x512xf32> to vector<8x128xf32>
    %421 = arith.negf %420 : vector<8x128xf32>
    %422 = math.exp %421 : vector<8x128xf32>
    %cst_109 = arith.constant 1.000000e+00 : f32
    %423 = vector.broadcast %cst_109 : f32 to vector<8x128xf32>
    %424 = arith.addf %423, %422 : vector<8x128xf32>
    %425 = arith.divf %423, %424 : vector<8x128xf32>
    %426 = vector.extract_strided_slice %413 {offsets = [0, 256], sizes = [8, 128], strides = [1, 1]} : vector<8x512xf32> to vector<8x128xf32>
    %427 = math.tanh %426 : vector<8x128xf32>
    %428 = vector.extract_strided_slice %413 {offsets = [0, 384], sizes = [8, 128], strides = [1, 1]} : vector<8x512xf32> to vector<8x128xf32>
    %429 = arith.negf %428 : vector<8x128xf32>
    %430 = math.exp %429 : vector<8x128xf32>
    %cst_110 = arith.constant 1.000000e+00 : f32
    %431 = vector.broadcast %cst_110 : f32 to vector<8x128xf32>
    %432 = arith.addf %431, %430 : vector<8x128xf32>
    %433 = arith.divf %431, %432 : vector<8x128xf32>
    %434 = arith.mulf %425, %348 : vector<8x128xf32>
    %435 = arith.mulf %419, %427 : vector<8x128xf32>
    %436 = arith.addf %434, %435 : vector<8x128xf32>
    %437 = math.tanh %436 : vector<8x128xf32>
    %438 = arith.mulf %433, %437 : vector<8x128xf32>
    %439 = arith.addi %4, %c4_i32 : i32
    %440 = vector.broadcast %439 : i32 to vector<8x1xi32>
    %441 = arith.cmpi slt, %440, %3 : vector<8x1xi32>
    %442 = vector.shape_cast %441 : vector<8x1xi1> to vector<8x1xi1>
    %443 = vector.broadcast %442 : vector<8x1xi1> to vector<8x128xi1>
    %444 = arith.select %443, %438, %345 : vector<8x128xi1>, vector<8x128xf32>
    %445 = vector.shape_cast %441 : vector<8x1xi1> to vector<8x1xi1>
    %446 = vector.broadcast %445 : vector<8x1xi1> to vector<8x128xi1>
    %447 = arith.select %446, %436, %348 : vector<8x128xi1>, vector<8x128xf32>
    %cst_111 = arith.constant 0.000000e+00 : f32
    %448 = vector.shape_cast %441 : vector<8x1xi1> to vector<8x1xi1>
    %449 = vector.broadcast %448 : vector<8x1xi1> to vector<8x128xi1>
    %450 = vector.broadcast %cst_111 : f32 to vector<8x128xf32>
    %451 = arith.select %449, %438, %450 : vector<8x128xi1>, vector<8x128xf32>
    %452 = arith.index_cast %c4_i32 : i32 to index
    %c0_112 = arith.constant 0 : index
    %c0_113 = arith.constant 0 : index
    %453 = vector.load %arg6[%452, %c0_112, %c0_113] : memref<8x8x128xf32, #tpu.memory_space<vmem>>, vector<1x8x128xf32>
    %454 = vector.shape_cast %453 : vector<1x8x128xf32> to vector<8x128xf32>
    %455 = vector.shape_cast %451 : vector<8x128xf32> to vector<1x8x128xf32>
    tpu.vector_store %arg6[%452, %c0_112, %c0_113], %455 {strides = array<i32>} : memref<8x8x128xf32, #tpu.memory_space<vmem>>, vector<1x8x128xf32>,
    %c7_i32_114 = arith.constant 7 : i32
    %456 = arith.subi %c7_i32_114, %c4_i32 : i32
    %457 = arith.index_cast %456 : i32 to index
    %c0_115 = arith.constant 0 : index
    %c0_116 = arith.constant 0 : index
    %458 = vector.load %arg3[%457, %c0_115, %c0_116] : memref<8x8x512xf32, #tpu.memory_space<vmem>>, vector<1x8x512xf32>
    %459 = vector.shape_cast %458 : vector<1x8x512xf32> to vector<8x512xf32>
    %460 = arith.truncf %395 : vector<8x128xf32> to vector<8x128xbf16>
    %c0_117 = arith.constant 0 : index
    %c0_118 = arith.constant 0 : index
    %461 = vector.load %arg5[%c0_117, %c0_118] : memref<128x512xbf16, #tpu.memory_space<vmem>>, vector<128x512xbf16>
    %cst_119 = arith.constant dense<0.000000e+00> : vector<8x512xf32>
    %462 = tpu.matmul %460, %461, %cst_119 {dimension_numbers = #tpu.dot_dimension_numbers<[1], [0], [0], [1], [0, 0, 1, 1], [], []>} : vector<8x128xbf16>, vector<128x512xbf16>, vector<8x512xf32> -> vector<8x512xf32>
    %463 = arith.addf %459, %462 : vector<8x512xf32>
    %464 = vector.extract_strided_slice %463 {offsets = [0, 0], sizes = [8, 128], strides = [1, 1]} : vector<8x512xf32> to vector<8x128xf32>
    %465 = arith.negf %464 : vector<8x128xf32>
    %466 = math.exp %465 : vector<8x128xf32>
    %cst_120 = arith.constant 1.000000e+00 : f32
    %467 = vector.broadcast %cst_120 : f32 to vector<8x128xf32>
    %468 = arith.addf %467, %466 : vector<8x128xf32>
    %469 = arith.divf %467, %468 : vector<8x128xf32>
    %470 = vector.extract_strided_slice %463 {offsets = [0, 128], sizes = [8, 128], strides = [1, 1]} : vector<8x512xf32> to vector<8x128xf32>
    %471 = arith.negf %470 : vector<8x128xf32>
    %472 = math.exp %471 : vector<8x128xf32>
    %cst_121 = arith.constant 1.000000e+00 : f32
    %473 = vector.broadcast %cst_121 : f32 to vector<8x128xf32>
    %474 = arith.addf %473, %472 : vector<8x128xf32>
    %475 = arith.divf %473, %474 : vector<8x128xf32>
    %476 = vector.extract_strided_slice %463 {offsets = [0, 256], sizes = [8, 128], strides = [1, 1]} : vector<8x512xf32> to vector<8x128xf32>
    %477 = math.tanh %476 : vector<8x128xf32>
    %478 = vector.extract_strided_slice %463 {offsets = [0, 384], sizes = [8, 128], strides = [1, 1]} : vector<8x512xf32> to vector<8x128xf32>
    %479 = arith.negf %478 : vector<8x128xf32>
    %480 = math.exp %479 : vector<8x128xf32>
    %cst_122 = arith.constant 1.000000e+00 : f32
    %481 = vector.broadcast %cst_122 : f32 to vector<8x128xf32>
    %482 = arith.addf %481, %480 : vector<8x128xf32>
    %483 = arith.divf %481, %482 : vector<8x128xf32>
    %484 = arith.mulf %475, %398 : vector<8x128xf32>
    %485 = arith.mulf %469, %477 : vector<8x128xf32>
    %486 = arith.addf %484, %485 : vector<8x128xf32>
    %487 = math.tanh %486 : vector<8x128xf32>
    %488 = arith.mulf %483, %487 : vector<8x128xf32>
    %489 = arith.addi %6, %456 : i32
    %490 = vector.broadcast %489 : i32 to vector<8x1xi32>
    %491 = arith.cmpi slt, %490, %3 : vector<8x1xi32>
    %492 = vector.shape_cast %491 : vector<8x1xi1> to vector<8x1xi1>
    %493 = vector.broadcast %492 : vector<8x1xi1> to vector<8x128xi1>
    %494 = arith.select %493, %488, %395 : vector<8x128xi1>, vector<8x128xf32>
    %495 = vector.shape_cast %491 : vector<8x1xi1> to vector<8x1xi1>
    %496 = vector.broadcast %495 : vector<8x1xi1> to vector<8x128xi1>
    %497 = arith.select %496, %486, %398 : vector<8x128xi1>, vector<8x128xf32>
    %cst_123 = arith.constant 0.000000e+00 : f32
    %498 = vector.shape_cast %491 : vector<8x1xi1> to vector<8x1xi1>
    %499 = vector.broadcast %498 : vector<8x1xi1> to vector<8x128xi1>
    %500 = vector.broadcast %cst_123 : f32 to vector<8x128xf32>
    %501 = arith.select %499, %488, %500 : vector<8x128xi1>, vector<8x128xf32>
    %502 = arith.index_cast %456 : i32 to index
    %c0_124 = arith.constant 0 : index
    %c0_125 = arith.constant 0 : index
    %503 = vector.load %arg7[%502, %c0_124, %c0_125] : memref<8x8x128xf32, #tpu.memory_space<vmem>>, vector<1x8x128xf32>
    %504 = vector.shape_cast %503 : vector<1x8x128xf32> to vector<8x128xf32>
    %505 = vector.shape_cast %501 : vector<8x128xf32> to vector<1x8x128xf32>
    tpu.vector_store %arg7[%502, %c0_124, %c0_125], %505 {strides = array<i32>} : memref<8x8x128xf32, #tpu.memory_space<vmem>>, vector<1x8x128xf32>,
    %c5_i32 = arith.constant 5 : i32
    %506 = arith.index_cast %c5_i32 : i32 to index
    %c0_126 = arith.constant 0 : index
    %c0_127 = arith.constant 0 : index
    %507 = vector.load %arg2[%506, %c0_126, %c0_127] : memref<8x8x512xf32, #tpu.memory_space<vmem>>, vector<1x8x512xf32>
    %508 = vector.shape_cast %507 : vector<1x8x512xf32> to vector<8x512xf32>
    %509 = arith.truncf %444 : vector<8x128xf32> to vector<8x128xbf16>
    %c0_128 = arith.constant 0 : index
    %c0_129 = arith.constant 0 : index
    %510 = vector.load %arg4[%c0_128, %c0_129] : memref<128x512xbf16, #tpu.memory_space<vmem>>, vector<128x512xbf16>
    %cst_130 = arith.constant dense<0.000000e+00> : vector<8x512xf32>
    %511 = tpu.matmul %509, %510, %cst_130 {dimension_numbers = #tpu.dot_dimension_numbers<[1], [0], [0], [1], [0, 0, 1, 1], [], []>} : vector<8x128xbf16>, vector<128x512xbf16>, vector<8x512xf32> -> vector<8x512xf32>
    %512 = arith.addf %508, %511 : vector<8x512xf32>
    %513 = vector.extract_strided_slice %512 {offsets = [0, 0], sizes = [8, 128], strides = [1, 1]} : vector<8x512xf32> to vector<8x128xf32>
    %514 = arith.negf %513 : vector<8x128xf32>
    %515 = math.exp %514 : vector<8x128xf32>
    %cst_131 = arith.constant 1.000000e+00 : f32
    %516 = vector.broadcast %cst_131 : f32 to vector<8x128xf32>
    %517 = arith.addf %516, %515 : vector<8x128xf32>
    %518 = arith.divf %516, %517 : vector<8x128xf32>
    %519 = vector.extract_strided_slice %512 {offsets = [0, 128], sizes = [8, 128], strides = [1, 1]} : vector<8x512xf32> to vector<8x128xf32>
    %520 = arith.negf %519 : vector<8x128xf32>
    %521 = math.exp %520 : vector<8x128xf32>
    %cst_132 = arith.constant 1.000000e+00 : f32
    %522 = vector.broadcast %cst_132 : f32 to vector<8x128xf32>
    %523 = arith.addf %522, %521 : vector<8x128xf32>
    %524 = arith.divf %522, %523 : vector<8x128xf32>
    %525 = vector.extract_strided_slice %512 {offsets = [0, 256], sizes = [8, 128], strides = [1, 1]} : vector<8x512xf32> to vector<8x128xf32>
    %526 = math.tanh %525 : vector<8x128xf32>
    %527 = vector.extract_strided_slice %512 {offsets = [0, 384], sizes = [8, 128], strides = [1, 1]} : vector<8x512xf32> to vector<8x128xf32>
    %528 = arith.negf %527 : vector<8x128xf32>
    %529 = math.exp %528 : vector<8x128xf32>
    %cst_133 = arith.constant 1.000000e+00 : f32
    %530 = vector.broadcast %cst_133 : f32 to vector<8x128xf32>
    %531 = arith.addf %530, %529 : vector<8x128xf32>
    %532 = arith.divf %530, %531 : vector<8x128xf32>
    %533 = arith.mulf %524, %447 : vector<8x128xf32>
    %534 = arith.mulf %518, %526 : vector<8x128xf32>
    %535 = arith.addf %533, %534 : vector<8x128xf32>
    %536 = math.tanh %535 : vector<8x128xf32>
    %537 = arith.mulf %532, %536 : vector<8x128xf32>
    %538 = arith.addi %4, %c5_i32 : i32
    %539 = vector.broadcast %538 : i32 to vector<8x1xi32>
    %540 = arith.cmpi slt, %539, %3 : vector<8x1xi32>
    %541 = vector.shape_cast %540 : vector<8x1xi1> to vector<8x1xi1>
    %542 = vector.broadcast %541 : vector<8x1xi1> to vector<8x128xi1>
    %543 = arith.select %542, %537, %444 : vector<8x128xi1>, vector<8x128xf32>
    %544 = vector.shape_cast %540 : vector<8x1xi1> to vector<8x1xi1>
    %545 = vector.broadcast %544 : vector<8x1xi1> to vector<8x128xi1>
    %546 = arith.select %545, %535, %447 : vector<8x128xi1>, vector<8x128xf32>
    %cst_134 = arith.constant 0.000000e+00 : f32
    %547 = vector.shape_cast %540 : vector<8x1xi1> to vector<8x1xi1>
    %548 = vector.broadcast %547 : vector<8x1xi1> to vector<8x128xi1>
    %549 = vector.broadcast %cst_134 : f32 to vector<8x128xf32>
    %550 = arith.select %548, %537, %549 : vector<8x128xi1>, vector<8x128xf32>
    %551 = arith.index_cast %c5_i32 : i32 to index
    %c0_135 = arith.constant 0 : index
    %c0_136 = arith.constant 0 : index
    %552 = vector.load %arg6[%551, %c0_135, %c0_136] : memref<8x8x128xf32, #tpu.memory_space<vmem>>, vector<1x8x128xf32>
    %553 = vector.shape_cast %552 : vector<1x8x128xf32> to vector<8x128xf32>
    %554 = vector.shape_cast %550 : vector<8x128xf32> to vector<1x8x128xf32>
    tpu.vector_store %arg6[%551, %c0_135, %c0_136], %554 {strides = array<i32>} : memref<8x8x128xf32, #tpu.memory_space<vmem>>, vector<1x8x128xf32>,
    %c7_i32_137 = arith.constant 7 : i32
    %555 = arith.subi %c7_i32_137, %c5_i32 : i32
    %556 = arith.index_cast %555 : i32 to index
    %c0_138 = arith.constant 0 : index
    %c0_139 = arith.constant 0 : index
    %557 = vector.load %arg3[%556, %c0_138, %c0_139] : memref<8x8x512xf32, #tpu.memory_space<vmem>>, vector<1x8x512xf32>
    %558 = vector.shape_cast %557 : vector<1x8x512xf32> to vector<8x512xf32>
    %559 = arith.truncf %494 : vector<8x128xf32> to vector<8x128xbf16>
    %c0_140 = arith.constant 0 : index
    %c0_141 = arith.constant 0 : index
    %560 = vector.load %arg5[%c0_140, %c0_141] : memref<128x512xbf16, #tpu.memory_space<vmem>>, vector<128x512xbf16>
    %cst_142 = arith.constant dense<0.000000e+00> : vector<8x512xf32>
    %561 = tpu.matmul %559, %560, %cst_142 {dimension_numbers = #tpu.dot_dimension_numbers<[1], [0], [0], [1], [0, 0, 1, 1], [], []>} : vector<8x128xbf16>, vector<128x512xbf16>, vector<8x512xf32> -> vector<8x512xf32>
    %562 = arith.addf %558, %561 : vector<8x512xf32>
    %563 = vector.extract_strided_slice %562 {offsets = [0, 0], sizes = [8, 128], strides = [1, 1]} : vector<8x512xf32> to vector<8x128xf32>
    %564 = arith.negf %563 : vector<8x128xf32>
    %565 = math.exp %564 : vector<8x128xf32>
    %cst_143 = arith.constant 1.000000e+00 : f32
    %566 = vector.broadcast %cst_143 : f32 to vector<8x128xf32>
    %567 = arith.addf %566, %565 : vector<8x128xf32>
    %568 = arith.divf %566, %567 : vector<8x128xf32>
    %569 = vector.extract_strided_slice %562 {offsets = [0, 128], sizes = [8, 128], strides = [1, 1]} : vector<8x512xf32> to vector<8x128xf32>
    %570 = arith.negf %569 : vector<8x128xf32>
    %571 = math.exp %570 : vector<8x128xf32>
    %cst_144 = arith.constant 1.000000e+00 : f32
    %572 = vector.broadcast %cst_144 : f32 to vector<8x128xf32>
    %573 = arith.addf %572, %571 : vector<8x128xf32>
    %574 = arith.divf %572, %573 : vector<8x128xf32>
    %575 = vector.extract_strided_slice %562 {offsets = [0, 256], sizes = [8, 128], strides = [1, 1]} : vector<8x512xf32> to vector<8x128xf32>
    %576 = math.tanh %575 : vector<8x128xf32>
    %577 = vector.extract_strided_slice %562 {offsets = [0, 384], sizes = [8, 128], strides = [1, 1]} : vector<8x512xf32> to vector<8x128xf32>
    %578 = arith.negf %577 : vector<8x128xf32>
    %579 = math.exp %578 : vector<8x128xf32>
    %cst_145 = arith.constant 1.000000e+00 : f32
    %580 = vector.broadcast %cst_145 : f32 to vector<8x128xf32>
    %581 = arith.addf %580, %579 : vector<8x128xf32>
    %582 = arith.divf %580, %581 : vector<8x128xf32>
    %583 = arith.mulf %574, %497 : vector<8x128xf32>
    %584 = arith.mulf %568, %576 : vector<8x128xf32>
    %585 = arith.addf %583, %584 : vector<8x128xf32>
    %586 = math.tanh %585 : vector<8x128xf32>
    %587 = arith.mulf %582, %586 : vector<8x128xf32>
    %588 = arith.addi %6, %555 : i32
    %589 = vector.broadcast %588 : i32 to vector<8x1xi32>
    %590 = arith.cmpi slt, %589, %3 : vector<8x1xi32>
    %591 = vector.shape_cast %590 : vector<8x1xi1> to vector<8x1xi1>
    %592 = vector.broadcast %591 : vector<8x1xi1> to vector<8x128xi1>
    %593 = arith.select %592, %587, %494 : vector<8x128xi1>, vector<8x128xf32>
    %594 = vector.shape_cast %590 : vector<8x1xi1> to vector<8x1xi1>
    %595 = vector.broadcast %594 : vector<8x1xi1> to vector<8x128xi1>
    %596 = arith.select %595, %585, %497 : vector<8x128xi1>, vector<8x128xf32>
    %cst_146 = arith.constant 0.000000e+00 : f32
    %597 = vector.shape_cast %590 : vector<8x1xi1> to vector<8x1xi1>
    %598 = vector.broadcast %597 : vector<8x1xi1> to vector<8x128xi1>
    %599 = vector.broadcast %cst_146 : f32 to vector<8x128xf32>
    %600 = arith.select %598, %587, %599 : vector<8x128xi1>, vector<8x128xf32>
    %601 = arith.index_cast %555 : i32 to index
    %c0_147 = arith.constant 0 : index
    %c0_148 = arith.constant 0 : index
    %602 = vector.load %arg7[%601, %c0_147, %c0_148] : memref<8x8x128xf32, #tpu.memory_space<vmem>>, vector<1x8x128xf32>
    %603 = vector.shape_cast %602 : vector<1x8x128xf32> to vector<8x128xf32>
    %604 = vector.shape_cast %600 : vector<8x128xf32> to vector<1x8x128xf32>
    tpu.vector_store %arg7[%601, %c0_147, %c0_148], %604 {strides = array<i32>} : memref<8x8x128xf32, #tpu.memory_space<vmem>>, vector<1x8x128xf32>,
    %c6_i32 = arith.constant 6 : i32
    %605 = arith.index_cast %c6_i32 : i32 to index
    %c0_149 = arith.constant 0 : index
    %c0_150 = arith.constant 0 : index
    %606 = vector.load %arg2[%605, %c0_149, %c0_150] : memref<8x8x512xf32, #tpu.memory_space<vmem>>, vector<1x8x512xf32>
    %607 = vector.shape_cast %606 : vector<1x8x512xf32> to vector<8x512xf32>
    %608 = arith.truncf %543 : vector<8x128xf32> to vector<8x128xbf16>
    %c0_151 = arith.constant 0 : index
    %c0_152 = arith.constant 0 : index
    %609 = vector.load %arg4[%c0_151, %c0_152] : memref<128x512xbf16, #tpu.memory_space<vmem>>, vector<128x512xbf16>
    %cst_153 = arith.constant dense<0.000000e+00> : vector<8x512xf32>
    %610 = tpu.matmul %608, %609, %cst_153 {dimension_numbers = #tpu.dot_dimension_numbers<[1], [0], [0], [1], [0, 0, 1, 1], [], []>} : vector<8x128xbf16>, vector<128x512xbf16>, vector<8x512xf32> -> vector<8x512xf32>
    %611 = arith.addf %607, %610 : vector<8x512xf32>
    %612 = vector.extract_strided_slice %611 {offsets = [0, 0], sizes = [8, 128], strides = [1, 1]} : vector<8x512xf32> to vector<8x128xf32>
    %613 = arith.negf %612 : vector<8x128xf32>
    %614 = math.exp %613 : vector<8x128xf32>
    %cst_154 = arith.constant 1.000000e+00 : f32
    %615 = vector.broadcast %cst_154 : f32 to vector<8x128xf32>
    %616 = arith.addf %615, %614 : vector<8x128xf32>
    %617 = arith.divf %615, %616 : vector<8x128xf32>
    %618 = vector.extract_strided_slice %611 {offsets = [0, 128], sizes = [8, 128], strides = [1, 1]} : vector<8x512xf32> to vector<8x128xf32>
    %619 = arith.negf %618 : vector<8x128xf32>
    %620 = math.exp %619 : vector<8x128xf32>
    %cst_155 = arith.constant 1.000000e+00 : f32
    %621 = vector.broadcast %cst_155 : f32 to vector<8x128xf32>
    %622 = arith.addf %621, %620 : vector<8x128xf32>
    %623 = arith.divf %621, %622 : vector<8x128xf32>
    %624 = vector.extract_strided_slice %611 {offsets = [0, 256], sizes = [8, 128], strides = [1, 1]} : vector<8x512xf32> to vector<8x128xf32>
    %625 = math.tanh %624 : vector<8x128xf32>
    %626 = vector.extract_strided_slice %611 {offsets = [0, 384], sizes = [8, 128], strides = [1, 1]} : vector<8x512xf32> to vector<8x128xf32>
    %627 = arith.negf %626 : vector<8x128xf32>
    %628 = math.exp %627 : vector<8x128xf32>
    %cst_156 = arith.constant 1.000000e+00 : f32
    %629 = vector.broadcast %cst_156 : f32 to vector<8x128xf32>
    %630 = arith.addf %629, %628 : vector<8x128xf32>
    %631 = arith.divf %629, %630 : vector<8x128xf32>
    %632 = arith.mulf %623, %546 : vector<8x128xf32>
    %633 = arith.mulf %617, %625 : vector<8x128xf32>
    %634 = arith.addf %632, %633 : vector<8x128xf32>
    %635 = math.tanh %634 : vector<8x128xf32>
    %636 = arith.mulf %631, %635 : vector<8x128xf32>
    %637 = arith.addi %4, %c6_i32 : i32
    %638 = vector.broadcast %637 : i32 to vector<8x1xi32>
    %639 = arith.cmpi slt, %638, %3 : vector<8x1xi32>
    %640 = vector.shape_cast %639 : vector<8x1xi1> to vector<8x1xi1>
    %641 = vector.broadcast %640 : vector<8x1xi1> to vector<8x128xi1>
    %642 = arith.select %641, %636, %543 : vector<8x128xi1>, vector<8x128xf32>
    %643 = vector.shape_cast %639 : vector<8x1xi1> to vector<8x1xi1>
    %644 = vector.broadcast %643 : vector<8x1xi1> to vector<8x128xi1>
    %645 = arith.select %644, %634, %546 : vector<8x128xi1>, vector<8x128xf32>
    %cst_157 = arith.constant 0.000000e+00 : f32
    %646 = vector.shape_cast %639 : vector<8x1xi1> to vector<8x1xi1>
    %647 = vector.broadcast %646 : vector<8x1xi1> to vector<8x128xi1>
    %648 = vector.broadcast %cst_157 : f32 to vector<8x128xf32>
    %649 = arith.select %647, %636, %648 : vector<8x128xi1>, vector<8x128xf32>
    %650 = arith.index_cast %c6_i32 : i32 to index
    %c0_158 = arith.constant 0 : index
    %c0_159 = arith.constant 0 : index
    %651 = vector.load %arg6[%650, %c0_158, %c0_159] : memref<8x8x128xf32, #tpu.memory_space<vmem>>, vector<1x8x128xf32>
    %652 = vector.shape_cast %651 : vector<1x8x128xf32> to vector<8x128xf32>
    %653 = vector.shape_cast %649 : vector<8x128xf32> to vector<1x8x128xf32>
    tpu.vector_store %arg6[%650, %c0_158, %c0_159], %653 {strides = array<i32>} : memref<8x8x128xf32, #tpu.memory_space<vmem>>, vector<1x8x128xf32>,
    %c7_i32_160 = arith.constant 7 : i32
    %654 = arith.subi %c7_i32_160, %c6_i32 : i32
    %655 = arith.index_cast %654 : i32 to index
    %c0_161 = arith.constant 0 : index
    %c0_162 = arith.constant 0 : index
    %656 = vector.load %arg3[%655, %c0_161, %c0_162] : memref<8x8x512xf32, #tpu.memory_space<vmem>>, vector<1x8x512xf32>
    %657 = vector.shape_cast %656 : vector<1x8x512xf32> to vector<8x512xf32>
    %658 = arith.truncf %593 : vector<8x128xf32> to vector<8x128xbf16>
    %c0_163 = arith.constant 0 : index
    %c0_164 = arith.constant 0 : index
    %659 = vector.load %arg5[%c0_163, %c0_164] : memref<128x512xbf16, #tpu.memory_space<vmem>>, vector<128x512xbf16>
    %cst_165 = arith.constant dense<0.000000e+00> : vector<8x512xf32>
    %660 = tpu.matmul %658, %659, %cst_165 {dimension_numbers = #tpu.dot_dimension_numbers<[1], [0], [0], [1], [0, 0, 1, 1], [], []>} : vector<8x128xbf16>, vector<128x512xbf16>, vector<8x512xf32> -> vector<8x512xf32>
    %661 = arith.addf %657, %660 : vector<8x512xf32>
    %662 = vector.extract_strided_slice %661 {offsets = [0, 0], sizes = [8, 128], strides = [1, 1]} : vector<8x512xf32> to vector<8x128xf32>
    %663 = arith.negf %662 : vector<8x128xf32>
    %664 = math.exp %663 : vector<8x128xf32>
    %cst_166 = arith.constant 1.000000e+00 : f32
    %665 = vector.broadcast %cst_166 : f32 to vector<8x128xf32>
    %666 = arith.addf %665, %664 : vector<8x128xf32>
    %667 = arith.divf %665, %666 : vector<8x128xf32>
    %668 = vector.extract_strided_slice %661 {offsets = [0, 128], sizes = [8, 128], strides = [1, 1]} : vector<8x512xf32> to vector<8x128xf32>
    %669 = arith.negf %668 : vector<8x128xf32>
    %670 = math.exp %669 : vector<8x128xf32>
    %cst_167 = arith.constant 1.000000e+00 : f32
    %671 = vector.broadcast %cst_167 : f32 to vector<8x128xf32>
    %672 = arith.addf %671, %670 : vector<8x128xf32>
    %673 = arith.divf %671, %672 : vector<8x128xf32>
    %674 = vector.extract_strided_slice %661 {offsets = [0, 256], sizes = [8, 128], strides = [1, 1]} : vector<8x512xf32> to vector<8x128xf32>
    %675 = math.tanh %674 : vector<8x128xf32>
    %676 = vector.extract_strided_slice %661 {offsets = [0, 384], sizes = [8, 128], strides = [1, 1]} : vector<8x512xf32> to vector<8x128xf32>
    %677 = arith.negf %676 : vector<8x128xf32>
    %678 = math.exp %677 : vector<8x128xf32>
    %cst_168 = arith.constant 1.000000e+00 : f32
    %679 = vector.broadcast %cst_168 : f32 to vector<8x128xf32>
    %680 = arith.addf %679, %678 : vector<8x128xf32>
    %681 = arith.divf %679, %680 : vector<8x128xf32>
    %682 = arith.mulf %673, %596 : vector<8x128xf32>
    %683 = arith.mulf %667, %675 : vector<8x128xf32>
    %684 = arith.addf %682, %683 : vector<8x128xf32>
    %685 = math.tanh %684 : vector<8x128xf32>
    %686 = arith.mulf %681, %685 : vector<8x128xf32>
    %687 = arith.addi %6, %654 : i32
    %688 = vector.broadcast %687 : i32 to vector<8x1xi32>
    %689 = arith.cmpi slt, %688, %3 : vector<8x1xi32>
    %690 = vector.shape_cast %689 : vector<8x1xi1> to vector<8x1xi1>
    %691 = vector.broadcast %690 : vector<8x1xi1> to vector<8x128xi1>
    %692 = arith.select %691, %686, %593 : vector<8x128xi1>, vector<8x128xf32>
    %693 = vector.shape_cast %689 : vector<8x1xi1> to vector<8x1xi1>
    %694 = vector.broadcast %693 : vector<8x1xi1> to vector<8x128xi1>
    %695 = arith.select %694, %684, %596 : vector<8x128xi1>, vector<8x128xf32>
    %cst_169 = arith.constant 0.000000e+00 : f32
    %696 = vector.shape_cast %689 : vector<8x1xi1> to vector<8x1xi1>
    %697 = vector.broadcast %696 : vector<8x1xi1> to vector<8x128xi1>
    %698 = vector.broadcast %cst_169 : f32 to vector<8x128xf32>
    %699 = arith.select %697, %686, %698 : vector<8x128xi1>, vector<8x128xf32>
    %700 = arith.index_cast %654 : i32 to index
    %c0_170 = arith.constant 0 : index
    %c0_171 = arith.constant 0 : index
    %701 = vector.load %arg7[%700, %c0_170, %c0_171] : memref<8x8x128xf32, #tpu.memory_space<vmem>>, vector<1x8x128xf32>
    %702 = vector.shape_cast %701 : vector<1x8x128xf32> to vector<8x128xf32>
    %703 = vector.shape_cast %699 : vector<8x128xf32> to vector<1x8x128xf32>
    tpu.vector_store %arg7[%700, %c0_170, %c0_171], %703 {strides = array<i32>} : memref<8x8x128xf32, #tpu.memory_space<vmem>>, vector<1x8x128xf32>,
    %c7_i32_172 = arith.constant 7 : i32
    %704 = arith.index_cast %c7_i32_172 : i32 to index
    %c0_173 = arith.constant 0 : index
    %c0_174 = arith.constant 0 : index
    %705 = vector.load %arg2[%704, %c0_173, %c0_174] : memref<8x8x512xf32, #tpu.memory_space<vmem>>, vector<1x8x512xf32>
    %706 = vector.shape_cast %705 : vector<1x8x512xf32> to vector<8x512xf32>
    %707 = arith.truncf %642 : vector<8x128xf32> to vector<8x128xbf16>
    %c0_175 = arith.constant 0 : index
    %c0_176 = arith.constant 0 : index
    %708 = vector.load %arg4[%c0_175, %c0_176] : memref<128x512xbf16, #tpu.memory_space<vmem>>, vector<128x512xbf16>
    %cst_177 = arith.constant dense<0.000000e+00> : vector<8x512xf32>
    %709 = tpu.matmul %707, %708, %cst_177 {dimension_numbers = #tpu.dot_dimension_numbers<[1], [0], [0], [1], [0, 0, 1, 1], [], []>} : vector<8x128xbf16>, vector<128x512xbf16>, vector<8x512xf32> -> vector<8x512xf32>
    %710 = arith.addf %706, %709 : vector<8x512xf32>
    %711 = vector.extract_strided_slice %710 {offsets = [0, 0], sizes = [8, 128], strides = [1, 1]} : vector<8x512xf32> to vector<8x128xf32>
    %712 = arith.negf %711 : vector<8x128xf32>
    %713 = math.exp %712 : vector<8x128xf32>
    %cst_178 = arith.constant 1.000000e+00 : f32
    %714 = vector.broadcast %cst_178 : f32 to vector<8x128xf32>
    %715 = arith.addf %714, %713 : vector<8x128xf32>
    %716 = arith.divf %714, %715 : vector<8x128xf32>
    %717 = vector.extract_strided_slice %710 {offsets = [0, 128], sizes = [8, 128], strides = [1, 1]} : vector<8x512xf32> to vector<8x128xf32>
    %718 = arith.negf %717 : vector<8x128xf32>
    %719 = math.exp %718 : vector<8x128xf32>
    %cst_179 = arith.constant 1.000000e+00 : f32
    %720 = vector.broadcast %cst_179 : f32 to vector<8x128xf32>
    %721 = arith.addf %720, %719 : vector<8x128xf32>
    %722 = arith.divf %720, %721 : vector<8x128xf32>
    %723 = vector.extract_strided_slice %710 {offsets = [0, 256], sizes = [8, 128], strides = [1, 1]} : vector<8x512xf32> to vector<8x128xf32>
    %724 = math.tanh %723 : vector<8x128xf32>
    %725 = vector.extract_strided_slice %710 {offsets = [0, 384], sizes = [8, 128], strides = [1, 1]} : vector<8x512xf32> to vector<8x128xf32>
    %726 = arith.negf %725 : vector<8x128xf32>
    %727 = math.exp %726 : vector<8x128xf32>
    %cst_180 = arith.constant 1.000000e+00 : f32
    %728 = vector.broadcast %cst_180 : f32 to vector<8x128xf32>
    %729 = arith.addf %728, %727 : vector<8x128xf32>
    %730 = arith.divf %728, %729 : vector<8x128xf32>
    %731 = arith.mulf %722, %645 : vector<8x128xf32>
    %732 = arith.mulf %716, %724 : vector<8x128xf32>
    %733 = arith.addf %731, %732 : vector<8x128xf32>
    %734 = math.tanh %733 : vector<8x128xf32>
    %735 = arith.mulf %730, %734 : vector<8x128xf32>
    %736 = arith.addi %4, %c7_i32_172 : i32
    %737 = vector.broadcast %736 : i32 to vector<8x1xi32>
    %738 = arith.cmpi slt, %737, %3 : vector<8x1xi32>
    %739 = vector.shape_cast %738 : vector<8x1xi1> to vector<8x1xi1>
    %740 = vector.broadcast %739 : vector<8x1xi1> to vector<8x128xi1>
    %741 = arith.select %740, %735, %642 : vector<8x128xi1>, vector<8x128xf32>
    %742 = vector.shape_cast %738 : vector<8x1xi1> to vector<8x1xi1>
    %743 = vector.broadcast %742 : vector<8x1xi1> to vector<8x128xi1>
    %744 = arith.select %743, %733, %645 : vector<8x128xi1>, vector<8x128xf32>
    %cst_181 = arith.constant 0.000000e+00 : f32
    %745 = vector.shape_cast %738 : vector<8x1xi1> to vector<8x1xi1>
    %746 = vector.broadcast %745 : vector<8x1xi1> to vector<8x128xi1>
    %747 = vector.broadcast %cst_181 : f32 to vector<8x128xf32>
    %748 = arith.select %746, %735, %747 : vector<8x128xi1>, vector<8x128xf32>
    %749 = arith.index_cast %c7_i32_172 : i32 to index
    %c0_182 = arith.constant 0 : index
    %c0_183 = arith.constant 0 : index
    %750 = vector.load %arg6[%749, %c0_182, %c0_183] : memref<8x8x128xf32, #tpu.memory_space<vmem>>, vector<1x8x128xf32>
    %751 = vector.shape_cast %750 : vector<1x8x128xf32> to vector<8x128xf32>
    %752 = vector.shape_cast %748 : vector<8x128xf32> to vector<1x8x128xf32>
    tpu.vector_store %arg6[%749, %c0_182, %c0_183], %752 {strides = array<i32>} : memref<8x8x128xf32, #tpu.memory_space<vmem>>, vector<1x8x128xf32>,
    %c7_i32_184 = arith.constant 7 : i32
    %753 = arith.subi %c7_i32_184, %c7_i32_172 : i32
    %754 = arith.index_cast %753 : i32 to index
    %c0_185 = arith.constant 0 : index
    %c0_186 = arith.constant 0 : index
    %755 = vector.load %arg3[%754, %c0_185, %c0_186] : memref<8x8x512xf32, #tpu.memory_space<vmem>>, vector<1x8x512xf32>
    %756 = vector.shape_cast %755 : vector<1x8x512xf32> to vector<8x512xf32>
    %757 = arith.truncf %692 : vector<8x128xf32> to vector<8x128xbf16>
    %c0_187 = arith.constant 0 : index
    %c0_188 = arith.constant 0 : index
    %758 = vector.load %arg5[%c0_187, %c0_188] : memref<128x512xbf16, #tpu.memory_space<vmem>>, vector<128x512xbf16>
    %cst_189 = arith.constant dense<0.000000e+00> : vector<8x512xf32>
    %759 = tpu.matmul %757, %758, %cst_189 {dimension_numbers = #tpu.dot_dimension_numbers<[1], [0], [0], [1], [0, 0, 1, 1], [], []>} : vector<8x128xbf16>, vector<128x512xbf16>, vector<8x512xf32> -> vector<8x512xf32>
    %760 = arith.addf %756, %759 : vector<8x512xf32>
    %761 = vector.extract_strided_slice %760 {offsets = [0, 0], sizes = [8, 128], strides = [1, 1]} : vector<8x512xf32> to vector<8x128xf32>
    %762 = arith.negf %761 : vector<8x128xf32>
    %763 = math.exp %762 : vector<8x128xf32>
    %cst_190 = arith.constant 1.000000e+00 : f32
    %764 = vector.broadcast %cst_190 : f32 to vector<8x128xf32>
    %765 = arith.addf %764, %763 : vector<8x128xf32>
    %766 = arith.divf %764, %765 : vector<8x128xf32>
    %767 = vector.extract_strided_slice %760 {offsets = [0, 128], sizes = [8, 128], strides = [1, 1]} : vector<8x512xf32> to vector<8x128xf32>
    %768 = arith.negf %767 : vector<8x128xf32>
    %769 = math.exp %768 : vector<8x128xf32>
    %cst_191 = arith.constant 1.000000e+00 : f32
    %770 = vector.broadcast %cst_191 : f32 to vector<8x128xf32>
    %771 = arith.addf %770, %769 : vector<8x128xf32>
    %772 = arith.divf %770, %771 : vector<8x128xf32>
    %773 = vector.extract_strided_slice %760 {offsets = [0, 256], sizes = [8, 128], strides = [1, 1]} : vector<8x512xf32> to vector<8x128xf32>
    %774 = math.tanh %773 : vector<8x128xf32>
    %775 = vector.extract_strided_slice %760 {offsets = [0, 384], sizes = [8, 128], strides = [1, 1]} : vector<8x512xf32> to vector<8x128xf32>
    %776 = arith.negf %775 : vector<8x128xf32>
    %777 = math.exp %776 : vector<8x128xf32>
    %cst_192 = arith.constant 1.000000e+00 : f32
    %778 = vector.broadcast %cst_192 : f32 to vector<8x128xf32>
    %779 = arith.addf %778, %777 : vector<8x128xf32>
    %780 = arith.divf %778, %779 : vector<8x128xf32>
    %781 = arith.mulf %772, %695 : vector<8x128xf32>
    %782 = arith.mulf %766, %774 : vector<8x128xf32>
    %783 = arith.addf %781, %782 : vector<8x128xf32>
    %784 = math.tanh %783 : vector<8x128xf32>
    %785 = arith.mulf %780, %784 : vector<8x128xf32>
    %786 = arith.addi %6, %753 : i32
    %787 = vector.broadcast %786 : i32 to vector<8x1xi32>
    %788 = arith.cmpi slt, %787, %3 : vector<8x1xi32>
    %789 = vector.shape_cast %788 : vector<8x1xi1> to vector<8x1xi1>
    %790 = vector.broadcast %789 : vector<8x1xi1> to vector<8x128xi1>
    %791 = arith.select %790, %785, %692 : vector<8x128xi1>, vector<8x128xf32>
    %792 = vector.shape_cast %788 : vector<8x1xi1> to vector<8x1xi1>
    %793 = vector.broadcast %792 : vector<8x1xi1> to vector<8x128xi1>
    %794 = arith.select %793, %783, %695 : vector<8x128xi1>, vector<8x128xf32>
    %cst_193 = arith.constant 0.000000e+00 : f32
    %795 = vector.shape_cast %788 : vector<8x1xi1> to vector<8x1xi1>
    %796 = vector.broadcast %795 : vector<8x1xi1> to vector<8x128xi1>
    %797 = vector.broadcast %cst_193 : f32 to vector<8x128xf32>
    %798 = arith.select %796, %785, %797 : vector<8x128xi1>, vector<8x128xf32>
    %799 = arith.index_cast %753 : i32 to index
    %c0_194 = arith.constant 0 : index
    %c0_195 = arith.constant 0 : index
    %800 = vector.load %arg7[%799, %c0_194, %c0_195] : memref<8x8x128xf32, #tpu.memory_space<vmem>>, vector<1x8x128xf32>
    %801 = vector.shape_cast %800 : vector<1x8x128xf32> to vector<8x128xf32>
    %802 = vector.shape_cast %798 : vector<8x128xf32> to vector<1x8x128xf32>
    tpu.vector_store %arg7[%799, %c0_194, %c0_195], %802 {strides = array<i32>} : memref<8x8x128xf32, #tpu.memory_space<vmem>>, vector<1x8x128xf32>,
    %c8_i32_196 = arith.constant 8 : i32
    %c0_197 = arith.constant 0 : index
    %c0_198 = arith.constant 0 : index
    %803 = vector.load %arg12[%c0_197, %c0_198] : memref<8x128xf32, #tpu.memory_space<vmem>>, vector<8x128xf32>
    tpu.vector_store %arg12[%c0_197, %c0_198], %741 {strides = array<i32>} : memref<8x128xf32, #tpu.memory_space<vmem>>, vector<8x128xf32>,
    %c0_199 = arith.constant 0 : index
    %c0_200 = arith.constant 0 : index
    %804 = vector.load %arg13[%c0_199, %c0_200] : memref<8x128xf32, #tpu.memory_space<vmem>>, vector<8x128xf32>
    tpu.vector_store %arg13[%c0_199, %c0_200], %744 {strides = array<i32>} : memref<8x128xf32, #tpu.memory_space<vmem>>, vector<8x128xf32>,
    %c0_201 = arith.constant 0 : index
    %c0_202 = arith.constant 0 : index
    %805 = vector.load %arg14[%c0_201, %c0_202] : memref<8x128xf32, #tpu.memory_space<vmem>>, vector<8x128xf32>
    tpu.vector_store %arg14[%c0_201, %c0_202], %791 {strides = array<i32>} : memref<8x128xf32, #tpu.memory_space<vmem>>, vector<8x128xf32>,
    %c0_203 = arith.constant 0 : index
    %c0_204 = arith.constant 0 : index
    %806 = vector.load %arg15[%c0_203, %c0_204] : memref<8x128xf32, #tpu.memory_space<vmem>>, vector<8x128xf32>
    tpu.vector_store %arg15[%c0_203, %c0_204], %794 {strides = array<i32>} : memref<8x128xf32, #tpu.memory_space<vmem>>, vector<8x128xf32>,
    %c0_i32_205 = arith.constant 0 : i32
    %807 = arith.cmpi eq, %arg0, %c0_i32_205 : i32
    %808 = arith.extui %807 : i1 to i32
    %c0_i32_206 = arith.constant 0 : i32
    %809 = arith.cmpi ne, %808, %c0_i32_206 : i32
    scf.if %809 {
      %c0_207 = arith.constant 0 : index
      %c0_208 = arith.constant 0 : index
      %810 = vector.load %arg8[%c0_207, %c0_208] : memref<8x128xf32, #tpu.memory_space<vmem>>, vector<8x128xf32>
      tpu.vector_store %arg8[%c0_207, %c0_208], %741 {strides = array<i32>} : memref<8x128xf32, #tpu.memory_space<vmem>>, vector<8x128xf32>,
      %c0_209 = arith.constant 0 : index
      %c0_210 = arith.constant 0 : index
      %811 = vector.load %arg9[%c0_209, %c0_210] : memref<8x128xf32, #tpu.memory_space<vmem>>, vector<8x128xf32>
      tpu.vector_store %arg9[%c0_209, %c0_210], %744 {strides = array<i32>} : memref<8x128xf32, #tpu.memory_space<vmem>>, vector<8x128xf32>,
      %c0_211 = arith.constant 0 : index
      %c0_212 = arith.constant 0 : index
      %812 = vector.load %arg10[%c0_211, %c0_212] : memref<8x128xf32, #tpu.memory_space<vmem>>, vector<8x128xf32>
      tpu.vector_store %arg10[%c0_211, %c0_212], %791 {strides = array<i32>} : memref<8x128xf32, #tpu.memory_space<vmem>>, vector<8x128xf32>,
      %c0_213 = arith.constant 0 : index
      %c0_214 = arith.constant 0 : index
      %813 = vector.load %arg11[%c0_213, %c0_214] : memref<8x128xf32, #tpu.memory_space<vmem>>, vector<8x128xf32>
      tpu.vector_store %arg11[%c0_213, %c0_214], %794 {strides = array<i32>} : memref<8x128xf32, #tpu.memory_space<vmem>>, vector<8x128xf32>,
    } else {
    }
    return
  }
  func.func @transform_0(%arg0: i32) -> (i32, i32) {
    %c0_i32 = arith.constant 0 : i32
    %c0_i32_0 = arith.constant 0 : i32
    %c0_i32_1 = arith.constant 0 : i32
    return %c0_i32, %c0_i32_0 : i32, i32
  }
  func.func @transform_1(%arg0: i32) -> (i32, i32, i32) {
    %c0_i32 = arith.constant 0 : i32
    %c0_i32_0 = arith.constant 0 : i32
    %c0_i32_1 = arith.constant 0 : i32
    return %arg0, %c0_i32, %c0_i32_0 : i32, i32, i32
  }
  func.func @transform_2(%arg0: i32) -> (i32, i32, i32) {
    %c0_i32 = arith.constant 0 : i32
    %0 = arith.subi %c0_i32, %arg0 : i32
    %c0_i32_0 = arith.constant 0 : i32
    %c1_i32 = arith.constant 1 : i32
    %c0_i32_1 = arith.constant 0 : i32
    return %0, %c0_i32_0, %c1_i32 : i32, i32, i32
  }
  func.func @transform_3(%arg0: i32) -> (i32, i32) {
    %c0_i32 = arith.constant 0 : i32
    %c0_i32_0 = arith.constant 0 : i32
    %c0_i32_1 = arith.constant 0 : i32
    return %c0_i32, %c0_i32_0 : i32, i32
  }
  func.func @transform_4(%arg0: i32) -> (i32, i32) {
    %c0_i32 = arith.constant 0 : i32
    %c0_i32_0 = arith.constant 0 : i32
    %c0_i32_1 = arith.constant 0 : i32
    return %c0_i32, %c0_i32_0 : i32, i32
  }
  func.func @transform_5(%arg0: i32) -> (i32, i32, i32) {
    %c0_i32 = arith.constant 0 : i32
    %c0_i32_0 = arith.constant 0 : i32
    %c0_i32_1 = arith.constant 0 : i32
    return %arg0, %c0_i32, %c0_i32_0 : i32, i32, i32
  }
  func.func @transform_6(%arg0: i32) -> (i32, i32, i32) {
    %c0_i32 = arith.constant 0 : i32
    %0 = arith.subi %c0_i32, %arg0 : i32
    %c0_i32_0 = arith.constant 0 : i32
    %c0_i32_1 = arith.constant 0 : i32
    %c0_i32_2 = arith.constant 0 : i32
    return %0, %c0_i32_0, %c0_i32_1 : i32, i32, i32
  }
  func.func @transform_7(%arg0: i32) -> (i32, i32) {
    %c0_i32 = arith.constant 0 : i32
    %c0_i32_0 = arith.constant 0 : i32
    %c0_i32_1 = arith.constant 0 : i32
    return %c0_i32, %c0_i32_0 : i32, i32
  }
  func.func @transform_8(%arg0: i32) -> (i32, i32) {
    %c0_i32 = arith.constant 0 : i32
    %c0_i32_0 = arith.constant 0 : i32
    %c0_i32_1 = arith.constant 0 : i32
    return %c0_i32, %c0_i32_0 : i32, i32
  }
  func.func @transform_9(%arg0: i32) -> (i32, i32) {
    %c0_i32 = arith.constant 0 : i32
    %c0_i32_0 = arith.constant 0 : i32
    %c0_i32_1 = arith.constant 0 : i32
    return %c0_i32, %c0_i32_0 : i32, i32
  }
  func.func @transform_10(%arg0: i32) -> (i32, i32) {
    %c0_i32 = arith.constant 0 : i32
    %c0_i32_0 = arith.constant 0 : i32
    %c0_i32_1 = arith.constant 0 : i32
    return %c0_i32, %c0_i32_0 : i32, i32
  }
}

module attributes {stable_mosaic.version = 11 : i64} {
  func.func @_linear_kernel(%arg0: i32, %arg1: memref<64x16xbf16, #tpu.memory_space<vmem>>, %arg2: memref<16x1024xbf16, #tpu.memory_space<vmem>>, %arg3: memref<1x1024xf32, #tpu.memory_space<vmem>>, %arg4: memref<64x1024xf32, #tpu.memory_space<vmem>>) attributes {dimension_semantics = [#tpu.dimension_semantics<parallel>], iteration_bounds = array<i64: 1>, scalar_prefetch = 0 : i64, scratch_operands = 0 : i64, tpu.core_type = #tpu.core_type<tc>, window_params = [{transform_indices = @transform_0, window_bounds = array<i64: 64, 16>}, {pipeline_mode = #tpu.pipeline_mode<synchronous>, transform_indices = @transform_1, window_bounds = array<i64: 16, 1024>}, {pipeline_mode = #tpu.pipeline_mode<synchronous>, transform_indices = @transform_2, window_bounds = array<i64: 1, 1024>}, {transform_indices = @transform_3, window_bounds = array<i64: 64, 1024>}]} {
    %c0 = arith.constant 0 : index
    %c0_0 = arith.constant 0 : index
    %0 = vector.load %arg1[%c0, %c0_0] : memref<64x16xbf16, #tpu.memory_space<vmem>>, vector<64x16xbf16>
    %c0_1 = arith.constant 0 : index
    %c0_2 = arith.constant 0 : index
    %1 = vector.load %arg2[%c0_1, %c0_2] : memref<16x1024xbf16, #tpu.memory_space<vmem>>, vector<16x1024xbf16>
    %cst = arith.constant dense<0.000000e+00> : vector<64x1024xf32>
    %2 = tpu.matmul %0, %1, %cst {dimension_numbers = #tpu.dot_dimension_numbers<[1], [0], [0], [1], [0, 0, 1, 1], [], []>} : vector<64x16xbf16>, vector<16x1024xbf16>, vector<64x1024xf32> -> vector<64x1024xf32>
    %c0_3 = arith.constant 0 : index
    %c0_4 = arith.constant 0 : index
    %3 = vector.load %arg3[%c0_3, %c0_4] : memref<1x1024xf32, #tpu.memory_space<vmem>>, vector<1x1024xf32>
    %4 = vector.broadcast %3 : vector<1x1024xf32> to vector<64x1024xf32>
    %5 = arith.addf %2, %4 : vector<64x1024xf32>
    %c0_5 = arith.constant 0 : index
    %c0_6 = arith.constant 0 : index
    %6 = vector.load %arg4[%c0_5, %c0_6] : memref<64x1024xf32, #tpu.memory_space<vmem>>, vector<64x1024xf32>
    tpu.vector_store %arg4[%c0_5, %c0_6], %5 {strides = array<i32>} : memref<64x1024xf32, #tpu.memory_space<vmem>>, vector<64x1024xf32>,
    return
  }
  func.func @transform_0(%arg0: i32) -> (i32, i32) {
    %c0_i32 = arith.constant 0 : i32
    %c0_i32_0 = arith.constant 0 : i32
    return %arg0, %c0_i32 : i32, i32
  }
  func.func @transform_1(%arg0: i32) -> (i32, i32) {
    %c0_i32 = arith.constant 0 : i32
    %c0_i32_0 = arith.constant 0 : i32
    %c0_i32_1 = arith.constant 0 : i32
    return %c0_i32, %c0_i32_0 : i32, i32
  }
  func.func @transform_2(%arg0: i32) -> (i32, i32) {
    %c0_i32 = arith.constant 0 : i32
    %c0_i32_0 = arith.constant 0 : i32
    %c0_i32_1 = arith.constant 0 : i32
    return %c0_i32, %c0_i32_0 : i32, i32
  }
  func.func @transform_3(%arg0: i32) -> (i32, i32) {
    %c0_i32 = arith.constant 0 : i32
    %c0_i32_0 = arith.constant 0 : i32
    return %arg0, %c0_i32 : i32, i32
  }
}

module attributes {stable_mosaic.version = 11 : i64} {
  func.func @_linear_kernel(%arg0: i32, %arg1: memref<64x256xbf16, #tpu.memory_space<vmem>>, %arg2: memref<256x128xbf16, #tpu.memory_space<vmem>>, %arg3: memref<1x128xf32, #tpu.memory_space<vmem>>, %arg4: memref<64x128xf32, #tpu.memory_space<vmem>>) attributes {dimension_semantics = [#tpu.dimension_semantics<parallel>], iteration_bounds = array<i64: 1>, scalar_prefetch = 0 : i64, scratch_operands = 0 : i64, tpu.core_type = #tpu.core_type<tc>, window_params = [{transform_indices = @transform_0, window_bounds = array<i64: 64, 256>}, {pipeline_mode = #tpu.pipeline_mode<synchronous>, transform_indices = @transform_1, window_bounds = array<i64: 256, 128>}, {pipeline_mode = #tpu.pipeline_mode<synchronous>, transform_indices = @transform_2, window_bounds = array<i64: 1, 128>}, {transform_indices = @transform_3, window_bounds = array<i64: 64, 128>}]} {
    %c0 = arith.constant 0 : index
    %c0_0 = arith.constant 0 : index
    %0 = vector.load %arg1[%c0, %c0_0] : memref<64x256xbf16, #tpu.memory_space<vmem>>, vector<64x256xbf16>
    %c0_1 = arith.constant 0 : index
    %c0_2 = arith.constant 0 : index
    %1 = vector.load %arg2[%c0_1, %c0_2] : memref<256x128xbf16, #tpu.memory_space<vmem>>, vector<256x128xbf16>
    %cst = arith.constant dense<0.000000e+00> : vector<64x128xf32>
    %2 = tpu.matmul %0, %1, %cst {dimension_numbers = #tpu.dot_dimension_numbers<[1], [0], [0], [1], [0, 0, 1, 1], [], []>} : vector<64x256xbf16>, vector<256x128xbf16>, vector<64x128xf32> -> vector<64x128xf32>
    %c0_3 = arith.constant 0 : index
    %c0_4 = arith.constant 0 : index
    %3 = vector.load %arg3[%c0_3, %c0_4] : memref<1x128xf32, #tpu.memory_space<vmem>>, vector<1x128xf32>
    %4 = vector.broadcast %3 : vector<1x128xf32> to vector<64x128xf32>
    %5 = arith.addf %2, %4 : vector<64x128xf32>
    %c0_5 = arith.constant 0 : index
    %c0_6 = arith.constant 0 : index
    %6 = vector.load %arg4[%c0_5, %c0_6] : memref<64x128xf32, #tpu.memory_space<vmem>>, vector<64x128xf32>
    tpu.vector_store %arg4[%c0_5, %c0_6], %5 {strides = array<i32>} : memref<64x128xf32, #tpu.memory_space<vmem>>, vector<64x128xf32>,
    return
  }
  func.func @transform_0(%arg0: i32) -> (i32, i32) {
    %c0_i32 = arith.constant 0 : i32
    %c0_i32_0 = arith.constant 0 : i32
    return %arg0, %c0_i32 : i32, i32
  }
  func.func @transform_1(%arg0: i32) -> (i32, i32) {
    %c0_i32 = arith.constant 0 : i32
    %c0_i32_0 = arith.constant 0 : i32
    %c0_i32_1 = arith.constant 0 : i32
    return %c0_i32, %c0_i32_0 : i32, i32
  }
  func.func @transform_2(%arg0: i32) -> (i32, i32) {
    %c0_i32 = arith.constant 0 : i32
    %c0_i32_0 = arith.constant 0 : i32
    %c0_i32_1 = arith.constant 0 : i32
    return %c0_i32, %c0_i32_0 : i32, i32
  }
  func.func @transform_3(%arg0: i32) -> (i32, i32) {
    %c0_i32 = arith.constant 0 : i32
    %c0_i32_0 = arith.constant 0 : i32
    return %arg0, %c0_i32 : i32, i32
  }
}

</mosaic_0001>

<bundles_post_ra>
// kernel: _lambda_.9
= control target key start
LH: loop header
LB: loop body
LE: loop exit
PB: predicated region body
PF: predicated region fallthrough
CT: control target
= control target key end

     0   :  { %s503_s1 = inlined_call_operand.vmem [shape: bf16[256,128], index: 1, kind: input, shape index: {}]   ;;  %s504_s0 = inlined_call_operand.vmem [shape: bf16[64,256], index: 0, kind: input, shape index: {}]   ;;  %s505_s2 = inlined_call_operand.vmem [shape: f32[1,128], index: 2, kind: input, shape index: {}]   ;;  %s506_s3 = inlined_call_operand.vmem [shape: f32[64,128], index: 3, kind: output, shape index: {}]  }
   0x1   :  { %v356_v0 = vld [vmem:[%s503_s1 + $0x78] sm:$0xff]   ;;  %v358_v2 = vld [vmem:[%s503_s1 + $0x70] sm:$0xff]   ;;  %v360_v4 = vld [vmem:[%s503_s1 + $0x68] sm:$0xff]  }
   0x2   :  { %v357_v1 = vld [vmem:[%s503_s1 + $0x38] sm:$0xff]   ;;  %300 = vmatprep.subr.bf16.mxu0 %v356_v0  ;;  %340 = vmatprep.subr.bf16.mxu1 %v356_v0  ;;  %v359_v3 = vld [vmem:[%s503_s1 + $0x30] sm:$0xff]   ;;  %v361_v5 = vld [vmem:[%s503_s1 + $0x28] sm:$0xff]  }
   0x3   :  { %301 = vmatpush3.bf16.msra.mxu0 %v357_v1  ;;  %348 = vmatpush3.bf16.msra.mxu1 %v357_v1  ;;  %v362_v6 = vld [vmem:[%s503_s1 + $0x60] sm:$0xff]   ;;  %v364_v8 = vld [vmem:[%s503_s1 + $0x58] sm:$0xff]   ;;  %v366_v10 = vld [vmem:[%s503_s1 + $0x50] sm:$0xff]  }
   0x4   :  { %302 = vmatprep.subr.bf16.mxu0 %v358_v2  ;;  %341 = vmatprep.subr.bf16.mxu1 %v358_v2  ;;  %v363_v7 = vld [vmem:[%s503_s1 + $0x20] sm:$0xff]   ;;  %v365_v9 = vld [vmem:[%s503_s1 + $0x18] sm:$0xff]   ;;  %v367_v13 = vld [vmem:[%s503_s1 + $0x10] sm:$0xff]  }
   0x5   :  { %v374_v11 = vld [vmem:[%s504_s0 + $0x4] ss:$8 sps:$4 sm:$0xff]   ;;  %v372_v18 = vld [vmem:[%s504_s0] ss:$8 sps:$4 sm:$0xff]   ;;  %v378_v20 = vld [vmem:[%s504_s0 + $0x14] ss:$8 sps:$4 sm:$0xff]  }
   0x6   :  { %v377_v12 = vld [vmem:[%s504_s0 + $0x24] ss:$8 sps:$4 sm:$0xff]   ;;  %230 = vmatprep.mubr.bf16.mxu0 %v374_v11  ;;  %v375_v19 = vld [vmem:[%s504_s0 + $0x20] ss:$8 sps:$4 sm:$0xff]   ;;  %v380_v21 = vld [vmem:[%s504_s0 + $0x34] ss:$8 sps:$4 sm:$0xff]  }
   0x7   :  { %303 = vmatpush3.bf16.msra.mxu0 %v359_v3  ;;  %349 = vmatpush3.bf16.msra.mxu1 %v359_v3  ;;  %v368_v14 = vld [vmem:[%s503_s1 + $0x48] sm:$0xff]   ;;  %v370_v16 = vld [vmem:[%s503_s1 + $0x40] sm:$0xff]   ;;  %v382_v22 = vld [vmem:[%s504_s0 + $0x10] ss:$8 sps:$4 sm:$0xff]  }
   0x8   :  { %304 = vmatprep.subr.bf16.mxu0 %v360_v4  ;;  %342 = vmatprep.subr.bf16.mxu1 %v360_v4  ;;  %v369_v15 = vld [vmem:[%s503_s1 + $0x8] sm:$0xff]   ;;  %v371_v17 = vld [vmem:[%s503_s1] sm:$0xff]   ;;  %v383_v23 = vld [vmem:[%s504_s0 + $0x30] ss:$8 sps:$4 sm:$0xff]  }
   0x9   :  { %246 = vmatprep.mubr.bf16.mxu1 %v377_v12  ;;  %v275_v26 = vld [vmem:[%s505_s2] ss:$0 sm:$0xff] }
   0xb   :  { %305 = vmatpush3.bf16.msra.mxu0 %v361_v5  ;;  %350 = vmatpush3.bf16.msra.mxu1 %v361_v5 }
   0xc   :  { %306 = vmatprep.subr.bf16.mxu0 %v362_v6  ;;  %343 = vmatprep.subr.bf16.mxu1 %v362_v6 }
   0xf   :  { %307 = vmatpush3.bf16.msra.mxu0 %v363_v7  ;;  %351 = vmatpush3.bf16.msra.mxu1 %v363_v7 }
  0x10   :  { %308 = vmatprep.subr.bf16.mxu0 %v364_v8  ;;  %344 = vmatprep.subr.bf16.mxu1 %v364_v8 }
  0x13   :  { %309 = vmatpush3.bf16.msra.mxu0 %v365_v9  ;;  %352 = vmatpush3.bf16.msra.mxu1 %v365_v9 }
  0x14   :  { %310 = vmatprep.subr.bf16.mxu0 %v366_v10  ;;  %345 = vmatprep.subr.bf16.mxu1 %v366_v10 }
  0x17   :  { %311 = vmatpush3.bf16.msra.mxu0 %v367_v13  ;;  %353 = vmatpush3.bf16.msra.mxu1 %v367_v13 }
  0x18   :  { %312 = vmatprep.subr.bf16.mxu0 %v368_v14  ;;  %346 = vmatprep.subr.bf16.mxu1 %v368_v14 }
  0x1b   :  { %313 = vmatpush3.bf16.msra.mxu0 %v369_v15  ;;  %354 = vmatpush3.bf16.msra.mxu1 %v369_v15 }
  0x1c   :  { %314 = vmatprep.subr.bf16.mxu0 %v370_v16  ;;  %347 = vmatprep.subr.bf16.mxu1 %v370_v16 }
  0x1f   :  { %315 = vmatpush3.bf16.msra.mxu0 %v371_v17  ;;  %355 = vmatpush3.bf16.msra.mxu1 %v371_v17 }
  0x22   :  { %231 = vmatmul.mubr.bf16.vlgmr.msra.gmra.mxu0 %v372_v18  ;;  %247 = vmatmul.mubr.bf16.vlgmr.msra.gmra.mxu1 %v375_v19 }
  0x23   :  { %238 = vmatprep.mubr.bf16.mxu0 %v378_v20  ;;  %254 = vmatprep.mubr.bf16.mxu1 %v380_v21 }
  0x2a   :  { %239 = vmatmul.mubr.bf16.gmra.mxu0 %v382_v22  ;;  %255 = vmatmul.mubr.bf16.gmra.mxu1 %v383_v23 }
  0xe2   :  { %v316_v24 = vpop.f32.mrf.mxu0  ;;  %v328_v25 = vpop.f32.mrf.mxu1 }
  0xe4   :  { %v317_v27 = vpop.f32.mrf.mxu0  ;;  %v329_v28 = vpop.f32.mrf.mxu1 }
  0xe5   :  { %v318_v29 = vadd.f32 %v317_v27, %v316_v24  ;;  %v330_v30 = vadd.f32 %v329_v28, %v328_v25 }
  0xe6   :  { %v319_v31 = vpop.f32.mrf.mxu0  ;;  %v331_v32 = vpop.f32.mrf.mxu1 }
  0xe7   :  { %v233_v33 = vadd.f32 %v318_v29, %v275_v26  ;;  %v249_v34 = vadd.f32 %v330_v30, %v275_v26 }
  0xe8   :  { %v320_v35 = vpop.f32.mrf.mxu0  ;;  %v332_v36 = vpop.f32.mrf.mxu1 }
  0xe9   :  { %263 = vst [vmem:[%s506_s3] sm:$0xff] %v233_v33  ;;  %267 = vst [vmem:[%s506_s3 + $0x20] sm:$0xff] %v249_v34  ;;  %v321_v37 = vadd.f32 %v320_v35, %v319_v31  ;;  %v333_v38 = vadd.f32 %v332_v36, %v331_v32 }
  0xea   :  { %v322_v39 = vpop.f32.mrf.mxu0  ;;  %v334_v40 = vpop.f32.mrf.mxu1 }
  0xeb   :  { %v236_v41 = vadd.f32 %v321_v37, %v275_v26  ;;  %v252_v42 = vadd.f32 %v333_v38, %v275_v26 }
  0xec   :  { %v323_v43 = vpop.f32.mrf.mxu0  ;;  %v335_v44 = vpop.f32.mrf.mxu1 }
  0xed   :  { %264 = vst [vmem:[%s506_s3 + $0x8] sm:$0xff] %v236_v41  ;;  %268 = vst [vmem:[%s506_s3 + $0x28] sm:$0xff] %v252_v42  ;;  %v324_v45 = vadd.f32 %v323_v43, %v322_v39  ;;  %v336_v46 = vadd.f32 %v335_v44, %v334_v40 }
  0xee   :  { %v325_v47 = vpop.f32.mrf.mxu0  ;;  %v337_v48 = vpop.f32.mrf.mxu1 }
  0xef   :  { %v241_v49 = vadd.f32 %v324_v45, %v275_v26  ;;  %v257_v50 = vadd.f32 %v336_v46, %v275_v26 }
  0xf0   :  { %v326_v51 = vpop.f32.mrf.mxu0  ;;  %v338_v52 = vpop.f32.mrf.mxu1 }
  0xf1   :  { %265 = vst [vmem:[%s506_s3 + $0x10] sm:$0xff] %v241_v49  ;;  %269 = vst [vmem:[%s506_s3 + $0x30] sm:$0xff] %v257_v50  ;;  %v327_v53 = vadd.f32 %v326_v51, %v325_v47  ;;  %v339_v54 = vadd.f32 %v338_v52, %v337_v48 }
  0xf3   :  { %v244_v55 = vadd.f32 %v327_v53, %v275_v26  ;;  %v260_v56 = vadd.f32 %v339_v54, %v275_v26 }
  0xf5   :  { %266 = vst [vmem:[%s506_s3 + $0x18] sm:$0xff] %v244_v55  ;;  %270 = vst [vmem:[%s506_s3 + $0x38] sm:$0xff] %v260_v56 }

// kernel: _lambda_.5
= control target key start
LH: loop header
LB: loop body
LE: loop exit
PB: predicated region body
PF: predicated region fallthrough
CT: control target
= control target key end

     0   :  { %v539_v3 = vmov 0   ;;  %vm133_vm0 = vcmask 130048   ;;  %v33_v21 = vlaneseq  ;;  %s907_s1 = inlined_call_operand.vmem [shape: bf16[16,1024], index: 1, kind: input, shape index: {}]   ;;  %s908_s0 = inlined_call_operand.vmem [shape: bf16[64,16], index: 0, kind: input, shape index: {}]   ;;  %s909_s2 = inlined_call_operand.vmem [shape: f32[1,1024], index: 2, kind: input, shape index: {}]   ;;  %s910_s3 = inlined_call_operand.vmem [shape: f32[64,1024], index: 3, kind: output, shape index: {}]  }
   0x1   :  { %v23_v0 = vld [vmem:[%s907_s1] sm:$0xff]  ;;  %v24_v2 = vld [vmem:[%s907_s1 + $0x8] sm:$0xff]  ;;  %178 = vmatprep.mubr.bf16.mxu0 %v539_v3  ;;  %251 = vmatprep.mubr.bf16.mxu1 %v539_v3  ;;  %v25_v10 = vld [vmem:[%s907_s1 + $0x10] sm:$0xff] }
   0x2   :  { %v27_v1 = vld [vmem:[%s907_s1 + $0x20] sm:$0xff]  ;;  %v28_v5 = vld [vmem:[%s907_s1 + $0x28] sm:$0xff]  ;;  %v29_v11 = vld [vmem:[%s907_s1 + $0x30] sm:$0xff]  ;;  %v612_v22 = vshrl.u32 %v33_v21, 7 }
   0x3   :  { %v511_v4 = vcombine.high %v23_v0, %v27_v1  ;;  %v510_v6 = vcombine.low %v23_v0, %v27_v1  ;;  %v513_v7 = vcombine.high %v24_v2, %v28_v5  ;;  %v512_v8 = vcombine.low %v24_v2, %v28_v5  ;;  %v535_v9 = vld [vmem:[%s908_s0] sm:$0xff]   ;;  %v26_v13 = vld [vmem:[%s907_s1 + $0x18] sm:$0xff]  ;;  %v536_v18 = vld [vmem:[%s908_s0 + $0x8] sm:$0xff]  }
   0x4   :  { %v515_v12 = vcombine.high %v25_v10, %v29_v11  ;;  %v30_v14 = vld [vmem:[%s907_s1 + $0x38] sm:$0xff]  ;;  %v514_v15 = vcombine.low %v25_v10, %v29_v11  ;;  %v537_v19 = vld [vmem:[%s908_s0 + $0x10] sm:$0xff]   ;;  %v35_v23 = vsub.s32 0, %v612_v22  ;;  %v618_v24 = vld [vmem:[%s909_s2] sm:$0xff]  ;;  %v43_v25 = vsub.s32 2, %v612_v22 }
   0x5   :  { %160 = vmatprep.subr.bf16.mxu0 %v511_v4  ;;  %233 = vmatprep.subr.bf16.mxu1 %v513_v7  ;;  %v517_v16 = vcombine.high %v26_v13, %v30_v14  ;;  %v516_v17 = vcombine.low %v26_v13, %v30_v14  ;;  %v538_v20 = vld [vmem:[%s908_s0 + $0x18] sm:$0xff]   ;;  %v39_v26 = vsub.s32 1, %v612_v22  ;;  %v47_v27 = vsub.s32 3, %v612_v22 }
   0x6   :  { %161 = vmatpush1.bf16.msra.mxu0 %v510_v6  ;;  %234 = vmatpush1.bf16.msra.mxu1 %v512_v8  ;;  %v624_v28 = vrot.slane %v618_v24, %v35_v23  ;;  %v627_v29 = vrot.slane %v618_v24, %v43_v25  ;;  %v59_v23 = vsub.s32 6, %v612_v22 }
   0x7   :  { %306 = vmatprep.subr.bf16.mxu0 %v515_v12  ;;  %379 = vmatprep.subr.bf16.mxu1 %v517_v16  ;;  %v630_v30 = vrot.slane %v618_v24, %v39_v26  ;;  %v633_v32 = vrot.slane %v618_v24, %v47_v27  ;;  %v55_v27 = vsub.s32 5, %v612_v22 }
   0x9   :  { %518 = vmatmul.mubr.msk.bf16.vlgmr.msra.gmra.mxu0 %vm133_vm0, %v535_v9  ;;  %522 = vmatmul.mubr.msk.bf16.vlgmr.msra.gmra.mxu1 %vm133_vm0, %v535_v9 }
   0xa   :  { %307 = vmatpush1.bf16.msra.mxu0 %v514_v15  ;;  %380 = vmatpush1.bf16.msra.mxu1 %v516_v17 }
   0xb   :  { %188 = vmatprep.mubr.bf16.mxu0 %v539_v3  ;;  %261 = vmatprep.mubr.bf16.mxu1 %v539_v3 }
  0x11   :  { %519 = vmatmul.mubr.msk.bf16.gmra.mxu0 %vm133_vm0, %v536_v18  ;;  %523 = vmatmul.mubr.msk.bf16.gmra.mxu1 %vm133_vm0, %v536_v18 }
  0x12   :  { %198 = vmatprep.mubr.bf16.mxu0 %v539_v3  ;;  %271 = vmatprep.mubr.bf16.mxu1 %v539_v3 }
  0x19   :  { %520 = vmatmul.mubr.msk.bf16.gmra.mxu0 %vm133_vm0, %v537_v19  ;;  %524 = vmatmul.mubr.msk.bf16.gmra.mxu1 %vm133_vm0, %v537_v19 }
  0x1a   :  { %208 = vmatprep.mubr.bf16.mxu0 %v539_v3  ;;  %281 = vmatprep.mubr.bf16.mxu1 %v539_v3 }
  0x21   :  { %521 = vmatmul.mubr.msk.bf16.gmra.mxu0 %vm133_vm0, %v538_v20  ;;  %525 = vmatmul.mubr.msk.bf16.gmra.mxu1 %vm133_vm0, %v538_v20 }
  0x22   :  { %324 = vmatprep.mubr.bf16.mxu0 %v539_v3  ;;  %397 = vmatprep.mubr.bf16.mxu1 %v539_v3 }
  0x29   :  { %526 = vmatmul.mubr.msk.bf16.vlgmr.msra.gmra.mxu0 %vm133_vm0, %v535_v9  ;;  %530 = vmatmul.mubr.msk.bf16.vlgmr.msra.gmra.mxu1 %vm133_vm0, %v535_v9 }
  0x2a   :  { %334 = vmatprep.mubr.bf16.mxu0 %v539_v3  ;;  %407 = vmatprep.mubr.bf16.mxu1 %v539_v3 }
  0x31   :  { %527 = vmatmul.mubr.msk.bf16.gmra.mxu0 %vm133_vm0, %v536_v18  ;;  %531 = vmatmul.mubr.msk.bf16.gmra.mxu1 %vm133_vm0, %v536_v18 }
  0x32   :  { %344 = vmatprep.mubr.bf16.mxu0 %v539_v3  ;;  %417 = vmatprep.mubr.bf16.mxu1 %v539_v3 }
  0x39   :  { %528 = vmatmul.mubr.msk.bf16.gmra.mxu0 %vm133_vm0, %v537_v19  ;;  %532 = vmatmul.mubr.msk.bf16.gmra.mxu1 %vm133_vm0, %v537_v19  ;;  %v51_v19 = vsub.s32 4, %v612_v22 }
  0x3a   :  { %354 = vmatprep.mubr.bf16.mxu0 %v539_v3  ;;  %427 = vmatprep.mubr.bf16.mxu1 %v539_v3 }
  0x41   :  { %529 = vmatmul.mubr.msk.bf16.gmra.mxu0 %vm133_vm0, %v538_v20  ;;  %533 = vmatmul.mubr.msk.bf16.gmra.mxu1 %vm133_vm0, %v538_v20 }
  0xc9   :  { %v180_v31 = vpop.f32.mrf.mxu0  ;;  %v253_v34 = vpop.f32.mrf.mxu1 }
  0xca   :  { %v181_v33 = vadd.f32 %v180_v31, %v624_v28  ;;  %v254_v35 = vadd.f32 %v253_v34, %v627_v29  ;;  %v63_v34 = vsub.s32 7, %v612_v22 }
  0xcb   :  { %v182_v36 = vpop.f32.mrf.mxu0  ;;  %v255_v38 = vpop.f32.mrf.mxu1 }
  0xcc   :  { %438 = vst [vmem:[%s910_s3] sm:$0xff] %v181_v33  ;;  %v183_v37 = vadd.f32 %v182_v36, %v630_v30  ;;  %440 = vst [vmem:[%s910_s3 + $0x10] sm:$0xff] %v254_v35  ;;  %v256_v39 = vadd.f32 %v255_v38, %v633_v32 }
  0xcd   :  { %v184_v40 = vpop.f32.mrf.mxu0  ;;  %v257_v42 = vpop.f32.mrf.mxu1 }
  0xce   :  { %439 = vst [vmem:[%s910_s3 + $0x8] sm:$0xff] %v183_v37  ;;  %v185_v41 = vadd.f32 %v184_v40, %v624_v28  ;;  %441 = vst [vmem:[%s910_s3 + $0x18] sm:$0xff] %v256_v39  ;;  %v258_v43 = vadd.f32 %v257_v42, %v627_v29  ;;  %v750_v37 = vrot.slane %v618_v24, %v51_v19 }
  0xcf   :  { %v186_v44 = vpop.f32.mrf.mxu0  ;;  %v259_v46 = vpop.f32.mrf.mxu1  ;;  %v757_v40 = vrot.slane %v618_v24, %v59_v23 }
  0xd0   :  { %446 = vst [vmem:[%s910_s3 + $0x40] sm:$0xff] %v185_v41  ;;  %v187_v45 = vadd.f32 %v186_v44, %v630_v30  ;;  %448 = vst [vmem:[%s910_s3 + $0x50] sm:$0xff] %v258_v43  ;;  %v260_v47 = vadd.f32 %v259_v46, %v633_v32  ;;  %v764_v41 = vrot.slane %v618_v24, %v55_v27 }
  0xd1   :  { %v190_v48 = vpop.f32.mrf.mxu0  ;;  %v263_v50 = vpop.f32.mrf.mxu1  ;;  %v771_v43 = vrot.slane %v618_v24, %v63_v34 }
  0xd2   :  { %447 = vst [vmem:[%s910_s3 + $0x48] sm:$0xff] %v187_v45  ;;  %v191_v49 = vadd.f32 %v190_v48, %v624_v28  ;;  %449 = vst [vmem:[%s910_s3 + $0x58] sm:$0xff] %v260_v47  ;;  %v264_v51 = vadd.f32 %v263_v50, %v627_v29 }
  0xd3   :  { %v192_v52 = vpop.f32.mrf.mxu0  ;;  %v265_v54 = vpop.f32.mrf.mxu1 }
  0xd4   :  { %454 = vst [vmem:[%s910_s3 + $0x80] sm:$0xff] %v191_v49  ;;  %v193_v53 = vadd.f32 %v192_v52, %v630_v30  ;;  %456 = vst [vmem:[%s910_s3 + $0x90] sm:$0xff] %v264_v51  ;;  %v266_v55 = vadd.f32 %v265_v54, %v633_v32 }
  0xd5   :  { %v194_v56 = vpop.f32.mrf.mxu0  ;;  %v267_v58 = vpop.f32.mrf.mxu1 }
  0xd6   :  { %455 = vst [vmem:[%s910_s3 + $0x88] sm:$0xff] %v193_v53  ;;  %v195_v57 = vadd.f32 %v194_v56, %v624_v28  ;;  %457 = vst [vmem:[%s910_s3 + $0x98] sm:$0xff] %v266_v55  ;;  %v268_v59 = vadd.f32 %v267_v58, %v627_v29 }
  0xd7   :  { %v196_v60 = vpop.f32.mrf.mxu0  ;;  %v269_v62 = vpop.f32.mrf.mxu1 }
  0xd8   :  { %462 = vst [vmem:[%s910_s3 + $0xc0] sm:$0xff] %v195_v57  ;;  %v197_v61 = vadd.f32 %v196_v60, %v630_v30  ;;  %464 = vst [vmem:[%s910_s3 + $0xd0] sm:$0xff] %v268_v59  ;;  %v270_v63 = vadd.f32 %v269_v62, %v633_v32 }
  0xd9   :  { %v200_v0 = vpop.f32.mrf.mxu0  ;;  %v273_v2 = vpop.f32.mrf.mxu1 }
  0xda   :  { %463 = vst [vmem:[%s910_s3 + $0xc8] sm:$0xff] %v197_v61  ;;  %v201_v1 = vadd.f32 %v200_v0, %v624_v28  ;;  %465 = vst [vmem:[%s910_s3 + $0xd8] sm:$0xff] %v270_v63  ;;  %v274_v3 = vadd.f32 %v273_v2, %v627_v29 }
  0xdb   :  { %v202_v4 = vpop.f32.mrf.mxu0  ;;  %v275_v6 = vpop.f32.mrf.mxu1 }
  0xdc   :  { %470 = vst [vmem:[%s910_s3 + $0x100] sm:$0xff] %v201_v1  ;;  %v203_v5 = vadd.f32 %v202_v4, %v630_v30  ;;  %472 = vst [vmem:[%s910_s3 + $0x110] sm:$0xff] %v274_v3  ;;  %v276_v7 = vadd.f32 %v275_v6, %v633_v32 }
  0xdd   :  { %v204_v8 = vpop.f32.mrf.mxu0  ;;  %v277_v10 = vpop.f32.mrf.mxu1 }
  0xde   :  { %471 = vst [vmem:[%s910_s3 + $0x108] sm:$0xff] %v203_v5  ;;  %v205_v9 = vadd.f32 %v204_v8, %v624_v28  ;;  %473 = vst [vmem:[%s910_s3 + $0x118] sm:$0xff] %v276_v7  ;;  %v278_v11 = vadd.f32 %v277_v10, %v627_v29 }
  0xdf   :  { %v206_v12 = vpop.f32.mrf.mxu0  ;;  %v279_v14 = vpop.f32.mrf.mxu1 }
  0xe0   :  { %478 = vst [vmem:[%s910_s3 + $0x140] sm:$0xff] %v205_v9  ;;  %v207_v13 = vadd.f32 %v206_v12, %v630_v30  ;;  %480 = vst [vmem:[%s910_s3 + $0x150] sm:$0xff] %v278_v11  ;;  %v280_v15 = vadd.f32 %v279_v14, %v633_v32 }
  0xe1   :  { %v210_v16 = vpop.f32.mrf.mxu0  ;;  %v283_v18 = vpop.f32.mrf.mxu1 }
  0xe2   :  { %479 = vst [vmem:[%s910_s3 + $0x148] sm:$0xff] %v207_v13  ;;  %v211_v17 = vadd.f32 %v210_v16, %v624_v28  ;;  %481 = vst [vmem:[%s910_s3 + $0x158] sm:$0xff] %v280_v15  ;;  %v284_v20 = vadd.f32 %v283_v18, %v627_v29 }
  0xe3   :  { %v212_v21 = vpop.f32.mrf.mxu0  ;;  %v285_v26 = vpop.f32.mrf.mxu1 }
  0xe4   :  { %486 = vst [vmem:[%s910_s3 + $0x180] sm:$0xff] %v211_v17  ;;  %v213_v25 = vadd.f32 %v212_v21, %v630_v30  ;;  %488 = vst [vmem:[%s910_s3 + $0x190] sm:$0xff] %v284_v20  ;;  %v286_v31 = vadd.f32 %v285_v26, %v633_v32 }
  0xe5   :  { %v214_v33 = vpop.f32.mrf.mxu0  ;;  %v287_v36 = vpop.f32.mrf.mxu1 }
  0xe6   :  { %487 = vst [vmem:[%s910_s3 + $0x188] sm:$0xff] %v213_v25  ;;  %v215_v35 = vadd.f32 %v214_v33, %v624_v28  ;;  %489 = vst [vmem:[%s910_s3 + $0x198] sm:$0xff] %v286_v31  ;;  %v288_v38 = vadd.f32 %v287_v36, %v627_v29 }
  0xe7   :  { %v216_v39 = vpop.f32.mrf.mxu0  ;;  %v289_v28 = vpop.f32.mrf.mxu1 }
  0xe8   :  { %494 = vst [vmem:[%s910_s3 + $0x1c0] sm:$0xff] %v215_v35  ;;  %v217_v22 = vadd.f32 %v216_v39, %v630_v30  ;;  %496 = vst [vmem:[%s910_s3 + $0x1d0] sm:$0xff] %v288_v38  ;;  %v290_v29 = vadd.f32 %v289_v28, %v633_v32 }
  0xe9   :  { %v326_v42 = vpop.f32.mrf.mxu0  ;;  %v399_v44 = vpop.f32.mrf.mxu1 }
  0xea   :  { %495 = vst [vmem:[%s910_s3 + $0x1c8] sm:$0xff] %v217_v22  ;;  %v327_v30 = vadd.f32 %v326_v42, %v750_v37  ;;  %497 = vst [vmem:[%s910_s3 + $0x1d8] sm:$0xff] %v290_v29  ;;  %v400_v45 = vadd.f32 %v399_v44, %v757_v40 }
  0xeb   :  { %v328_v46 = vpop.f32.mrf.mxu0  ;;  %v401_v32 = vpop.f32.mrf.mxu1 }
  0xec   :  { %442 = vst [vmem:[%s910_s3 + $0x20] sm:$0xff] %v327_v30  ;;  %v329_v24 = vadd.f32 %v328_v46, %v764_v41  ;;  %444 = vst [vmem:[%s910_s3 + $0x30] sm:$0xff] %v400_v45  ;;  %v402_v47 = vadd.f32 %v401_v32, %v771_v43 }
  0xed   :  { %v330_v48 = vpop.f32.mrf.mxu0  ;;  %v403_v50 = vpop.f32.mrf.mxu1 }
  0xee   :  { %443 = vst [vmem:[%s910_s3 + $0x28] sm:$0xff] %v329_v24  ;;  %v331_v49 = vadd.f32 %v330_v48, %v750_v37  ;;  %445 = vst [vmem:[%s910_s3 + $0x38] sm:$0xff] %v402_v47  ;;  %v404_v51 = vadd.f32 %v403_v50, %v757_v40 }
  0xef   :  { %v332_v52 = vpop.f32.mrf.mxu0  ;;  %v405_v54 = vpop.f32.mrf.mxu1 }
  0xf0   :  { %450 = vst [vmem:[%s910_s3 + $0x60] sm:$0xff] %v331_v49  ;;  %v333_v53 = vadd.f32 %v332_v52, %v764_v41  ;;  %452 = vst [vmem:[%s910_s3 + $0x70] sm:$0xff] %v404_v51  ;;  %v406_v55 = vadd.f32 %v405_v54, %v771_v43 }
  0xf1   :  { %v336_v56 = vpop.f32.mrf.mxu0  ;;  %v409_v58 = vpop.f32.mrf.mxu1 }
  0xf2   :  { %451 = vst [vmem:[%s910_s3 + $0x68] sm:$0xff] %v333_v53  ;;  %v337_v57 = vadd.f32 %v336_v56, %v750_v37  ;;  %453 = vst [vmem:[%s910_s3 + $0x78] sm:$0xff] %v406_v55  ;;  %v410_v59 = vadd.f32 %v409_v58, %v757_v40 }
  0xf3   :  { %v338_v60 = vpop.f32.mrf.mxu0  ;;  %v411_v62 = vpop.f32.mrf.mxu1 }
  0xf4   :  { %458 = vst [vmem:[%s910_s3 + $0xa0] sm:$0xff] %v337_v57  ;;  %v339_v61 = vadd.f32 %v338_v60, %v764_v41  ;;  %460 = vst [vmem:[%s910_s3 + $0xb0] sm:$0xff] %v410_v59  ;;  %v412_v63 = vadd.f32 %v411_v62, %v771_v43 }
  0xf5   :  { %v340_v0 = vpop.f32.mrf.mxu0  ;;  %v413_v2 = vpop.f32.mrf.mxu1 }
  0xf6   :  { %459 = vst [vmem:[%s910_s3 + $0xa8] sm:$0xff] %v339_v61  ;;  %v341_v1 = vadd.f32 %v340_v0, %v750_v37  ;;  %461 = vst [vmem:[%s910_s3 + $0xb8] sm:$0xff] %v412_v63  ;;  %v414_v3 = vadd.f32 %v413_v2, %v757_v40 }
  0xf7   :  { %v342_v4 = vpop.f32.mrf.mxu0  ;;  %v415_v6 = vpop.f32.mrf.mxu1 }
  0xf8   :  { %466 = vst [vmem:[%s910_s3 + $0xe0] sm:$0xff] %v341_v1  ;;  %v343_v5 = vadd.f32 %v342_v4, %v764_v41  ;;  %468 = vst [vmem:[%s910_s3 + $0xf0] sm:$0xff] %v414_v3  ;;  %v416_v7 = vadd.f32 %v415_v6, %v771_v43 }
  0xf9   :  { %v346_v8 = vpop.f32.mrf.mxu0  ;;  %v419_v10 = vpop.f32.mrf.mxu1 }
  0xfa   :  { %467 = vst [vmem:[%s910_s3 + $0xe8] sm:$0xff] %v343_v5  ;;  %v347_v9 = vadd.f32 %v346_v8, %v750_v37  ;;  %469 = vst [vmem:[%s910_s3 + $0xf8] sm:$0xff] %v416_v7  ;;  %v420_v11 = vadd.f32 %v419_v10, %v757_v40 }
  0xfb   :  { %v348_v12 = vpop.f32.mrf.mxu0  ;;  %v421_v14 = vpop.f32.mrf.mxu1 }
  0xfc   :  { %474 = vst [vmem:[%s910_s3 + $0x120] sm:$0xff] %v347_v9  ;;  %v349_v13 = vadd.f32 %v348_v12, %v764_v41  ;;  %476 = vst [vmem:[%s910_s3 + $0x130] sm:$0xff] %v420_v11  ;;  %v422_v15 = vadd.f32 %v421_v14, %v771_v43 }
  0xfd   :  { %v350_v16 = vpop.f32.mrf.mxu0  ;;  %v423_v18 = vpop.f32.mrf.mxu1 }
  0xfe   :  { %475 = vst [vmem:[%s910_s3 + $0x128] sm:$0xff] %v349_v13  ;;  %v351_v17 = vadd.f32 %v350_v16, %v750_v37  ;;  %477 = vst [vmem:[%s910_s3 + $0x138] sm:$0xff] %v422_v15  ;;  %v424_v19 = vadd.f32 %v423_v18, %v757_v40 }
  0xff   :  { %v352_v20 = vpop.f32.mrf.mxu0  ;;  %v425_v23 = vpop.f32.mrf.mxu1 }
 0x100   :  { %482 = vst [vmem:[%s910_s3 + $0x160] sm:$0xff] %v351_v17  ;;  %v353_v21 = vadd.f32 %v352_v20, %v764_v41  ;;  %484 = vst [vmem:[%s910_s3 + $0x170] sm:$0xff] %v424_v19  ;;  %v426_v25 = vadd.f32 %v425_v23, %v771_v43 }
 0x101   :  { %v356_v26 = vpop.f32.mrf.mxu0  ;;  %v429_v31 = vpop.f32.mrf.mxu1 }
 0x102   :  { %483 = vst [vmem:[%s910_s3 + $0x168] sm:$0xff] %v353_v21  ;;  %v357_v27 = vadd.f32 %v356_v26, %v750_v37  ;;  %485 = vst [vmem:[%s910_s3 + $0x178] sm:$0xff] %v426_v25  ;;  %v430_v33 = vadd.f32 %v429_v31, %v757_v40 }
 0x103   :  { %v358_v34 = vpop.f32.mrf.mxu0  ;;  %v431_v36 = vpop.f32.mrf.mxu1 }
 0x104   :  { %490 = vst [vmem:[%s910_s3 + $0x1a0] sm:$0xff] %v357_v27  ;;  %v359_v35 = vadd.f32 %v358_v34, %v764_v41  ;;  %492 = vst [vmem:[%s910_s3 + $0x1b0] sm:$0xff] %v430_v33  ;;  %v432_v38 = vadd.f32 %v431_v36, %v771_v43 }
 0x105   :  { %v360_v39 = vpop.f32.mrf.mxu0  ;;  %v433_v28 = vpop.f32.mrf.mxu1 }
 0x106   :  { %491 = vst [vmem:[%s910_s3 + $0x1a8] sm:$0xff] %v359_v35  ;;  %v361_v22 = vadd.f32 %v360_v39, %v750_v37  ;;  %493 = vst [vmem:[%s910_s3 + $0x1b8] sm:$0xff] %v432_v38  ;;  %v434_v29 = vadd.f32 %v433_v28, %v757_v40 }
 0x107   :  { %v362_v42 = vpop.f32.mrf.mxu0  ;;  %v435_v44 = vpop.f32.mrf.mxu1 }
 0x108   :  { %498 = vst [vmem:[%s910_s3 + $0x1e0] sm:$0xff] %v361_v22  ;;  %v363_v30 = vadd.f32 %v362_v42, %v764_v41  ;;  %500 = vst [vmem:[%s910_s3 + $0x1f0] sm:$0xff] %v434_v29  ;;  %v436_v37 = vadd.f32 %v435_v44, %v771_v43 }
 0x10a   :  { %499 = vst [vmem:[%s910_s3 + $0x1e8] sm:$0xff] %v363_v30  ;;  %501 = vst [vmem:[%s910_s3 + $0x1f8] sm:$0xff] %v436_v37 }

// kernel: _lambda_.7
= control target key start
LH: loop header
LB: loop body
LE: loop exit
PB: predicated region body
PF: predicated region fallthrough
CT: control target
= control target key end

     0   :  { %s2151_s1 = inlined_call_operand.vmem [shape: bf16[256,1024], index: 1, kind: input, shape index: {}]   ;;  %s2152_s0 = inlined_call_operand.vmem [shape: bf16[64,256], index: 0, kind: input, shape index: {}]   ;;  %s2153_s2 = inlined_call_operand.vmem [shape: f32[1,1024], index: 2, kind: input, shape index: {}]   ;;  %s2154_s3 = inlined_call_operand.vmem [shape: f32[64,1024], index: 3, kind: output, shape index: {}]  }
   0x1   :  { %v78_v0 = vld [vmem:[%s2151_s1 + $0x1c0] sm:$0xff]  ;;  %v79_v2 = vld [vmem:[%s2151_s1 + $0x1c8] sm:$0xff] }
   0x2   :  { %v82_v1 = vld [vmem:[%s2151_s1 + $0x1e0] sm:$0xff]  ;;  %v83_v4 = vld [vmem:[%s2151_s1 + $0x1e8] sm:$0xff] }
   0x3   :  { %v1297_v3 = vcombine.high %v78_v0, %v82_v1  ;;  %v1296_v5 = vcombine.low %v78_v0, %v82_v1  ;;  %v70_v6 = vld [vmem:[%s2151_s1 + $0x180] sm:$0xff]  ;;  %v1299_v8 = vcombine.high %v79_v2, %v83_v4  ;;  %v1298_v9 = vcombine.low %v79_v2, %v83_v4  ;;  %v71_v11 = vld [vmem:[%s2151_s1 + $0x188] sm:$0xff] }
   0x4   :  { %v74_v7 = vld [vmem:[%s2151_s1 + $0x1a0] sm:$0xff]  ;;  %v75_v12 = vld [vmem:[%s2151_s1 + $0x1a8] sm:$0xff] }
   0x5   :  { %v1289_v10 = vcombine.high %v70_v6, %v74_v7  ;;  %v62_v13 = vld [vmem:[%s2151_s1 + $0x140] sm:$0xff]  ;;  %872 = vmatprep.subr.bf16.mxu0 %v1297_v3  ;;  %v1291_v14 = vcombine.high %v71_v11, %v75_v12  ;;  %v63_v16 = vld [vmem:[%s2151_s1 + $0x148] sm:$0xff]  ;;  %945 = vmatprep.subr.bf16.mxu1 %v1299_v8  ;;  %v1288_v18 = vcombine.low %v70_v6, %v74_v7 }
   0x6   :  { %v66_v15 = vld [vmem:[%s2151_s1 + $0x160] sm:$0xff]  ;;  %v67_v17 = vld [vmem:[%s2151_s1 + $0x168] sm:$0xff]  ;;  %873 = vmatpush1.bf16.msra.mxu0 %v1296_v5  ;;  %946 = vmatpush1.bf16.msra.mxu1 %v1298_v9  ;;  %v1290_v19 = vcombine.low %v71_v11, %v75_v12 }
   0x7   :  { %874 = vmatprep.subr.bf16.mxu0 %v1289_v10  ;;  %v1281_v20 = vcombine.high %v62_v13, %v66_v15  ;;  %947 = vmatprep.subr.bf16.mxu1 %v1291_v14  ;;  %v1283_v21 = vcombine.high %v63_v16, %v67_v17  ;;  %v54_v22 = vld [vmem:[%s2151_s1 + $0x100] sm:$0xff]  ;;  %v55_v24 = vld [vmem:[%s2151_s1 + $0x108] sm:$0xff]  ;;  %v1280_v26 = vcombine.low %v62_v13, %v66_v15 }
   0x8   :  { %v58_v23 = vld [vmem:[%s2151_s1 + $0x120] sm:$0xff]  ;;  %v59_v25 = vld [vmem:[%s2151_s1 + $0x128] sm:$0xff]  ;;  %v1282_v27 = vcombine.low %v63_v16, %v67_v17 }
   0x9   :  { %v1273_v28 = vcombine.high %v54_v22, %v58_v23  ;;  %v1275_v29 = vcombine.high %v55_v24, %v59_v25  ;;  %v46_v30 = vld [vmem:[%s2151_s1 + $0xc0] sm:$0xff]  ;;  %v47_v32 = vld [vmem:[%s2151_s1 + $0xc8] sm:$0xff]  ;;  %v1272_v34 = vcombine.low %v54_v22, %v58_v23  ;;  %v1274_v35 = vcombine.low %v55_v24, %v59_v25 }
   0xa   :  { %875 = vmatpush1.bf16.msra.mxu0 %v1288_v18  ;;  %948 = vmatpush1.bf16.msra.mxu1 %v1290_v19  ;;  %v50_v31 = vld [vmem:[%s2151_s1 + $0xe0] sm:$0xff]  ;;  %v51_v33 = vld [vmem:[%s2151_s1 + $0xe8] sm:$0xff] }
   0xb   :  { %876 = vmatprep.subr.bf16.mxu0 %v1281_v20  ;;  %949 = vmatprep.subr.bf16.mxu1 %v1283_v21  ;;  %v1265_v36 = vcombine.high %v46_v30, %v50_v31  ;;  %v1267_v37 = vcombine.high %v47_v32, %v51_v33  ;;  %v38_v38 = vld [vmem:[%s2151_s1 + $0x80] sm:$0xff]  ;;  %v39_v40 = vld [vmem:[%s2151_s1 + $0x88] sm:$0xff]  ;;  %v1264_v42 = vcombine.low %v46_v30, %v50_v31 }
   0xc   :  { %v42_v39 = vld [vmem:[%s2151_s1 + $0xa0] sm:$0xff]  ;;  %v43_v41 = vld [vmem:[%s2151_s1 + $0xa8] sm:$0xff]  ;;  %v1266_v43 = vcombine.low %v47_v32, %v51_v33 }
   0xd   :  { %v1257_v44 = vcombine.high %v38_v38, %v42_v39  ;;  %v1259_v45 = vcombine.high %v39_v40, %v43_v41  ;;  %v30_v46 = vld [vmem:[%s2151_s1 + $0x40] sm:$0xff]  ;;  %v31_v48 = vld [vmem:[%s2151_s1 + $0x48] sm:$0xff]  ;;  %v1256_v50 = vcombine.low %v38_v38, %v42_v39  ;;  %v1258_v51 = vcombine.low %v39_v40, %v43_v41 }
   0xe   :  { %877 = vmatpush1.bf16.msra.mxu0 %v1280_v26  ;;  %950 = vmatpush1.bf16.msra.mxu1 %v1282_v27  ;;  %v34_v47 = vld [vmem:[%s2151_s1 + $0x60] sm:$0xff]  ;;  %v35_v49 = vld [vmem:[%s2151_s1 + $0x68] sm:$0xff] }
   0xf   :  { %878 = vmatprep.subr.bf16.mxu0 %v1273_v28  ;;  %951 = vmatprep.subr.bf16.mxu1 %v1275_v29  ;;  %v1249_v52 = vcombine.high %v30_v46, %v34_v47  ;;  %v1251_v53 = vcombine.high %v31_v48, %v35_v49  ;;  %v22_v54 = vld [vmem:[%s2151_s1] sm:$0xff]  ;;  %v23_v57 = vld [vmem:[%s2151_s1 + $0x8] sm:$0xff]  ;;  %v1248_v59 = vcombine.low %v30_v46, %v34_v47 }
  0x10   :  { %v26_v55 = vld [vmem:[%s2151_s1 + $0x20] sm:$0xff]  ;;  %v27_v58 = vld [vmem:[%s2151_s1 + $0x28] sm:$0xff]  ;;  %v1250_v60 = vcombine.low %v31_v48, %v35_v49 }
  0x11   :  { %v1493_v56 = vld [vmem:[%s2152_s0 + $0x4] ss:$8 sps:$4 sm:$0xff]   ;;  %v1241_v61 = vcombine.high %v22_v54, %v26_v55  ;;  %v1243_v62 = vcombine.high %v23_v57, %v27_v58  ;;  %v1240_v3 = vcombine.low %v22_v54, %v26_v55  ;;  %v1242_v4 = vcombine.low %v23_v57, %v27_v58 }
  0x12   :  { %879 = vmatpush1.bf16.msra.mxu0 %v1272_v34  ;;  %952 = vmatpush1.bf16.msra.mxu1 %v1274_v35  ;;  %v142_v63 = vld [vmem:[%s2151_s1 + $0x3c0] sm:$0xff]  ;;  %v143_v1 = vld [vmem:[%s2151_s1 + $0x3c8] sm:$0xff] }
  0x13   :  { %880 = vmatprep.subr.bf16.mxu0 %v1265_v36  ;;  %953 = vmatprep.subr.bf16.mxu1 %v1267_v37  ;;  %v146_v0 = vld [vmem:[%s2151_s1 + $0x3e0] sm:$0xff]  ;;  %v147_v2 = vld [vmem:[%s2151_s1 + $0x3e8] sm:$0xff] }
  0x14   :  { %904 = vmatprep.mubr.bf16.mxu0 %v1493_v56  ;;  %977 = vmatprep.mubr.bf16.mxu1 %v1493_v56  ;;  %v1361_v5 = vcombine.high %v142_v63, %v146_v0  ;;  %v1363_v6 = vcombine.high %v143_v1, %v147_v2  ;;  %v134_v7 = vld [vmem:[%s2151_s1 + $0x380] sm:$0xff]  ;;  %v135_v9 = vld [vmem:[%s2151_s1 + $0x388] sm:$0xff]  ;;  %v1360_v11 = vcombine.low %v142_v63, %v146_v0  ;;  %v80_v0 = vld [vmem:[%s2151_s1 + $0x1d0] sm:$0xff] }
  0x15   :  { %v138_v8 = vld [vmem:[%s2151_s1 + $0x3a0] sm:$0xff]  ;;  %v139_v10 = vld [vmem:[%s2151_s1 + $0x3a8] sm:$0xff]  ;;  %v1362_v12 = vcombine.low %v143_v1, %v147_v2  ;;  %v84_v1 = vld [vmem:[%s2151_s1 + $0x1f0] sm:$0xff] }
  0x16   :  { %881 = vmatpush1.bf16.msra.mxu0 %v1264_v42  ;;  %954 = vmatpush1.bf16.msra.mxu1 %v1266_v43  ;;  %v1353_v13 = vcombine.high %v134_v7, %v138_v8  ;;  %v1355_v14 = vcombine.high %v135_v9, %v139_v10  ;;  %v126_v15 = vld [vmem:[%s2151_s1 + $0x340] sm:$0xff]  ;;  %v127_v17 = vld [vmem:[%s2151_s1 + $0x348] sm:$0xff]  ;;  %v1352_v19 = vcombine.low %v134_v7, %v138_v8  ;;  %v81_v2 = vld [vmem:[%s2151_s1 + $0x1d8] sm:$0xff] }
  0x17   :  { %882 = vmatprep.subr.bf16.mxu0 %v1257_v44  ;;  %955 = vmatprep.subr.bf16.mxu1 %v1259_v45  ;;  %v130_v16 = vld [vmem:[%s2151_s1 + $0x360] sm:$0xff]  ;;  %v131_v18 = vld [vmem:[%s2151_s1 + $0x368] sm:$0xff]  ;;  %v1354_v20 = vcombine.low %v135_v9, %v139_v10  ;;  %v72_v8 = vld [vmem:[%s2151_s1 + $0x190] sm:$0xff] }
  0x18   :  { %v1345_v21 = vcombine.high %v126_v15, %v130_v16  ;;  %v1347_v22 = vcombine.high %v127_v17, %v131_v18  ;;  %v118_v23 = vld [vmem:[%s2151_s1 + $0x300] sm:$0xff]  ;;  %v119_v25 = vld [vmem:[%s2151_s1 + $0x308] sm:$0xff]  ;;  %v1344_v27 = vcombine.low %v126_v15, %v130_v16  ;;  %v1346_v28 = vcombine.low %v127_v17, %v131_v18  ;;  %v76_v9 = vld [vmem:[%s2151_s1 + $0x1b0] sm:$0xff] }
  0x19   :  { %v122_v24 = vld [vmem:[%s2151_s1 + $0x320] sm:$0xff]  ;;  %v123_v26 = vld [vmem:[%s2151_s1 + $0x328] sm:$0xff]  ;;  %v1293_v15 = vcombine.high %v72_v8, %v76_v9  ;;  %v64_v17 = vld [vmem:[%s2151_s1 + $0x150] sm:$0xff] }
  0x1a   :  { %883 = vmatpush1.bf16.msra.mxu0 %v1256_v50  ;;  %956 = vmatpush1.bf16.msra.mxu1 %v1258_v51  ;;  %v1337_v29 = vcombine.high %v118_v23, %v122_v24  ;;  %v1339_v30 = vcombine.high %v119_v25, %v123_v26  ;;  %v110_v31 = vld [vmem:[%s2151_s1 + $0x2c0] sm:$0xff]  ;;  %v111_v33 = vld [vmem:[%s2151_s1 + $0x2c8] sm:$0xff]  ;;  %v1336_v35 = vcombine.low %v118_v23, %v122_v24  ;;  %v68_v18 = vld [vmem:[%s2151_s1 + $0x170] sm:$0xff] }
  0x1b   :  { %884 = vmatprep.subr.bf16.mxu0 %v1249_v52  ;;  %957 = vmatprep.subr.bf16.mxu1 %v1251_v53  ;;  %v114_v32 = vld [vmem:[%s2151_s1 + $0x2e0] sm:$0xff]  ;;  %v115_v34 = vld [vmem:[%s2151_s1 + $0x2e8] sm:$0xff]  ;;  %v1338_v36 = vcombine.low %v119_v25, %v123_v26  ;;  %v1285_v24 = vcombine.high %v64_v17, %v68_v18  ;;  %v56_v26 = vld [vmem:[%s2151_s1 + $0x110] sm:$0xff] }
  0x1c   :  { %v1329_v37 = vcombine.high %v110_v31, %v114_v32  ;;  %v1331_v38 = vcombine.high %v111_v33, %v115_v34  ;;  %v102_v39 = vld [vmem:[%s2151_s1 + $0x280] sm:$0xff]  ;;  %v103_v41 = vld [vmem:[%s2151_s1 + $0x288] sm:$0xff]  ;;  %v1328_v43 = vcombine.low %v110_v31, %v114_v32  ;;  %v1330_v44 = vcombine.low %v111_v33, %v115_v34 }
  0x1d   :  { %v106_v40 = vld [vmem:[%s2151_s1 + $0x2a0] sm:$0xff]  ;;  %v107_v42 = vld [vmem:[%s2151_s1 + $0x2a8] sm:$0xff]  ;;  %v1284_v31 = vcombine.low %v64_v17, %v68_v18  ;;  %v136_v17 = vld [vmem:[%s2151_s1 + $0x390] sm:$0xff] }
  0x1e   :  { %885 = vmatpush1.bf16.msra.mxu0 %v1248_v59  ;;  %958 = vmatpush1.bf16.msra.mxu1 %v1250_v60  ;;  %v1321_v45 = vcombine.high %v102_v39, %v106_v40  ;;  %v1323_v46 = vcombine.high %v103_v41, %v107_v42  ;;  %v94_v47 = vld [vmem:[%s2151_s1 + $0x240] sm:$0xff]  ;;  %v95_v49 = vld [vmem:[%s2151_s1 + $0x248] sm:$0xff]  ;;  %v1320_v51 = vcombine.low %v102_v39, %v106_v40  ;;  %v53_v39 = vld [vmem:[%s2151_s1 + $0xf8] sm:$0xff] }
  0x1f   :  { %886 = vmatprep.subr.bf16.mxu0 %v1241_v61  ;;  %959 = vmatprep.subr.bf16.mxu1 %v1243_v62  ;;  %v98_v48 = vld [vmem:[%s2151_s1 + $0x260] sm:$0xff]  ;;  %v99_v50 = vld [vmem:[%s2151_s1 + $0x268] sm:$0xff]  ;;  %v1322_v52 = vcombine.low %v103_v41, %v107_v42  ;;  %v140_v18 = vld [vmem:[%s2151_s1 + $0x3b0] sm:$0xff] }
  0x20   :  { %v1313_v53 = vcombine.high %v94_v47, %v98_v48  ;;  %v1315_v54 = vcombine.high %v95_v49, %v99_v50  ;;  %v86_v55 = vld [vmem:[%s2151_s1 + $0x200] sm:$0xff]  ;;  %v87_v58 = vld [vmem:[%s2151_s1 + $0x208] sm:$0xff]  ;;  %v1312_v60 = vcombine.low %v94_v47, %v98_v48  ;;  %v1314_v61 = vcombine.low %v95_v49, %v99_v50  ;;  %v45_v47 = vld [vmem:[%s2151_s1 + $0xb8] sm:$0xff] }
  0x21   :  { %v90_v57 = vld [vmem:[%s2151_s1 + $0x220] sm:$0xff]  ;;  %v91_v59 = vld [vmem:[%s2151_s1 + $0x228] sm:$0xff] }
  0x22   :  { %887 = vmatpush1.bf16.msra.mxu0 %v1240_v3  ;;  %960 = vmatpush1.bf16.msra.mxu1 %v1242_v4  ;;  %v1305_v62 = vcombine.high %v86_v55, %v90_v57  ;;  %v1307_v63 = vcombine.high %v87_v58, %v91_v59  ;;  %v85_v3 = vld [vmem:[%s2151_s1 + $0x1f8] sm:$0xff]  ;;  %v1304_v4 = vcombine.low %v86_v55, %v90_v57  ;;  %v1620_v10 = vld [vmem:[%s2152_s0] ss:$8 sps:$4 sm:$0xff]  }
  0x23   :  { %888 = vmatprep.subr.bf16.mxu0 %v1361_v5  ;;  %961 = vmatprep.subr.bf16.mxu1 %v1363_v6  ;;  %v1306_v5 = vcombine.low %v87_v58, %v91_v59  ;;  %v1301_v6 = vcombine.high %v80_v0, %v84_v1  ;;  %v1303_v7 = vcombine.high %v81_v2, %v85_v3  ;;  %v1702_v48 = vld [vmem:[%s2152_s0 + $0x20] ss:$8 sps:$4 sm:$0xff]   ;;  %v1713_v55 = vld [vmem:[%s2152_s0 + $0x34] ss:$8 sps:$4 sm:$0xff]  }
  0x24   :  { %v33_v57 = vld [vmem:[%s2151_s1 + $0x58] sm:$0xff] }
  0x25   :  { %v37_v58 = vld [vmem:[%s2151_s1 + $0x78] sm:$0xff] }
  0x26   :  { %889 = vmatpush2.bf16.msra.mxu0 %v1360_v11  ;;  %962 = vmatpush2.bf16.msra.mxu1 %v1362_v12  ;;  %v73_v11 = vld [vmem:[%s2151_s1 + $0x198] sm:$0xff] }
  0x27   :  { %890 = vmatprep.subr.bf16.mxu0 %v1353_v13  ;;  %963 = vmatprep.subr.bf16.mxu1 %v1355_v14  ;;  %v77_v12 = vld [vmem:[%s2151_s1 + $0x1b8] sm:$0xff]  ;;  %v1300_v13 = vcombine.low %v80_v0, %v84_v1  ;;  %v1302_v14 = vcombine.low %v81_v2, %v85_v3  ;;  %v28_v0 = vld [vmem:[%s2151_s1 + $0x30] sm:$0xff] }
  0x28   :  { %v1295_v16 = vcombine.high %v73_v11, %v77_v12  ;;  %v1294_v23 = vcombine.low %v73_v11, %v77_v12  ;;  %v25_v1 = vld [vmem:[%s2151_s1 + $0x18] sm:$0xff] }
  0x29   :  { %v29_v2 = vld [vmem:[%s2151_s1 + $0x38] sm:$0xff] }
  0x2a   :  { %891 = vmatpush2.bf16.msra.mxu0 %v1352_v19  ;;  %964 = vmatpush2.bf16.msra.mxu1 %v1354_v20  ;;  %v1637_v19 = vld [vmem:[%s2152_s0 + $0x14] ss:$8 sps:$4 sm:$0xff]   ;;  %v1740_v3 = vld [vmem:[%s2152_s0 + $0x30] ss:$8 sps:$4 sm:$0xff]  }
  0x2b   :  { %892 = vmatprep.subr.bf16.mxu0 %v1345_v21  ;;  %965 = vmatprep.subr.bf16.mxu1 %v1347_v22  ;;  %v65_v20 = vld [vmem:[%s2151_s1 + $0x158] sm:$0xff]  ;;  %v1292_v22 = vcombine.low %v72_v8, %v76_v9  ;;  %v144_v8 = vld [vmem:[%s2151_s1 + $0x3d0] sm:$0xff] }
  0x2c   :  { %v69_v21 = vld [vmem:[%s2151_s1 + $0x178] sm:$0xff]  ;;  %v148_v9 = vld [vmem:[%s2151_s1 + $0x3f0] sm:$0xff] }
  0x2d   :  { %v1287_v25 = vcombine.high %v65_v20, %v69_v21  ;;  %v1286_v32 = vcombine.low %v65_v20, %v69_v21  ;;  %v145_v11 = vld [vmem:[%s2151_s1 + $0x3d8] sm:$0xff] }
  0x2e   :  { %893 = vmatpush2.bf16.msra.mxu0 %v1344_v27  ;;  %966 = vmatpush2.bf16.msra.mxu1 %v1346_v28  ;;  %v60_v27 = vld [vmem:[%s2151_s1 + $0x130] sm:$0xff]  ;;  %v57_v28 = vld [vmem:[%s2151_s1 + $0x118] sm:$0xff] }
  0x2f   :  { %894 = vmatprep.subr.bf16.mxu0 %v1337_v29  ;;  %967 = vmatprep.subr.bf16.mxu1 %v1339_v30  ;;  %v61_v29 = vld [vmem:[%s2151_s1 + $0x138] sm:$0xff]  ;;  %v1277_v33 = vcombine.high %v56_v26, %v60_v27  ;;  %v1276_v40 = vcombine.low %v56_v26, %v60_v27  ;;  %v128_v26 = vld [vmem:[%s2151_s1 + $0x350] sm:$0xff] }
  0x30   :  { %v1664_v30 = vld [vmem:[%s2152_s0 + $0x10] ss:$8 sps:$4 sm:$0xff]   ;;  %v1279_v34 = vcombine.high %v57_v28, %v61_v29  ;;  %v1278_v41 = vcombine.low %v57_v28, %v61_v29  ;;  %v1356_v29 = vcombine.low %v136_v17, %v140_v18 }
  0x31   :  { %v149_v12 = vld [vmem:[%s2151_s1 + $0x3f8] sm:$0xff]  ;;  %v132_v27 = vld [vmem:[%s2151_s1 + $0x370] sm:$0xff] }
  0x32   :  { %895 = vmatpush2.bf16.msra.mxu0 %v1336_v35  ;;  %968 = vmatpush2.bf16.msra.mxu1 %v1338_v36  ;;  %v48_v35 = vld [vmem:[%s2151_s1 + $0xd0] sm:$0xff]  ;;  %v137_v20 = vld [vmem:[%s2151_s1 + $0x398] sm:$0xff] }
  0x33   :  { %896 = vmatprep.subr.bf16.mxu0 %v1329_v37  ;;  %969 = vmatprep.subr.bf16.mxu1 %v1331_v38  ;;  %v52_v36 = vld [vmem:[%s2151_s1 + $0xf0] sm:$0xff]  ;;  %v1675_v37 = vld [vmem:[%s2152_s0 + $0x24] ss:$8 sps:$4 sm:$0xff]   ;;  %v49_v38 = vld [vmem:[%s2151_s1 + $0xd8] sm:$0xff] }
  0x34   :  { %v1269_v42 = vcombine.high %v48_v35, %v52_v36  ;;  %v1268_v49 = vcombine.low %v48_v35, %v52_v36  ;;  %v1270_v50 = vcombine.low %v49_v38, %v53_v39  ;;  %v141_v21 = vld [vmem:[%s2151_s1 + $0x3b8] sm:$0xff]  ;;  %v124_v35 = vld [vmem:[%s2151_s1 + $0x330] sm:$0xff] }
  0x35   :  { %v133_v28 = vld [vmem:[%s2151_s1 + $0x378] sm:$0xff] }
  0x36   :  { %897 = vmatpush2.bf16.msra.mxu0 %v1328_v43  ;;  %970 = vmatpush2.bf16.msra.mxu1 %v1330_v44  ;;  %v1271_v43 = vcombine.high %v49_v38, %v53_v39  ;;  %v40_v44 = vld [vmem:[%s2151_s1 + $0x90] sm:$0xff]  ;;  %v121_v36 = vld [vmem:[%s2151_s1 + $0x318] sm:$0xff]  ;;  %v1348_v39 = vcombine.low %v128_v26, %v132_v27 }
  0x37   :  { %898 = vmatprep.subr.bf16.mxu0 %v1321_v45  ;;  %971 = vmatprep.subr.bf16.mxu1 %v1323_v46  ;;  %v44_v45 = vld [vmem:[%s2151_s1 + $0xb0] sm:$0xff]  ;;  %v41_v46 = vld [vmem:[%s2151_s1 + $0x98] sm:$0xff] }
  0x38   :  { %v1260_v59 = vcombine.low %v40_v44, %v44_v45  ;;  %v125_v38 = vld [vmem:[%s2151_s1 + $0x338] sm:$0xff] }
  0x3a   :  { %899 = vmatpush2.bf16.msra.mxu0 %v1320_v51  ;;  %972 = vmatpush2.bf16.msra.mxu1 %v1322_v52  ;;  %v1261_v51 = vcombine.high %v40_v44, %v44_v45  ;;  %v1263_v52 = vcombine.high %v41_v46, %v45_v47  ;;  %v116_v44 = vld [vmem:[%s2151_s1 + $0x2f0] sm:$0xff]  ;;  %v113_v45 = vld [vmem:[%s2151_s1 + $0x2d8] sm:$0xff] }
  0x3b   :  { %900 = vmatprep.subr.bf16.mxu0 %v1313_v53  ;;  %973 = vmatprep.subr.bf16.mxu1 %v1315_v54  ;;  %v32_v53 = vld [vmem:[%s2151_s1 + $0x50] sm:$0xff] }
  0x3c   :  { %v36_v54 = vld [vmem:[%s2151_s1 + $0x70] sm:$0xff] }
  0x3e   :  { %901 = vmatpush2.bf16.msra.mxu0 %v1312_v60  ;;  %974 = vmatpush2.bf16.msra.mxu1 %v1314_v61  ;;  %v1262_v60 = vcombine.low %v41_v46, %v45_v47  ;;  %v1253_v61 = vcombine.high %v32_v53, %v36_v54  ;;  %v117_v46 = vld [vmem:[%s2151_s1 + $0x2f8] sm:$0xff] }
  0x3f   :  { %902 = vmatprep.subr.bf16.mxu0 %v1305_v62  ;;  %975 = vmatprep.subr.bf16.mxu1 %v1307_v63  ;;  %v1255_v62 = vcombine.high %v33_v57, %v37_v58  ;;  %v24_v63 = vld [vmem:[%s2151_s1 + $0x10] sm:$0xff] }
  0x42   :  { %903 = vmatpush2.bf16.msra.mxu0 %v1304_v4  ;;  %976 = vmatpush2.bf16.msra.mxu1 %v1306_v5  ;;  %v1252_v4 = vcombine.low %v32_v53, %v36_v54  ;;  %v1254_v5 = vcombine.low %v33_v57, %v37_v58  ;;  %v108_v53 = vld [vmem:[%s2151_s1 + $0x2b0] sm:$0xff]  ;;  %v105_v54 = vld [vmem:[%s2151_s1 + $0x298] sm:$0xff] }
  0x43   :  { %1018 = vmatprep.subr.bf16.mxu0 %v1301_v6  ;;  %1091 = vmatprep.subr.bf16.mxu1 %v1303_v7  ;;  %v1245_v6 = vcombine.high %v24_v63, %v28_v0  ;;  %v1247_v7 = vcombine.high %v25_v1, %v29_v2  ;;  %v109_v57 = vld [vmem:[%s2151_s1 + $0x2b8] sm:$0xff] }
  0x45   :  { %905 = vmatmul.mubr.bf16.vlgmr.msra.gmra.mxu0 %v1620_v10  ;;  %978 = vmatmul.mubr.bf16.vlgmr.msra.gmra.mxu1 %v1620_v10 }
  0x46   :  { %1019 = vmatpush1.bf16.msra.mxu0 %v1300_v13  ;;  %1092 = vmatpush1.bf16.msra.mxu1 %v1302_v14  ;;  %v1244_v13 = vcombine.low %v24_v63, %v28_v0  ;;  %v1246_v14 = vcombine.low %v25_v1, %v29_v2  ;;  %v100_v63 = vld [vmem:[%s2151_s1 + $0x270] sm:$0xff]  ;;  %v97_v0 = vld [vmem:[%s2151_s1 + $0x258] sm:$0xff] }
  0x47   :  { %1020 = vmatprep.subr.bf16.mxu0 %v1293_v15  ;;  %1093 = vmatprep.subr.bf16.mxu1 %v1295_v16  ;;  %v1365_v15 = vcombine.high %v144_v8, %v148_v9  ;;  %v1367_v16 = vcombine.high %v145_v11, %v149_v12  ;;  %v101_v1 = vld [vmem:[%s2151_s1 + $0x278] sm:$0xff] }
  0x48   :  { %914 = vmatprep.mubr.bf16.mxu0 %v1637_v19  ;;  %987 = vmatprep.mubr.bf16.mxu1 %v1637_v19 }
  0x4a   :  { %1021 = vmatpush1.bf16.msra.mxu0 %v1292_v22  ;;  %1094 = vmatpush1.bf16.msra.mxu1 %v1294_v23  ;;  %v1364_v22 = vcombine.low %v144_v8, %v148_v9  ;;  %v1366_v23 = vcombine.low %v145_v11, %v149_v12  ;;  %v92_v8 = vld [vmem:[%s2151_s1 + $0x230] sm:$0xff]  ;;  %v89_v9 = vld [vmem:[%s2151_s1 + $0x218] sm:$0xff] }
  0x4b   :  { %1022 = vmatprep.subr.bf16.mxu0 %v1285_v24  ;;  %1095 = vmatprep.subr.bf16.mxu1 %v1287_v25  ;;  %v1357_v24 = vcombine.high %v136_v17, %v140_v18  ;;  %v1359_v25 = vcombine.high %v137_v20, %v141_v21  ;;  %v93_v11 = vld [vmem:[%s2151_s1 + $0x238] sm:$0xff] }
  0x4c   :  { %v1310_v17 = vcombine.low %v89_v9, %v93_v11 }
  0x4d   :  { %915 = vmatmul.mubr.bf16.gmra.mxu0 %v1664_v30  ;;  %988 = vmatmul.mubr.bf16.gmra.mxu1 %v1664_v30 }
  0x4e   :  { %1023 = vmatpush1.bf16.msra.mxu0 %v1284_v31  ;;  %1096 = vmatpush1.bf16.msra.mxu1 %v1286_v32  ;;  %v1358_v31 = vcombine.low %v137_v20, %v141_v21  ;;  %v1349_v32 = vcombine.high %v128_v26, %v132_v27 }
  0x4f   :  { %1024 = vmatprep.subr.bf16.mxu0 %v1277_v33  ;;  %1097 = vmatprep.subr.bf16.mxu1 %v1279_v34  ;;  %v120_v34 = vld [vmem:[%s2151_s1 + $0x310] sm:$0xff] }
  0x50   :  { %924 = vmatprep.mubr.bf16.mxu0 %v1675_v37  ;;  %997 = vmatprep.mubr.bf16.mxu1 %v1675_v37  ;;  %v1340_v47 = vcombine.low %v120_v34, %v124_v35 }
  0x52   :  { %1025 = vmatpush1.bf16.msra.mxu0 %v1276_v40  ;;  %1098 = vmatpush1.bf16.msra.mxu1 %v1278_v41  ;;  %v1341_v41 = vcombine.high %v120_v34, %v124_v35 }
  0x53   :  { %1026 = vmatprep.subr.bf16.mxu0 %v1269_v42  ;;  %1099 = vmatprep.subr.bf16.mxu1 %v1271_v43  ;;  %v1343_v42 = vcombine.high %v121_v36, %v125_v38  ;;  %v112_v43 = vld [vmem:[%s2151_s1 + $0x2d0] sm:$0xff] }
  0x54   :  { %v1332_v58 = vcombine.low %v112_v43, %v116_v44 }
  0x55   :  { %925 = vmatmul.mubr.bf16.gmra.mxu0 %v1702_v48  ;;  %998 = vmatmul.mubr.bf16.gmra.mxu1 %v1702_v48 }
  0x56   :  { %1027 = vmatpush1.bf16.msra.mxu0 %v1268_v49  ;;  %1100 = vmatpush1.bf16.msra.mxu1 %v1270_v50  ;;  %v1342_v49 = vcombine.low %v121_v36, %v125_v38  ;;  %v1333_v50 = vcombine.high %v112_v43, %v116_v44 }
  0x57   :  { %1028 = vmatprep.subr.bf16.mxu0 %v1261_v51  ;;  %1101 = vmatprep.subr.bf16.mxu1 %v1263_v52  ;;  %v1335_v51 = vcombine.high %v113_v45, %v117_v46  ;;  %v104_v52 = vld [vmem:[%s2151_s1 + $0x290] sm:$0xff] }
  0x58   :  { %934 = vmatprep.mubr.bf16.mxu0 %v1713_v55  ;;  %1007 = vmatprep.mubr.bf16.mxu1 %v1713_v55  ;;  %v1324_v2 = vcombine.low %v104_v52, %v108_v53 }
  0x5a   :  { %1029 = vmatpush1.bf16.msra.mxu0 %v1260_v59  ;;  %1102 = vmatpush1.bf16.msra.mxu1 %v1262_v60  ;;  %v1334_v59 = vcombine.low %v113_v45, %v117_v46  ;;  %v1325_v60 = vcombine.high %v104_v52, %v108_v53 }
  0x5b   :  { %1030 = vmatprep.subr.bf16.mxu0 %v1253_v61  ;;  %1103 = vmatprep.subr.bf16.mxu1 %v1255_v62  ;;  %v1327_v61 = vcombine.high %v105_v54, %v109_v57  ;;  %v96_v62 = vld [vmem:[%s2151_s1 + $0x250] sm:$0xff] }
  0x5c   :  { %v1316_v12 = vcombine.low %v96_v62, %v100_v63 }
  0x5d   :  { %935 = vmatmul.mubr.bf16.gmra.mxu0 %v1740_v3  ;;  %1008 = vmatmul.mubr.bf16.gmra.mxu1 %v1740_v3 }
  0x5e   :  { %1031 = vmatpush1.bf16.msra.mxu0 %v1252_v4  ;;  %1104 = vmatpush1.bf16.msra.mxu1 %v1254_v5  ;;  %v1326_v4 = vcombine.low %v105_v54, %v109_v57  ;;  %v1317_v5 = vcombine.high %v96_v62, %v100_v63 }
  0x5f   :  { %1032 = vmatprep.subr.bf16.mxu0 %v1245_v6  ;;  %1105 = vmatprep.subr.bf16.mxu1 %v1247_v7  ;;  %v1319_v6 = vcombine.high %v97_v0, %v101_v1  ;;  %v88_v7 = vld [vmem:[%s2151_s1 + $0x210] sm:$0xff] }
  0x60   :  { %1050 = vmatprep.mubr.bf16.mxu0 %v1493_v56  ;;  %1123 = vmatprep.mubr.bf16.mxu1 %v1493_v56  ;;  %v129_v56 = vld [vmem:[%s2151_s1 + $0x358] sm:$0xff] }
  0x61   :  { %v1351_v33 = vcombine.high %v129_v56, %v133_v28  ;;  %v1350_v40 = vcombine.low %v129_v56, %v133_v28 }
  0x62   :  { %1033 = vmatpush1.bf16.msra.mxu0 %v1244_v13  ;;  %1106 = vmatpush1.bf16.msra.mxu1 %v1246_v14  ;;  %v1318_v13 = vcombine.low %v97_v0, %v101_v1  ;;  %v1309_v14 = vcombine.high %v88_v7, %v92_v8 }
  0x63   :  { %1034 = vmatprep.subr.bf16.mxu0 %v1365_v15  ;;  %1107 = vmatprep.subr.bf16.mxu1 %v1367_v16  ;;  %v1311_v15 = vcombine.high %v89_v9, %v93_v11  ;;  %v1308_v16 = vcombine.low %v88_v7, %v92_v8 }
  0x66   :  { %1035 = vmatpush2.bf16.msra.mxu0 %v1364_v22  ;;  %1108 = vmatpush2.bf16.msra.mxu1 %v1366_v23 }
  0x67   :  { %1036 = vmatprep.subr.bf16.mxu0 %v1357_v24  ;;  %1109 = vmatprep.subr.bf16.mxu1 %v1359_v25 }
  0x6a   :  { %1037 = vmatpush2.bf16.msra.mxu0 %v1356_v29  ;;  %1110 = vmatpush2.bf16.msra.mxu1 %v1358_v31 }
  0x6b   :  { %1038 = vmatprep.subr.bf16.mxu0 %v1349_v32  ;;  %1111 = vmatprep.subr.bf16.mxu1 %v1351_v33 }
  0x6e   :  { %1039 = vmatpush2.bf16.msra.mxu0 %v1348_v39  ;;  %1112 = vmatpush2.bf16.msra.mxu1 %v1350_v40 }
  0x6f   :  { %1040 = vmatprep.subr.bf16.mxu0 %v1341_v41  ;;  %1113 = vmatprep.subr.bf16.mxu1 %v1343_v42 }
  0x72   :  { %1041 = vmatpush2.bf16.msra.mxu0 %v1340_v47  ;;  %1114 = vmatpush2.bf16.msra.mxu1 %v1342_v49 }
  0x73   :  { %1042 = vmatprep.subr.bf16.mxu0 %v1333_v50  ;;  %1115 = vmatprep.subr.bf16.mxu1 %v1335_v51 }
  0x76   :  { %1043 = vmatpush2.bf16.msra.mxu0 %v1332_v58  ;;  %1116 = vmatpush2.bf16.msra.mxu1 %v1334_v59 }
  0x77   :  { %1044 = vmatprep.subr.bf16.mxu0 %v1325_v60  ;;  %1117 = vmatprep.subr.bf16.mxu1 %v1327_v61 }
  0x7a   :  { %1045 = vmatpush2.bf16.msra.mxu0 %v1324_v2  ;;  %1118 = vmatpush2.bf16.msra.mxu1 %v1326_v4 }
  0x7b   :  { %1046 = vmatprep.subr.bf16.mxu0 %v1317_v5  ;;  %1119 = vmatprep.subr.bf16.mxu1 %v1319_v6 }
  0x7e   :  { %1047 = vmatpush2.bf16.msra.mxu0 %v1316_v12  ;;  %1120 = vmatpush2.bf16.msra.mxu1 %v1318_v13 }
  0x7f   :  { %1048 = vmatprep.subr.bf16.mxu0 %v1309_v14  ;;  %1121 = vmatprep.subr.bf16.mxu1 %v1311_v15 }
  0x82   :  { %1049 = vmatpush2.bf16.msra.mxu0 %v1308_v16  ;;  %1122 = vmatpush2.bf16.msra.mxu1 %v1310_v17 }
  0x85   :  { %1051 = vmatmul.mubr.bf16.vlgmr.msra.gmra.mxu0 %v1620_v10  ;;  %1124 = vmatmul.mubr.bf16.vlgmr.msra.gmra.mxu1 %v1620_v10  ;;  %v152_v10 = vlaneseq }
  0x86   :  { %1060 = vmatprep.mubr.bf16.mxu0 %v1637_v19  ;;  %1133 = vmatprep.mubr.bf16.mxu1 %v1637_v19 }
  0x87   :  { %v1856_v19 = vshrl.u32 %v152_v10, 7 }
  0x89   :  { %v158_v18 = vsub.s32 1, %v1856_v19 }
  0x8d   :  { %1061 = vmatmul.mubr.bf16.gmra.mxu0 %v1664_v30  ;;  %1134 = vmatmul.mubr.bf16.gmra.mxu1 %v1664_v30  ;;  %v154_v30 = vsub.s32 0, %v1856_v19 }
  0x8e   :  { %1070 = vmatprep.mubr.bf16.mxu0 %v1675_v37  ;;  %1143 = vmatprep.mubr.bf16.mxu1 %v1675_v37  ;;  %v1862_v37 = vld [vmem:[%s2153_s2] sm:$0xff] }
  0x8f   :  { %v1868_v20 = vrot.slane %v1862_v37, %v154_v30  ;;  %v1874_v21 = vrot.slane %v1862_v37, %v158_v18 }
  0x95   :  { %1071 = vmatmul.mubr.bf16.gmra.mxu0 %v1702_v48  ;;  %1144 = vmatmul.mubr.bf16.gmra.mxu1 %v1702_v48  ;;  %v162_v48 = vsub.s32 2, %v1856_v19 }
  0x96   :  { %1080 = vmatprep.mubr.bf16.mxu0 %v1713_v55  ;;  %1153 = vmatprep.mubr.bf16.mxu1 %v1713_v55  ;;  %v166_v55 = vsub.s32 3, %v1856_v19 }
  0x98   :  { %v1877_v23 = vrot.slane %v1862_v37, %v166_v55 }
  0x9d   :  { %1081 = vmatmul.mubr.bf16.gmra.mxu0 %v1740_v3  ;;  %1154 = vmatmul.mubr.bf16.gmra.mxu1 %v1740_v3  ;;  %v1871_v3 = vrot.slane %v1862_v37, %v162_v48 }
 0x105   :  { %v906_v22 = vpop.f32.mrf.mxu0  ;;  %v979_v25 = vpop.f32.mrf.mxu1 }
 0x106   :  { %v907_v24 = vadd.f32 %v906_v22, %v1868_v20  ;;  %v980_v26 = vadd.f32 %v979_v25, %v1871_v3 }
 0x107   :  { %v908_v27 = vpop.f32.mrf.mxu0  ;;  %v981_v28 = vpop.f32.mrf.mxu1 }
 0x108   :  { %1164 = vst [vmem:[%s2154_s3] sm:$0xff] %v907_v24  ;;  %v909_v56 = vadd.f32 %v908_v27, %v1874_v21  ;;  %1166 = vst [vmem:[%s2154_s3 + $0x10] sm:$0xff] %v980_v26  ;;  %v982_v29 = vadd.f32 %v981_v28, %v1877_v23  ;;  %v182_v28 = vsub.s32 7, %v1856_v19 }
 0x109   :  { %v910_v31 = vpop.f32.mrf.mxu0  ;;  %v983_v33 = vpop.f32.mrf.mxu1 }
 0x10a   :  { %1165 = vst [vmem:[%s2154_s3 + $0x8] sm:$0xff] %v909_v56  ;;  %v911_v32 = vadd.f32 %v910_v31, %v1868_v20  ;;  %1167 = vst [vmem:[%s2154_s3 + $0x18] sm:$0xff] %v982_v29  ;;  %v984_v34 = vadd.f32 %v983_v33, %v1871_v3  ;;  %v178_v56 = vsub.s32 6, %v1856_v19  ;;  %v2021_v33 = vrot.slane %v1862_v37, %v182_v28 }
 0x10b   :  { %v912_v35 = vpop.f32.mrf.mxu0  ;;  %v985_v38 = vpop.f32.mrf.mxu1 }
 0x10c   :  { %1172 = vst [vmem:[%s2154_s3 + $0x40] sm:$0xff] %v911_v32  ;;  %v913_v36 = vadd.f32 %v912_v35, %v1874_v21  ;;  %1174 = vst [vmem:[%s2154_s3 + $0x50] sm:$0xff] %v984_v34  ;;  %v986_v39 = vadd.f32 %v985_v38, %v1877_v23 }
 0x10d   :  { %v916_v40 = vpop.f32.mrf.mxu0  ;;  %v989_v42 = vpop.f32.mrf.mxu1 }
 0x10e   :  { %1173 = vst [vmem:[%s2154_s3 + $0x48] sm:$0xff] %v913_v36  ;;  %v917_v41 = vadd.f32 %v916_v40, %v1868_v20  ;;  %1175 = vst [vmem:[%s2154_s3 + $0x58] sm:$0xff] %v986_v39  ;;  %v990_v43 = vadd.f32 %v989_v42, %v1871_v3 }
 0x10f   :  { %v918_v44 = vpop.f32.mrf.mxu0  ;;  %v991_v46 = vpop.f32.mrf.mxu1 }
 0x110   :  { %1180 = vst [vmem:[%s2154_s3 + $0x80] sm:$0xff] %v917_v41  ;;  %v919_v45 = vadd.f32 %v918_v44, %v1874_v21  ;;  %1182 = vst [vmem:[%s2154_s3 + $0x90] sm:$0xff] %v990_v43  ;;  %v992_v47 = vadd.f32 %v991_v46, %v1877_v23 }
 0x111   :  { %v920_v49 = vpop.f32.mrf.mxu0  ;;  %v993_v51 = vpop.f32.mrf.mxu1 }
 0x112   :  { %1181 = vst [vmem:[%s2154_s3 + $0x88] sm:$0xff] %v919_v45  ;;  %v921_v50 = vadd.f32 %v920_v49, %v1868_v20  ;;  %1183 = vst [vmem:[%s2154_s3 + $0x98] sm:$0xff] %v992_v47  ;;  %v994_v52 = vadd.f32 %v993_v51, %v1871_v3 }
 0x113   :  { %v922_v53 = vpop.f32.mrf.mxu0  ;;  %v995_v57 = vpop.f32.mrf.mxu1 }
 0x114   :  { %1188 = vst [vmem:[%s2154_s3 + $0xc0] sm:$0xff] %v921_v50  ;;  %v923_v54 = vadd.f32 %v922_v53, %v1874_v21  ;;  %1190 = vst [vmem:[%s2154_s3 + $0xd0] sm:$0xff] %v994_v52  ;;  %v996_v58 = vadd.f32 %v995_v57, %v1877_v23 }
 0x115   :  { %v926_v59 = vpop.f32.mrf.mxu0  ;;  %v999_v61 = vpop.f32.mrf.mxu1 }
 0x116   :  { %1189 = vst [vmem:[%s2154_s3 + $0xc8] sm:$0xff] %v923_v54  ;;  %v927_v60 = vadd.f32 %v926_v59, %v1868_v20  ;;  %1191 = vst [vmem:[%s2154_s3 + $0xd8] sm:$0xff] %v996_v58  ;;  %v1000_v62 = vadd.f32 %v999_v61, %v1871_v3 }
 0x117   :  { %v928_v63 = vpop.f32.mrf.mxu0  ;;  %v1001_v1 = vpop.f32.mrf.mxu1 }
 0x118   :  { %1196 = vst [vmem:[%s2154_s3 + $0x100] sm:$0xff] %v927_v60  ;;  %v929_v0 = vadd.f32 %v928_v63, %v1874_v21  ;;  %1198 = vst [vmem:[%s2154_s3 + $0x110] sm:$0xff] %v1000_v62  ;;  %v1002_v2 = vadd.f32 %v1001_v1, %v1877_v23 }
 0x119   :  { %v930_v4 = vpop.f32.mrf.mxu0  ;;  %v1003_v6 = vpop.f32.mrf.mxu1 }
 0x11a   :  { %1197 = vst [vmem:[%s2154_s3 + $0x108] sm:$0xff] %v929_v0  ;;  %v931_v5 = vadd.f32 %v930_v4, %v1868_v20  ;;  %1199 = vst [vmem:[%s2154_s3 + $0x118] sm:$0xff] %v1002_v2  ;;  %v1004_v7 = vadd.f32 %v1003_v6, %v1871_v3 }
 0x11b   :  { %v932_v8 = vpop.f32.mrf.mxu0  ;;  %v1005_v11 = vpop.f32.mrf.mxu1 }
 0x11c   :  { %1204 = vst [vmem:[%s2154_s3 + $0x140] sm:$0xff] %v931_v5  ;;  %v933_v9 = vadd.f32 %v932_v8, %v1874_v21  ;;  %1206 = vst [vmem:[%s2154_s3 + $0x150] sm:$0xff] %v1004_v7  ;;  %v1006_v12 = vadd.f32 %v1005_v11, %v1877_v23 }
 0x11d   :  { %v936_v13 = vpop.f32.mrf.mxu0  ;;  %v1009_v15 = vpop.f32.mrf.mxu1 }
 0x11e   :  { %1205 = vst [vmem:[%s2154_s3 + $0x148] sm:$0xff] %v933_v9  ;;  %v937_v14 = vadd.f32 %v936_v13, %v1868_v20  ;;  %1207 = vst [vmem:[%s2154_s3 + $0x158] sm:$0xff] %v1006_v12  ;;  %v1010_v16 = vadd.f32 %v1009_v15, %v1871_v3 }
 0x11f   :  { %v938_v17 = vpop.f32.mrf.mxu0  ;;  %v1011_v30 = vpop.f32.mrf.mxu1 }
 0x120   :  { %1212 = vst [vmem:[%s2154_s3 + $0x180] sm:$0xff] %v937_v14  ;;  %v939_v10 = vadd.f32 %v938_v17, %v1874_v21  ;;  %1214 = vst [vmem:[%s2154_s3 + $0x190] sm:$0xff] %v1010_v16  ;;  %v1012_v48 = vadd.f32 %v1011_v30, %v1877_v23 }
 0x121   :  { %v940_v18 = vpop.f32.mrf.mxu0  ;;  %v1013_v22 = vpop.f32.mrf.mxu1 }
 0x122   :  { %1213 = vst [vmem:[%s2154_s3 + $0x188] sm:$0xff] %v939_v10  ;;  %v941_v55 = vadd.f32 %v940_v18, %v1868_v20  ;;  %1215 = vst [vmem:[%s2154_s3 + $0x198] sm:$0xff] %v1012_v48  ;;  %v1014_v24 = vadd.f32 %v1013_v22, %v1871_v3  ;;  %v170_v3 = vsub.s32 4, %v1856_v19 }
 0x123   :  { %v942_v25 = vpop.f32.mrf.mxu0  ;;  %v1015_v27 = vpop.f32.mrf.mxu1 }
 0x124   :  { %1220 = vst [vmem:[%s2154_s3 + $0x1c0] sm:$0xff] %v941_v55  ;;  %v943_v26 = vadd.f32 %v942_v25, %v1874_v21  ;;  %1222 = vst [vmem:[%s2154_s3 + $0x1d0] sm:$0xff] %v1014_v24  ;;  %v1016_v20 = vadd.f32 %v1015_v27, %v1877_v23  ;;  %v174_v21 = vsub.s32 5, %v1856_v19  ;;  %v2012_v29 = vrot.slane %v1862_v37, %v170_v3 }
 0x125   :  { %v2015_v23 = vrot.slane %v1862_v37, %v178_v56 }
 0x126   :  { %1221 = vst [vmem:[%s2154_s3 + $0x1c8] sm:$0xff] %v943_v26  ;;  %1223 = vst [vmem:[%s2154_s3 + $0x1d8] sm:$0xff] %v1016_v20  ;;  %v2018_v31 = vrot.slane %v1862_v37, %v174_v21 }
 0x145   :  { %v1052_v32 = vpop.f32.mrf.mxu0  ;;  %v1125_v35 = vpop.f32.mrf.mxu1 }
 0x146   :  { %v1053_v34 = vadd.f32 %v1052_v32, %v2012_v29  ;;  %v1126_v36 = vadd.f32 %v1125_v35, %v2015_v23 }
 0x147   :  { %v1054_v38 = vpop.f32.mrf.mxu0  ;;  %v1127_v39 = vpop.f32.mrf.mxu1 }
 0x148   :  { %1168 = vst [vmem:[%s2154_s3 + $0x20] sm:$0xff] %v1053_v34  ;;  %v1055_v19 = vadd.f32 %v1054_v38, %v2018_v31  ;;  %1170 = vst [vmem:[%s2154_s3 + $0x30] sm:$0xff] %v1126_v36  ;;  %v1128_v37 = vadd.f32 %v1127_v39, %v2021_v33 }
 0x149   :  { %v1056_v40 = vpop.f32.mrf.mxu0  ;;  %v1129_v42 = vpop.f32.mrf.mxu1 }
 0x14a   :  { %1169 = vst [vmem:[%s2154_s3 + $0x28] sm:$0xff] %v1055_v19  ;;  %v1057_v41 = vadd.f32 %v1056_v40, %v2012_v29  ;;  %1171 = vst [vmem:[%s2154_s3 + $0x38] sm:$0xff] %v1128_v37  ;;  %v1130_v43 = vadd.f32 %v1129_v42, %v2015_v23 }
 0x14b   :  { %v1058_v44 = vpop.f32.mrf.mxu0  ;;  %v1131_v46 = vpop.f32.mrf.mxu1 }
 0x14c   :  { %1176 = vst [vmem:[%s2154_s3 + $0x60] sm:$0xff] %v1057_v41  ;;  %v1059_v45 = vadd.f32 %v1058_v44, %v2018_v31  ;;  %1178 = vst [vmem:[%s2154_s3 + $0x70] sm:$0xff] %v1130_v43  ;;  %v1132_v47 = vadd.f32 %v1131_v46, %v2021_v33 }
 0x14d   :  { %v1062_v49 = vpop.f32.mrf.mxu0  ;;  %v1135_v51 = vpop.f32.mrf.mxu1 }
 0x14e   :  { %1177 = vst [vmem:[%s2154_s3 + $0x68] sm:$0xff] %v1059_v45  ;;  %v1063_v50 = vadd.f32 %v1062_v49, %v2012_v29  ;;  %1179 = vst [vmem:[%s2154_s3 + $0x78] sm:$0xff] %v1132_v47  ;;  %v1136_v52 = vadd.f32 %v1135_v51, %v2015_v23 }
 0x14f   :  { %v1064_v53 = vpop.f32.mrf.mxu0  ;;  %v1137_v57 = vpop.f32.mrf.mxu1 }
 0x150   :  { %1184 = vst [vmem:[%s2154_s3 + $0xa0] sm:$0xff] %v1063_v50  ;;  %v1065_v54 = vadd.f32 %v1064_v53, %v2018_v31  ;;  %1186 = vst [vmem:[%s2154_s3 + $0xb0] sm:$0xff] %v1136_v52  ;;  %v1138_v58 = vadd.f32 %v1137_v57, %v2021_v33 }
 0x151   :  { %v1066_v59 = vpop.f32.mrf.mxu0  ;;  %v1139_v61 = vpop.f32.mrf.mxu1 }
 0x152   :  { %1185 = vst [vmem:[%s2154_s3 + $0xa8] sm:$0xff] %v1065_v54  ;;  %v1067_v60 = vadd.f32 %v1066_v59, %v2012_v29  ;;  %1187 = vst [vmem:[%s2154_s3 + $0xb8] sm:$0xff] %v1138_v58  ;;  %v1140_v62 = vadd.f32 %v1139_v61, %v2015_v23 }
 0x153   :  { %v1068_v63 = vpop.f32.mrf.mxu0  ;;  %v1141_v1 = vpop.f32.mrf.mxu1 }
 0x154   :  { %1192 = vst [vmem:[%s2154_s3 + $0xe0] sm:$0xff] %v1067_v60  ;;  %v1069_v0 = vadd.f32 %v1068_v63, %v2018_v31  ;;  %1194 = vst [vmem:[%s2154_s3 + $0xf0] sm:$0xff] %v1140_v62  ;;  %v1142_v2 = vadd.f32 %v1141_v1, %v2021_v33 }
 0x155   :  { %v1072_v4 = vpop.f32.mrf.mxu0  ;;  %v1145_v6 = vpop.f32.mrf.mxu1 }
 0x156   :  { %1193 = vst [vmem:[%s2154_s3 + $0xe8] sm:$0xff] %v1069_v0  ;;  %v1073_v5 = vadd.f32 %v1072_v4, %v2012_v29  ;;  %1195 = vst [vmem:[%s2154_s3 + $0xf8] sm:$0xff] %v1142_v2  ;;  %v1146_v7 = vadd.f32 %v1145_v6, %v2015_v23 }
 0x157   :  { %v1074_v8 = vpop.f32.mrf.mxu0  ;;  %v1147_v11 = vpop.f32.mrf.mxu1 }
 0x158   :  { %1200 = vst [vmem:[%s2154_s3 + $0x120] sm:$0xff] %v1073_v5  ;;  %v1075_v9 = vadd.f32 %v1074_v8, %v2018_v31  ;;  %1202 = vst [vmem:[%s2154_s3 + $0x130] sm:$0xff] %v1146_v7  ;;  %v1148_v12 = vadd.f32 %v1147_v11, %v2021_v33 }
 0x159   :  { %v1076_v13 = vpop.f32.mrf.mxu0  ;;  %v1149_v15 = vpop.f32.mrf.mxu1 }
 0x15a   :  { %1201 = vst [vmem:[%s2154_s3 + $0x128] sm:$0xff] %v1075_v9  ;;  %v1077_v14 = vadd.f32 %v1076_v13, %v2012_v29  ;;  %1203 = vst [vmem:[%s2154_s3 + $0x138] sm:$0xff] %v1148_v12  ;;  %v1150_v16 = vadd.f32 %v1149_v15, %v2015_v23 }
 0x15b   :  { %v1078_v17 = vpop.f32.mrf.mxu0  ;;  %v1151_v30 = vpop.f32.mrf.mxu1 }
 0x15c   :  { %1208 = vst [vmem:[%s2154_s3 + $0x160] sm:$0xff] %v1077_v14  ;;  %v1079_v10 = vadd.f32 %v1078_v17, %v2018_v31  ;;  %1210 = vst [vmem:[%s2154_s3 + $0x170] sm:$0xff] %v1150_v16  ;;  %v1152_v48 = vadd.f32 %v1151_v30, %v2021_v33 }
 0x15d   :  { %v1082_v18 = vpop.f32.mrf.mxu0  ;;  %v1155_v22 = vpop.f32.mrf.mxu1 }
 0x15e   :  { %1209 = vst [vmem:[%s2154_s3 + $0x168] sm:$0xff] %v1079_v10  ;;  %v1083_v55 = vadd.f32 %v1082_v18, %v2012_v29  ;;  %1211 = vst [vmem:[%s2154_s3 + $0x178] sm:$0xff] %v1152_v48  ;;  %v1156_v24 = vadd.f32 %v1155_v22, %v2015_v23 }
 0x15f   :  { %v1084_v25 = vpop.f32.mrf.mxu0  ;;  %v1157_v27 = vpop.f32.mrf.mxu1 }
 0x160   :  { %1216 = vst [vmem:[%s2154_s3 + $0x1a0] sm:$0xff] %v1083_v55  ;;  %v1085_v26 = vadd.f32 %v1084_v25, %v2018_v31  ;;  %1218 = vst [vmem:[%s2154_s3 + $0x1b0] sm:$0xff] %v1156_v24  ;;  %v1158_v20 = vadd.f32 %v1157_v27, %v2021_v33 }
 0x161   :  { %v1086_v3 = vpop.f32.mrf.mxu0  ;;  %v1159_v21 = vpop.f32.mrf.mxu1 }
 0x162   :  { %1217 = vst [vmem:[%s2154_s3 + $0x1a8] sm:$0xff] %v1085_v26  ;;  %v1087_v56 = vadd.f32 %v1086_v3, %v2012_v29  ;;  %1219 = vst [vmem:[%s2154_s3 + $0x1b8] sm:$0xff] %v1158_v20  ;;  %v1160_v28 = vadd.f32 %v1159_v21, %v2015_v23 }
 0x163   :  { %v1088_v32 = vpop.f32.mrf.mxu0  ;;  %v1161_v35 = vpop.f32.mrf.mxu1 }
 0x164   :  { %1224 = vst [vmem:[%s2154_s3 + $0x1e0] sm:$0xff] %v1087_v56  ;;  %v1089_v34 = vadd.f32 %v1088_v32, %v2018_v31  ;;  %1226 = vst [vmem:[%s2154_s3 + $0x1f0] sm:$0xff] %v1160_v28  ;;  %v1162_v29 = vadd.f32 %v1161_v35, %v2021_v33 }
 0x166   :  { %1225 = vst [vmem:[%s2154_s3 + $0x1e8] sm:$0xff] %v1089_v34  ;;  %1227 = vst [vmem:[%s2154_s3 + $0x1f8] sm:$0xff] %v1162_v29 }

// kernel: _lambda_.6
= control target key start
LH: loop header
LB: loop body
LE: loop exit
PB: predicated region body
PF: predicated region fallthrough
CT: control target
= control target key end

     0   :  { %v9075_v2 = vmov 0   ;;  %v9070_v37 = vmov 0.0|0.0   ;;  %s9059_s0 = inlined_call_operand.vmem [shape: s32[8,1], index: 0, kind: input, shape index: {}]   ;;  %s9060_s1 = inlined_call_operand.vmem [shape: f32[8,8,1024], index: 1, kind: input, shape index: {}, may-alias: {1,2}]   ;;  %s9061_s2 = inlined_call_operand.vmem [shape: f32[8,8,1024], index: 2, kind: input, shape index: {}, may-alias: {1,2}]   ;;  %s9062_s3 = inlined_call_operand.vmem [shape: bf16[128,512], index: 3, kind: input, shape index: {}]   ;;  %s9063_s4 = inlined_call_operand.vmem [shape: bf16[128,512], index: 4, kind: input, shape index: {}]   ;;  %s9064_s5 = inlined_call_operand.vmem [shape: f32[8,8,128], index: 5, kind: output, shape index: {0}]   ;;  %s9065_s6 = inlined_call_operand.vmem [shape: f32[8,8,128], index: 6, kind: output, shape index: {1}]   ;;  %s9066_s7 = inlined_call_operand.vmem [shape: f32[8,128], index: 7, kind: output, shape index: {2}]   ;;  %s9067_s8 = inlined_call_operand.vmem [shape: f32[8,128], index: 8, kind: output, shape index: {3}]   ;;  %s9068_s9 = inlined_call_operand.vmem [shape: f32[8,128], index: 9, kind: output, shape index: {4}]   ;;  %s9069_s10 = inlined_call_operand.vmem [shape: f32[8,128], index: 10, kind: output, shape index: {5}]  }
   0x1   :  { %v6764_v0 = vld [vmem:[%s9062_s3 + $0xe4] ss:$16 sps:$4 sm:$0xff]   ;;  %v6769_v1 = vld [vmem:[%s9062_s3 + $0xe0] ss:$16 sps:$4 sm:$0xff]   ;;  %456 = vmatprep.mubr.bf16.mxu0 %v9075_v2  ;;  %497 = vmatprep.mubr.bf16.mxu1 %v9075_v2  ;;  %v6796_v6 = vld [vmem:[%s9062_s3 + $0xec] ss:$16 sps:$4 sm:$0xff]  }
   0x2   :  { %424 = vmatprep.subr.bf16.mxu0 %v6764_v0  ;;  %v6777_v3 = vld [vmem:[%s9062_s3 + $0xc4] ss:$16 sps:$4 sm:$0xff]   ;;  %6062 = vset.pattern.permute.xlu0 %v9075_v2  ;;  %v6784_v4 = vld [vmem:[%s9062_s3 + $0xc0] ss:$16 sps:$4 sm:$0xff]   ;;  %v6801_v7 = vld [vmem:[%s9062_s3 + $0xe8] ss:$16 sps:$4 sm:$0xff]  }
   0x3   :  { %425 = vmatpush1.bf16.msra.mxu0 %v6769_v1  ;;  %6063 = vset.pattern.permute.xlu1 %v9075_v2  ;;  %v6791_v5 = vld [vmem:[%s9062_s3 + $0xa4] ss:$16 sps:$4 sm:$0xff]   ;;  %v6807_v8 = vld [vmem:[%s9062_s3 + $0xa0] ss:$16 sps:$4 sm:$0xff]   ;;  %v6820_v10 = vld [vmem:[%s9062_s3 + $0xcc] ss:$16 sps:$4 sm:$0xff]  }
   0x4   :  { %426 = vmatprep.subr.bf16.mxu0 %v6777_v3  ;;  %465 = vmatprep.subr.bf16.mxu1 %v6796_v6  ;;  %v6814_v9 = vld [vmem:[%s9062_s3 + $0x84] ss:$16 sps:$4 sm:$0xff]   ;;  %v6825_v11 = vld [vmem:[%s9062_s3 + $0xc8] ss:$16 sps:$4 sm:$0xff]   ;;  %v6832_v12 = vld [vmem:[%s9062_s3 + $0x80] ss:$16 sps:$4 sm:$0xff]  }
   0x5   :  { %466 = vmatpush1.bf16.msra.mxu1 %v6801_v7  ;;  %v6837_v13 = vld [vmem:[%s9062_s3 + $0x64] ss:$16 sps:$4 sm:$0xff]   ;;  %v6842_v14 = vld [vmem:[%s9062_s3 + $0xac] ss:$16 sps:$4 sm:$0xff]   ;;  %v6849_v15 = vld [vmem:[%s9062_s3 + $0xa8] ss:$16 sps:$4 sm:$0xff]  }
   0x6   :  { %467 = vmatprep.subr.bf16.mxu1 %v6820_v10  ;;  %v6855_v16 = vld [vmem:[%s9062_s3 + $0x8c] ss:$16 sps:$4 sm:$0xff]   ;;  %v6861_v17 = vld [vmem:[%s9062_s3 + $0x60] ss:$16 sps:$4 sm:$0xff]   ;;  %v6867_v18 = vld [vmem:[%s9062_s3 + $0x44] ss:$16 sps:$4 sm:$0xff]  }
   0x7   :  { %427 = vmatpush1.bf16.msra.mxu0 %v6784_v4  ;;  %v6873_v19 = vld [vmem:[%s9062_s3 + $0x88] ss:$16 sps:$4 sm:$0xff]   ;;  %v6879_v20 = vld [vmem:[%s9062_s3 + $0x6c] ss:$16 sps:$4 sm:$0xff]   ;;  %v6885_v21 = vld [vmem:[%s9062_s3 + $0x40] ss:$16 sps:$4 sm:$0xff]  }
   0x8   :  { %428 = vmatprep.subr.bf16.mxu0 %v6791_v5  ;;  %v6890_v22 = vld [vmem:[%s9062_s3 + $0x24] ss:$16 sps:$4 sm:$0xff]   ;;  %v6897_v23 = vld [vmem:[%s9062_s3 + $0x68] ss:$16 sps:$4 sm:$0xff]   ;;  %v6903_v24 = vld [vmem:[%s9062_s3 + $0x4c] ss:$16 sps:$4 sm:$0xff]  }
   0x9   :  { %468 = vmatpush1.bf16.msra.mxu1 %v6825_v11  ;;  %v6909_v25 = vld [vmem:[%s9062_s3 + $0x20] ss:$16 sps:$4 sm:$0xff]   ;;  %v6915_v26 = vld [vmem:[%s9062_s3 + $0x4] ss:$16 sps:$4 sm:$0xff]   ;;  %v6921_v27 = vld [vmem:[%s9062_s3 + $0x48] ss:$16 sps:$4 sm:$0xff]  }
   0xa   :  { %469 = vmatprep.subr.bf16.mxu1 %v6842_v14  ;;  %v6927_v28 = vld [vmem:[%s9062_s3 + $0x2c] ss:$16 sps:$4 sm:$0xff]   ;;  %v6933_v29 = vld [vmem:[%s9062_s3] ss:$16 sps:$4 sm:$0xff]   ;;  %v6938_v30 = vld [vmem:[%s9063_s4 + $0xe4] ss:$16 sps:$4 sm:$0xff]  }
   0xb   :  { %429 = vmatpush1.bf16.msra.mxu0 %v6807_v8  ;;  %v6945_v31 = vld [vmem:[%s9062_s3 + $0x28] ss:$16 sps:$4 sm:$0xff]   ;;  %v6951_v32 = vld [vmem:[%s9062_s3 + $0xc] ss:$16 sps:$4 sm:$0xff]   ;;  %v6957_v33 = vld [vmem:[%s9063_s4 + $0xe0] ss:$16 sps:$4 sm:$0xff]  }
   0xc   :  { %430 = vmatprep.subr.bf16.mxu0 %v6814_v9  ;;  %v6962_v34 = vld [vmem:[%s9063_s4 + $0xc4] ss:$16 sps:$4 sm:$0xff]   ;;  %v6969_v35 = vld [vmem:[%s9062_s3 + $0x8] ss:$16 sps:$4 sm:$0xff]   ;;  %v6975_v36 = vld [vmem:[%s9063_s4 + $0xec] ss:$16 sps:$4 sm:$0xff]  }
   0xd   :  { %470 = vmatpush1.bf16.msra.mxu1 %v6849_v15  ;;  %v6982_v38 = vld [vmem:[%s9063_s4 + $0xc0] ss:$16 sps:$4 sm:$0xff]   ;;  %v6987_v39 = vld [vmem:[%s9063_s4 + $0xa4] ss:$16 sps:$4 sm:$0xff]   ;;  %v6995_v40 = vld [vmem:[%s9063_s4 + $0xe8] ss:$16 sps:$4 sm:$0xff]  }
   0xe   :  { %471 = vmatprep.subr.bf16.mxu1 %v6855_v16  ;;  %v7001_v41 = vld [vmem:[%s9063_s4 + $0xcc] ss:$16 sps:$4 sm:$0xff]   ;;  %v7007_v42 = vld [vmem:[%s9063_s4 + $0xa0] ss:$16 sps:$4 sm:$0xff]   ;;  %v7012_v43 = vld [vmem:[%s9063_s4 + $0x84] ss:$16 sps:$4 sm:$0xff]  }
   0xf   :  { %431 = vmatpush1.bf16.msra.mxu0 %v6832_v12  ;;  %v7020_v44 = vld [vmem:[%s9063_s4 + $0xc8] ss:$16 sps:$4 sm:$0xff]   ;;  %v7026_v45 = vld [vmem:[%s9063_s4 + $0xac] ss:$16 sps:$4 sm:$0xff]   ;;  %v7032_v46 = vld [vmem:[%s9063_s4 + $0x80] ss:$16 sps:$4 sm:$0xff]  }
  0x10   :  { %432 = vmatprep.subr.bf16.mxu0 %v6837_v13  ;;  %v7037_v47 = vld [vmem:[%s9063_s4 + $0x64] ss:$16 sps:$4 sm:$0xff]   ;;  %v7048_v49 = vld [vmem:[%s9063_s4 + $0xa8] ss:$16 sps:$4 sm:$0xff]   ;;  %v7057_v50 = vld [vmem:[%s9063_s4 + $0x8c] ss:$16 sps:$4 sm:$0xff]  }
  0x11   :  { %472 = vmatpush1.bf16.msra.mxu1 %v6873_v19  ;;  %9120 = vst [vmem:[#allocation8_spill] sm:$0xff] %v7037_v47  ;;  %v7042_v48 = vld [vmem:[%s9059_s0] sm:$0xff]  ;;  %v7077_v54 = vld [vmem:[%s9063_s4 + $0x88] ss:$16 sps:$4 sm:$0xff]   ;;  %v7084_v56 = vld [vmem:[%s9063_s4 + $0x6c] ss:$16 sps:$4 sm:$0xff]  }
  0x12   :  { %473 = vmatprep.subr.bf16.mxu1 %v6879_v20  ;;  %vm5493_vm0 = vcmp.gt.s32.totalorder %v7042_v48, 0  ;;  %vm5529_vm1 = vcmp.gt.s32.totalorder %v7042_v48, 7  ;;  %v7065_v52 = vld [vmem:[%s9063_s4 + $0x60] ss:$16 sps:$4 sm:$0xff]   ;;  %v7072_v53 = vld [vmem:[%s9063_s4 + $0x44] ss:$16 sps:$4 sm:$0xff]  }
  0x13   :  { %433 = vmatpush1.bf16.msra.mxu0 %v6861_v17  ;;  %v7060_v51 = vsel %vm5493_vm0, 1, %v9075_v2  ;;  %9121 = vst [vmem:[#allocation9_spill] sm:$0xff] %v7065_v52  ;;  %9122 = vst [vmem:[#allocation10_spill] sm:$0xff] %v7072_v53  ;;  %v856_v55 = vsel %vm5529_vm1, 1, %v9075_v2  ;;  %vm5640_vm2 = vcmp.gt.s32.totalorder %v7042_v48, 2  ;;  %vm5714_vm3 = vcmp.gt.s32.totalorder %v7042_v48, 3 }
  0x14   :  { %434 = vmatprep.subr.bf16.mxu0 %v6867_v18  ;;  %538 = vperm.xlu0 %6062, %v7060_v51   ;;  %9123 = vst [vmem:[#allocation11_spill] sm:$0xff] %v7084_v56  ;;  %v7092_v57 = vld [vmem:[%s9063_s4 + $0x40] ss:$16 sps:$4 sm:$0xff]   ;;  %v7098_v58 = vld [vmem:[%s9063_s4 + $0x24] ss:$16 sps:$4 sm:$0xff]   ;;  %v7106_v60 = vsel %vm5640_vm2, 1, %v9075_v2 }
  0x15   :  { %474 = vmatpush1.bf16.msra.mxu1 %v6897_v23  ;;  %9124 = vst [vmem:[#allocation12_spill] sm:$0xff] %v7092_v57  ;;  %9125 = vst [vmem:[#allocation13_spill] sm:$0xff] %v7098_v58  ;;  %v7103_v59 = vld [vmem:[%s9063_s4 + $0x68] ss:$16 sps:$4 sm:$0xff]   ;;  %v7112_v61 = vld [vmem:[%s9063_s4 + $0x4c] ss:$16 sps:$4 sm:$0xff]  }
  0x16   :  { %475 = vmatprep.subr.bf16.mxu1 %v6903_v24  ;;  %9126 = vst [vmem:[#allocation14_spill] sm:$0xff] %v7112_v61  ;;  %v7120_v62 = vld [vmem:[%s9063_s4 + $0x20] ss:$16 sps:$4 sm:$0xff]   ;;  %v7127_v63 = vld [vmem:[%s9063_s4 + $0x4] ss:$16 sps:$4 sm:$0xff]   ;;  %vm5751_vm4 = vcmp.gt.s32.totalorder %v7042_v48, 4 }
  0x17   :  { %435 = vmatpush1.bf16.msra.mxu0 %v6885_v21  ;;  %9127 = vst [vmem:[#allocation15_spill] sm:$0xff] %v7120_v62  ;;  %9128 = vst [vmem:[#allocation16_spill] sm:$0xff] %v7127_v63  ;;  %vm5677_vm5 = vcmp.gt.s32.totalorder %v7042_v48, 5  ;;  %vm5603_vm6 = vcmp.gt.s32.totalorder %v7042_v48, 6  ;;  %vm5566_vm7 = vcmp.gt.s32.totalorder %v7042_v48, 1 }
  0x18   :  { %436 = vmatprep.subr.bf16.mxu0 %v6890_v22  ;;  %858 = vperm.xlu0 %6062, %v856_v55  }
  0x19   :  { %476 = vmatpush1.bf16.msra.mxu1 %v6921_v27 }
  0x1a   :  { %477 = vmatprep.subr.bf16.mxu1 %v6927_v28 }
  0x1b   :  { %437 = vmatpush1.bf16.msra.mxu0 %v6909_v25 }
  0x1c   :  { %438 = vmatprep.subr.bf16.mxu0 %v6915_v26  ;;  %1821 = vperm.xlu0 %6062, %v7106_v60  }
  0x1d   :  { %478 = vmatpush1.bf16.msra.mxu1 %v6945_v31 }
  0x1e   :  { %479 = vmatprep.subr.bf16.mxu1 %v6951_v32 }
  0x1f   :  { %439 = vmatpush1.bf16.msra.mxu0 %v6933_v29 }
  0x20   :  { %743 = vmatprep.subr.bf16.mxu0 %v6938_v30 }
  0x21   :  { %480 = vmatpush1.bf16.msra.mxu1 %v6969_v35 }
  0x22   :  { %457 = vmatmul.mubr.bf16.vlgmr.msra.gmra.mxu0 %v9070_v37  ;;  %784 = vmatprep.subr.bf16.mxu1 %v6975_v36 }
  0x23   :  { %744 = vmatpush1.bf16.msra.mxu0 %v6957_v33  ;;  %775 = vmatprep.mubr.bf16.mxu0 %v9075_v2 }
  0x24   :  { %745 = vmatprep.subr.bf16.mxu0 %v6962_v34  ;;  %498 = vmatmul.mubr.bf16.vlgmr.msra.gmra.mxu1 %v9070_v37  ;;  %v7132_v37 = vld [vmem:[%s9063_s4 + $0x48] ss:$16 sps:$4 sm:$0xff]  }
  0x25   :  { %785 = vmatpush1.bf16.msra.mxu1 %v6995_v40  ;;  %816 = vmatprep.mubr.bf16.mxu1 %v9075_v2 }
  0x26   :  { %786 = vmatprep.subr.bf16.mxu1 %v7001_v41 }
  0x27   :  { %746 = vmatpush1.bf16.msra.mxu0 %v6982_v38 }
  0x28   :  { %747 = vmatprep.subr.bf16.mxu0 %v6987_v39 }
  0x29   :  { %787 = vmatpush1.bf16.msra.mxu1 %v7020_v44 }
  0x2a   :  { %788 = vmatprep.subr.bf16.mxu1 %v7026_v45 }
  0x2b   :  { %748 = vmatpush1.bf16.msra.mxu0 %v7007_v42 }
  0x2c   :  { %749 = vmatprep.subr.bf16.mxu0 %v7012_v43 }
  0x2d   :  { %789 = vmatpush1.bf16.msra.mxu1 %v7048_v49 }
  0x2e   :  { %790 = vmatprep.subr.bf16.mxu1 %v7057_v50 }
  0x2f   :  { %750 = vmatpush1.bf16.msra.mxu0 %v7032_v46 }
  0x30   :  { %751 = vmatprep.subr.bf16.mxu0 %v7037_v47 }
  0x31   :  { %791 = vmatpush1.bf16.msra.mxu1 %v7077_v54 }
  0x32   :  { %792 = vmatprep.subr.bf16.mxu1 %v7084_v56  ;;  %v7149_v56 = vld [vmem:[%s9063_s4] ss:$16 sps:$4 sm:$0xff]  }
  0x33   :  { %752 = vmatpush1.bf16.msra.mxu0 %v7065_v52  ;;  %v7141_v52 = vld [vmem:[%s9063_s4 + $0x2c] ss:$16 sps:$4 sm:$0xff]  }
  0x34   :  { %753 = vmatprep.subr.bf16.mxu0 %v7072_v53  ;;  %v7135_v53 = vsel %vm5714_vm3, 1, %v9075_v2  ;;  %9129 = vst [vmem:[#allocation17_spill] sm:$0xff] %v7141_v52  ;;  %v7156_v2 = vld [vmem:[%s9063_s4 + $0x28] ss:$16 sps:$4 sm:$0xff]  }
  0x35   :  { %793 = vmatpush1.bf16.msra.mxu1 %v7103_v59  ;;  %2463 = vperm.xlu0 %6062, %v7135_v53  }
  0x36   :  { %794 = vmatprep.subr.bf16.mxu1 %v7112_v61  ;;  %v7172_v61 = vld [vmem:[%s9063_s4 + $0x8] ss:$16 sps:$4 sm:$0xff]  }
  0x37   :  { %754 = vmatpush1.bf16.msra.mxu0 %v7092_v57  ;;  %v9130_v57 = vmov 0  }
  0x38   :  { %755 = vmatprep.subr.bf16.mxu0 %v7098_v58  ;;  %v2782_v47 = vsel %vm5751_vm4, 1, %v9130_v57  ;;  %v7163_v58 = vld [vmem:[%s9063_s4 + $0xc] ss:$16 sps:$4 sm:$0xff]  }
  0x39   :  { %795 = vmatpush1.bf16.msra.mxu1 %v7132_v37  ;;  %3105 = vperm.xlu0 %6062, %v2782_v47  }
  0x3a   :  { %796 = vmatprep.subr.bf16.mxu1 %v7141_v52  ;;  %v1498_v52 = vsel %vm5603_vm6, 1, %v9130_v57 }
  0x3b   :  { %756 = vmatpush1.bf16.msra.mxu0 %v7120_v62  ;;  %v2140_v62 = vsel %vm5677_vm5, 1, %v9130_v57 }
  0x3c   :  { %757 = vmatprep.subr.bf16.mxu0 %v7127_v63  ;;  %v9131_v63 = vmov 0.0|0.0  }
  0x3d   :  { %797 = vmatpush1.bf16.msra.mxu1 %v7156_v2  ;;  %3747 = vperm.xlu0 %6062, %v2140_v62  }
  0x3e   :  { %798 = vmatprep.subr.bf16.mxu1 %v7163_v58 }
  0x3f   :  { %758 = vmatpush1.bf16.msra.mxu0 %v7149_v56 }
  0x40   :  { %1064 = vmatprep.subr.bf16.mxu0 %v6764_v0  ;;  %v1177_v0 = vsel %vm5566_vm7, 1, %v9130_v57 }
  0x41   :  { %799 = vmatpush1.bf16.msra.mxu1 %v7172_v61  ;;  %4389 = vperm.xlu0 %6062, %v1498_v52  }
  0x42   :  { %776 = vmatmul.mubr.bf16.vlgmr.msra.gmra.mxu0 %v9131_v63  ;;  %1105 = vmatprep.subr.bf16.mxu1 %v6796_v6 }
  0x43   :  { %1065 = vmatpush1.bf16.msra.mxu0 %v6769_v1  ;;  %1096 = vmatprep.mubr.bf16.mxu0 %v9130_v57  ;;  %v32_v1 = vld [vmem:[%s9060_s1] sm:$0xff] }
  0x44   :  { %1066 = vmatprep.subr.bf16.mxu0 %v6777_v3  ;;  %817 = vmatmul.mubr.bf16.vlgmr.msra.gmra.mxu1 %v9131_v63 }
  0x45   :  { %1106 = vmatpush1.bf16.msra.mxu1 %v6801_v7  ;;  %5031 = vperm.xlu0 %6062, %v856_v55  }
  0x46   :  { %1107 = vmatprep.subr.bf16.mxu1 %v6820_v10  ;;  %1137 = vmatprep.mubr.bf16.mxu1 %v9130_v57 }
  0x47   :  { %1067 = vmatpush1.bf16.msra.mxu0 %v6784_v4  ;;  %1179 = vperm.xlu1 %6063, %v1177_v0   ;;  %v34_v4 = vld [vmem:[%s9060_s1 + $0x8] sm:$0xff] }
  0x48   :  { %1068 = vmatprep.subr.bf16.mxu0 %v6791_v5 }
  0x49   :  { %1108 = vmatpush1.bf16.msra.mxu1 %v6825_v11 }
  0x4a   :  { %1109 = vmatprep.subr.bf16.mxu1 %v6842_v14 }
  0x4b   :  { %1069 = vmatpush1.bf16.msra.mxu0 %v6807_v8  ;;  %1500 = vperm.xlu1 %6063, %v1498_v52  }
  0x4c   :  { %1070 = vmatprep.subr.bf16.mxu0 %v6814_v9 }
  0x4d   :  { %1110 = vmatpush1.bf16.msra.mxu1 %v6849_v15 }
  0x4e   :  { %1111 = vmatprep.subr.bf16.mxu1 %v6855_v16 }
  0x4f   :  { %1071 = vmatpush1.bf16.msra.mxu0 %v6832_v12  ;;  %2142 = vperm.xlu1 %6063, %v2140_v62  }
  0x50   :  { %1072 = vmatprep.subr.bf16.mxu0 %v6837_v13  ;;  %v38_v13 = vld [vmem:[%s9060_s1 + $0x18] sm:$0xff] }
  0x51   :  { %1112 = vmatpush1.bf16.msra.mxu1 %v6873_v19 }
  0x52   :  { %1113 = vmatprep.subr.bf16.mxu1 %v6879_v20 }
  0x53   :  { %1073 = vmatpush1.bf16.msra.mxu0 %v6861_v17  ;;  %2784 = vperm.xlu1 %6063, %v2782_v47  }
  0x54   :  { %1074 = vmatprep.subr.bf16.mxu0 %v6867_v18  ;;  %v36_v18 = vld [vmem:[%s9060_s1 + $0x10] sm:$0xff] }
  0x55   :  { %1114 = vmatpush1.bf16.msra.mxu1 %v6897_v23 }
  0x56   :  { %1115 = vmatprep.subr.bf16.mxu1 %v6903_v24 }
  0x57   :  { %1075 = vmatpush1.bf16.msra.mxu0 %v6885_v21  ;;  %3426 = vperm.xlu1 %6063, %v7135_v53  }
  0x58   :  { %1076 = vmatprep.subr.bf16.mxu0 %v6890_v22 }
  0x59   :  { %1116 = vmatpush1.bf16.msra.mxu1 %v6921_v27 }
  0x5a   :  { %1117 = vmatprep.subr.bf16.mxu1 %v6927_v28 }
  0x5b   :  { %1077 = vmatpush1.bf16.msra.mxu0 %v6909_v25  ;;  %4068 = vperm.xlu1 %6063, %v7106_v60   ;;  %v5454_v25 = vld [vmem:[%s9061_s2 + $0x1e0] sm:$0xff] }
  0x5c   :  { %1078 = vmatprep.subr.bf16.mxu0 %v6915_v26 }
  0x5d   :  { %1118 = vmatpush1.bf16.msra.mxu1 %v6945_v31 }
  0x5e   :  { %1119 = vmatprep.subr.bf16.mxu1 %v6951_v32 }
  0x5f   :  { %1079 = vmatpush1.bf16.msra.mxu0 %v6933_v29  ;;  %4710 = vperm.xlu1 %6063, %v1177_v0   ;;  %v5455_v29 = vld [vmem:[%s9061_s2 + $0x1e8] sm:$0xff] }
  0x60   :  { %1385 = vmatprep.subr.bf16.mxu0 %v6938_v30 }
  0x61   :  { %1120 = vmatpush1.bf16.msra.mxu1 %v6969_v35 }
  0x62   :  { %1426 = vmatprep.subr.bf16.mxu1 %v6975_v36 }
  0x63   :  { %5350 = vperm.xlu1 %6063, %v7060_v51  }
  0xe2   :  { %v458_v3 = vpop.f32.mrf.mxu0 }
  0xe3   :  { %v506_v5 = vadd.f32 %v458_v3, %v32_v1  ;;  %v5457_v1 = vld [vmem:[%s9061_s2 + $0x1f8] sm:$0xff] }
  0xe4   :  { %v460_v6 = vpop.f32.mrf.mxu0  ;;  %v499_v11 = vpop.f32.mrf.mxu1 }
  0xe5   :  { %v5490_v7 = vmul.f32 -1.442695, %v506_v5  ;;  %v507_v8 = vadd.f32 %v460_v6, %v34_v4  ;;  %v508_v20 = vadd.f32 %v499_v11, %v36_v18  ;;  %v5456_v5 = vld [vmem:[%s9061_s2 + $0x1f0] sm:$0xff] }
  0xe6   :  { %v462_v9 = vpop.f32.mrf.mxu0  ;;  %v501_v14 = vpop.f32.mrf.mxu1 }
  0xe7   :  { %6448 = vpow2.f32 %v5490_v7  ;;  %v5491_v10 = vmul.f32 -1.442695, %v507_v8  ;;  %v509_v16 = vadd.f32 %v501_v14, %v38_v13 }
  0xe8   :  { %v463_v12 = vpop.f32.mrf.mxu0  ;;  %v503_v15 = vpop.f32.mrf.mxu1 }
  0xe9   :  { %6450 = vpow2.f32 %v5491_v10  ;;  %v5492_v19 = vmul.f32 -1.442695, %v509_v16  ;;  %v7251_v15 = vpop.permute.xlu0 %538 }
  0xea   :  { %v504_v17 = vpop.f32.mrf.mxu1  ;;  %vm540_vm8 = vcmp.eq.s32.totalorder %v7251_v15, 1 }
  0xeb   :  { %6452 = vpow2.f32 %v5492_v19  ;;  %vm6048_vm9 = vmpackc.low %vm540_vm8, %vm540_vm8 }
  0xec   :  { %6454 = vtanh.f32 %v508_v20 }
  0xf4   :  { %v6449_v21 = vpop.eup %6448 }
  0xf5   :  { %v513_v22 = vadd.f32 1.0, %v6449_v21 }
  0xf6   :  { %v6451_v23 = vpop.eup %6450 }
  0xf7   :  { %6456 = vrcp.f32 %v513_v22  ;;  %v519_v24 = vadd.f32 1.0, %v6451_v23  ;;  %v9141_v23 = vld [vmem:[#allocation16_spill] sm:$0xff] }
  0xf8   :  { %v6453_v26 = vpop.eup %6452 }
  0xf9   :  { %6458 = vrcp.f32 %v519_v24  ;;  %v6455_v27 = vpop.eup %6454  ;;  %v526_v32 = vadd.f32 1.0, %v6453_v26  ;;  %v7298_v24 = vpop.permute.xlu0 %858 }
  0xfa   :  { %vm860_vm10 = vcmp.eq.s32.totalorder %v7298_v24, 1  ;;  %v7655_v24 = vld [vmem:[%s9063_s4 + $0x6c] ss:$16 sps:$4 sm:$0xff]  }
  0xfb   :  { %vm6054_vm11 = vmpackc.low %vm860_vm10, %vm860_vm10 }
 0x102   :  { %v777_v28 = vpop.f32.mrf.mxu0 }
 0x103   :  { %v825_v30 = vadd.f32 %v5454_v25, %v777_v28  ;;  %v7348_v28 = vld [vmem:[%s9062_s3 + $0xcc] ss:$16 sps:$4 sm:$0xff]  }
 0x104   :  { %v6457_v31 = vpop.eup %6456  ;;  %v779_v35 = vpop.f32.mrf.mxu0 }
 0x105   :  { %v530_v36 = vmul.f32 %v6457_v31, %v6455_v27  ;;  %v5526_v47 = vmul.f32 -1.442695, %v825_v30  ;;  %v826_v48 = vadd.f32 %v5455_v29, %v779_v35  ;;  %v818_v60 = vpop.f32.mrf.mxu1  ;;  %v7343_v27 = vld [vmem:[%s9062_s3 + $0xc4] ss:$16 sps:$4 sm:$0xff]   ;;  %v7353_v29 = vld [vmem:[%s9062_s3 + $0xc0] ss:$16 sps:$4 sm:$0xff]  }
 0x106   :  { %v6459_v51 = vpop.eup %6458  ;;  %v781_v52 = vpop.f32.mrf.mxu0  ;;  %v827_v7 = vadd.f32 %v5456_v5, %v818_v60  ;;  %v7358_v30 = vld [vmem:[%s9062_s3 + $0xc8] ss:$16 sps:$4 sm:$0xff]   ;;  %v7367_v31 = vld [vmem:[%s9062_s3 + $0xa4] ss:$16 sps:$4 sm:$0xff]   ;;  %v7425_v60 = vld [vmem:[%s9062_s3 + $0x60] ss:$16 sps:$4 sm:$0xff]  }
 0x107   :  { %v529_v53 = vmul.f32 0.0, %v6459_v51  ;;  %6460 = vpow2.f32 %v5526_v47  ;;  %v5527_v55 = vmul.f32 -1.442695, %v826_v48  ;;  %v820_v0 = vpop.f32.mrf.mxu1  ;;  %v7377_v35 = vld [vmem:[%s9062_s3 + $0xa8] ss:$16 sps:$4 sm:$0xff]  }
 0x108   :  { %6462 = vrcp.f32 %v526_v32  ;;  %v782_v62 = vpop.f32.mrf.mxu0  ;;  %v828_v6 = vadd.f32 %v5457_v1, %v820_v0  ;;  %v7372_v32 = vld [vmem:[%s9062_s3 + $0xa0] ss:$16 sps:$4 sm:$0xff]   ;;  %v7391_v47 = vld [vmem:[%s9062_s3 + $0x84] ss:$16 sps:$4 sm:$0xff]   ;;  %v7396_v48 = vld [vmem:[%s9062_s3 + $0x8c] ss:$16 sps:$4 sm:$0xff]  }
 0x109   :  { %v7242_v63 = vadd.f32 %v530_v36, %v529_v53  ;;  %6464 = vpow2.f32 %v5527_v55  ;;  %v822_v3 = vpop.f32.mrf.mxu1  ;;  %v7382_v36 = vld [vmem:[%s9062_s3 + $0xac] ss:$16 sps:$4 sm:$0xff]   ;;  %v7401_v51 = vld [vmem:[%s9062_s3 + $0x80] ss:$16 sps:$4 sm:$0xff]   ;;  %v7406_v52 = vld [vmem:[%s9062_s3 + $0x88] ss:$16 sps:$4 sm:$0xff]  }
 0x10a   :  { %v5528_v8 = vmul.f32 -1.442695, %v828_v6  ;;  %v7415_v53 = vld [vmem:[%s9062_s3 + $0x64] ss:$16 sps:$4 sm:$0xff]   ;;  %v7420_v55 = vld [vmem:[%s9062_s3 + $0x6c] ss:$16 sps:$4 sm:$0xff]  }
 0x10b   :  { %6466 = vtanh.f32 %v7242_v63  ;;  %v823_v4 = vpop.f32.mrf.mxu1  ;;  %v7430_v62 = vld [vmem:[%s9062_s3 + $0x68] ss:$16 sps:$4 sm:$0xff]   ;;  %v7439_v0 = vld [vmem:[%s9062_s3 + $0x44] ss:$16 sps:$4 sm:$0xff]   ;;  %v7444_v1 = vld [vmem:[%s9062_s3 + $0x4c] ss:$16 sps:$4 sm:$0xff]  }
 0x10c   :  { %6468 = vtanh.f32 %v827_v7  ;;  %v7449_v3 = vld [vmem:[%s9062_s3 + $0x40] ss:$16 sps:$4 sm:$0xff]   ;;  %v7454_v4 = vld [vmem:[%s9062_s3 + $0x48] ss:$16 sps:$4 sm:$0xff]   ;;  %v7463_v5 = vld [vmem:[%s9062_s3 + $0x24] ss:$16 sps:$4 sm:$0xff]  }
 0x10d   :  { %6470 = vpow2.f32 %v5528_v8  ;;  %v7468_v6 = vld [vmem:[%s9062_s3 + $0x2c] ss:$16 sps:$4 sm:$0xff]   ;;  %v7473_v7 = vld [vmem:[%s9062_s3 + $0x20] ss:$16 sps:$4 sm:$0xff]   ;;  %v7478_v8 = vld [vmem:[%s9062_s3 + $0x28] ss:$16 sps:$4 sm:$0xff]  }
 0x114   :  { %v6461_v9 = vpop.eup %6460 }
 0x115   :  { %v6463_v10 = vpop.eup %6462  ;;  %v832_v11 = vadd.f32 1.0, %v6461_v9  ;;  %v7487_v9 = vld [vmem:[%s9062_s3 + $0x4] ss:$16 sps:$4 sm:$0xff]  }
 0x116   :  { %v6465_v12 = vpop.eup %6464 }
 0x117   :  { %6472 = vrcp.f32 %v832_v11  ;;  %v838_v13 = vadd.f32 1.0, %v6465_v12  ;;  %v7497_v11 = vld [vmem:[%s9062_s3] ss:$16 sps:$4 sm:$0xff]   ;;  %v7502_v12 = vld [vmem:[%s9062_s3 + $0x8] ss:$16 sps:$4 sm:$0xff]  }
 0x118   :  { %v6467_v14 = vpop.eup %6466 }
 0x119   :  { %v533_v16 = vmul.f32 %v6467_v14, %v6463_v10  ;;  %6474 = vrcp.f32 %v838_v13  ;;  %v6469_v19 = vpop.eup %6468  ;;  %v7492_v10 = vld [vmem:[%s9062_s3 + $0xc] ss:$16 sps:$4 sm:$0xff]   ;;  %v7511_v13 = vld [vmem:[%s9063_s4 + $0xe4] ss:$16 sps:$4 sm:$0xff]  }
 0x11a   :  { %v6471_v20 = vpop.eup %6470  ;;  %v7516_v14 = vld [vmem:[%s9063_s4 + $0xec] ss:$16 sps:$4 sm:$0xff]  }
 0x11b   :  { %v7259_v17 = vsel %vm540_vm8, %v533_v16, 0.0  ;;  %v6049_v18 = vpack.c.bf16 %v533_v16, %v533_v16  ;;  %v845_v21 = vadd.f32 1.0, %v6471_v20  ;;  %v40_v16 = vld [vmem:[%s9060_s1 + $0x40] sm:$0xff]  ;;  %v42_v20 = vld [vmem:[%s9060_s1 + $0x48] sm:$0xff] }
 0x11c   :  { %544 = vst [vmem:[%s9064_s5] sm:$0xff] %v7259_v17 }
 0x11d   :  { %6050 = vmatmul.mubr.msk.bf16.vlgmr.msra.gmra.mxu0 %vm6048_vm9, %v6049_v18  ;;  %6053 = vmatmul.mubr.msk.bf16.vlgmr.msra.gmra.mxu1 %vm6048_vm9, %v6049_v18  ;;  %6476 = vrcp.f32 %v845_v21 }
 0x11e   :  { %1386 = vmatpush1.bf16.msra.mxu0 %v6957_v33  ;;  %1427 = vmatpush1.bf16.msra.mxu1 %v6995_v40 }
 0x11f   :  { %1387 = vmatprep.subr.bf16.mxu0 %v6962_v34  ;;  %1428 = vmatprep.subr.bf16.mxu1 %v7001_v41 }
 0x120   :  { %1417 = vmatprep.mubr.bf16.mxu0 %v9130_v57  ;;  %1458 = vmatprep.mubr.bf16.mxu1 %v9130_v57 }
 0x122   :  { %1388 = vmatpush1.bf16.msra.mxu0 %v6982_v38  ;;  %1429 = vmatpush1.bf16.msra.mxu1 %v7020_v44  ;;  %v9134_v44 = vld [vmem:[#allocation9_spill] sm:$0xff] }
 0x123   :  { %1389 = vmatprep.subr.bf16.mxu0 %v6987_v39  ;;  %1430 = vmatprep.subr.bf16.mxu1 %v7026_v45  ;;  %v9132_v39 = vld [vmem:[#allocation8_spill] sm:$0xff]  ;;  %v9136_v45 = vld [vmem:[#allocation14_spill] sm:$0xff] }
 0x124   :  { %v6473_v33 = vpop.eup %6472  ;;  %9142 = vst [vmem:[#allocation8_spill] sm:$0xff] %v7655_v24 }
 0x125   :  { %v849_v41 = vmul.f32 %v6473_v33, %v6469_v19 }
 0x126   :  { %v6475_v40 = vpop.eup %6474  ;;  %1390 = vmatpush1.bf16.msra.mxu0 %v7007_v42  ;;  %1431 = vmatpush1.bf16.msra.mxu1 %v7048_v49  ;;  %v9133_v42 = vld [vmem:[#allocation11_spill] sm:$0xff]  ;;  %v9137_v49 = vld [vmem:[#allocation12_spill] sm:$0xff] }
 0x127   :  { %v848_v34 = vmul.f32 0.0, %v6475_v40  ;;  %1391 = vmatprep.subr.bf16.mxu0 %v7012_v43  ;;  %1432 = vmatprep.subr.bf16.mxu1 %v7057_v50  ;;  %v9135_v43 = vld [vmem:[#allocation10_spill] sm:$0xff]  ;;  %v9139_v50 = vld [vmem:[#allocation17_spill] sm:$0xff] }
 0x129   :  { %v7279_v38 = vadd.f32 %v849_v41, %v848_v34 }
 0x12a   :  { %1392 = vmatpush1.bf16.msra.mxu0 %v7032_v46  ;;  %1433 = vmatpush1.bf16.msra.mxu1 %v7077_v54  ;;  %v9138_v46 = vld [vmem:[#allocation13_spill] sm:$0xff]  ;;  %v9140_v54 = vld [vmem:[#allocation15_spill] sm:$0xff]  ;;  %v6477_v22 = vpop.eup %6476 }
 0x12b   :  { %6478 = vtanh.f32 %v7279_v38  ;;  %1393 = vmatprep.subr.bf16.mxu0 %v9132_v39  ;;  %1434 = vmatprep.subr.bf16.mxu1 %v9133_v42 }
 0x12e   :  { %1394 = vmatpush1.bf16.msra.mxu0 %v9134_v44  ;;  %1435 = vmatpush1.bf16.msra.mxu1 %v7103_v59 }
 0x12f   :  { %1395 = vmatprep.subr.bf16.mxu0 %v9135_v43  ;;  %1436 = vmatprep.subr.bf16.mxu1 %v9136_v45 }
 0x132   :  { %1396 = vmatpush1.bf16.msra.mxu0 %v9137_v49  ;;  %1437 = vmatpush1.bf16.msra.mxu1 %v7132_v37  ;;  %v46_v49 = vld [vmem:[%s9060_s1 + $0x58] sm:$0xff] }
 0x133   :  { %1397 = vmatprep.subr.bf16.mxu0 %v9138_v46  ;;  %1438 = vmatprep.subr.bf16.mxu1 %v9139_v50  ;;  %v44_v50 = vld [vmem:[%s9060_s1 + $0x50] sm:$0xff] }
 0x136   :  { %1398 = vmatpush1.bf16.msra.mxu0 %v9140_v54  ;;  %1439 = vmatpush1.bf16.msra.mxu1 %v7156_v2  ;;  %v7319_v2 = vld [vmem:[%s9062_s3 + $0xe4] ss:$16 sps:$4 sm:$0xff]  }
 0x137   :  { %1399 = vmatprep.subr.bf16.mxu0 %v9141_v23  ;;  %1440 = vmatprep.subr.bf16.mxu1 %v7163_v58  ;;  %v7329_v58 = vld [vmem:[%s9062_s3 + $0xe0] ss:$16 sps:$4 sm:$0xff]  }
 0x138   :  { %v6479_v59 = vpop.eup %6478 }
 0x139   :  { %v852_v25 = vmul.f32 %v6479_v59, %v6477_v22 }
 0x13a   :  { %1400 = vmatpush1.bf16.msra.mxu0 %v7149_v56  ;;  %1441 = vmatpush1.bf16.msra.mxu1 %v7172_v61  ;;  %v7324_v56 = vld [vmem:[%s9062_s3 + $0xec] ss:$16 sps:$4 sm:$0xff]   ;;  %v7334_v61 = vld [vmem:[%s9062_s3 + $0xe8] ss:$16 sps:$4 sm:$0xff]  }
 0x13b   :  { %v6055_v37 = vpack.c.bf16 %v852_v25, %v852_v25  ;;  %v7305_v26 = vsel %vm860_vm10, %v852_v25, 0.0  ;;  %1706 = vmatprep.subr.bf16.mxu0 %v7319_v2  ;;  %1747 = vmatprep.subr.bf16.mxu1 %v7324_v56 }
 0x13c   :  { %5530 = vst [vmem:[%s9065_s6 + $0x38] sm:$0xff] %v7305_v26 }
 0x13d   :  { %6056 = vmatmul.mubr.msk.bf16.vlgmr.msra.gmra.mxu0 %vm6054_vm11, %v6055_v37  ;;  %6059 = vmatmul.mubr.msk.bf16.vlgmr.msra.gmra.mxu1 %vm6054_vm11, %v6055_v37 }
 0x13e   :  { %1738 = vmatprep.mubr.bf16.mxu0 %v9130_v57  ;;  %1779 = vmatprep.mubr.bf16.mxu1 %v9130_v57 }
 0x13f   :  { %1707 = vmatpush1.bf16.msra.mxu0 %v7329_v58  ;;  %1748 = vmatpush1.bf16.msra.mxu1 %v7334_v61 }
 0x140   :  { %1708 = vmatprep.subr.bf16.mxu0 %v7343_v27  ;;  %1749 = vmatprep.subr.bf16.mxu1 %v7348_v28 }
 0x143   :  { %1709 = vmatpush1.bf16.msra.mxu0 %v7353_v29  ;;  %1750 = vmatpush1.bf16.msra.mxu1 %v7358_v30 }
 0x144   :  { %1710 = vmatprep.subr.bf16.mxu0 %v7367_v31  ;;  %1751 = vmatprep.subr.bf16.mxu1 %v7382_v36 }
 0x147   :  { %1711 = vmatpush1.bf16.msra.mxu0 %v7372_v32  ;;  %1752 = vmatpush1.bf16.msra.mxu1 %v7377_v35 }
 0x148   :  { %1712 = vmatprep.subr.bf16.mxu0 %v7391_v47  ;;  %1753 = vmatprep.subr.bf16.mxu1 %v7396_v48 }
 0x14b   :  { %1713 = vmatpush1.bf16.msra.mxu0 %v7401_v51  ;;  %1754 = vmatpush1.bf16.msra.mxu1 %v7406_v52 }
 0x14c   :  { %1714 = vmatprep.subr.bf16.mxu0 %v7415_v53  ;;  %1755 = vmatprep.subr.bf16.mxu1 %v7420_v55 }
 0x14f   :  { %1715 = vmatpush1.bf16.msra.mxu0 %v7425_v60  ;;  %1756 = vmatpush1.bf16.msra.mxu1 %v7430_v62 }
 0x150   :  { %1716 = vmatprep.subr.bf16.mxu0 %v7439_v0  ;;  %1757 = vmatprep.subr.bf16.mxu1 %v7444_v1 }
 0x153   :  { %1717 = vmatpush1.bf16.msra.mxu0 %v7449_v3  ;;  %1758 = vmatpush1.bf16.msra.mxu1 %v7454_v4 }
 0x154   :  { %1718 = vmatprep.subr.bf16.mxu0 %v7463_v5  ;;  %1759 = vmatprep.subr.bf16.mxu1 %v7468_v6 }
 0x157   :  { %1719 = vmatpush1.bf16.msra.mxu0 %v7473_v7  ;;  %1760 = vmatpush1.bf16.msra.mxu1 %v7478_v8 }
 0x158   :  { %1720 = vmatprep.subr.bf16.mxu0 %v7487_v9  ;;  %1761 = vmatprep.subr.bf16.mxu1 %v7492_v10 }
 0x15b   :  { %1721 = vmatpush1.bf16.msra.mxu0 %v7497_v11  ;;  %1762 = vmatpush1.bf16.msra.mxu1 %v7502_v12 }
 0x15c   :  { %2027 = vmatprep.subr.bf16.mxu0 %v7511_v13  ;;  %2068 = vmatprep.subr.bf16.mxu1 %v7516_v14 }
 0x1dd   :  { %v1098_v18 = vpop.f32.mrf.mxu0  ;;  %v1139_v19 = vpop.f32.mrf.mxu1 }
 0x1de   :  { %v1146_v33 = vadd.f32 %v1098_v18, %v40_v16  ;;  %v1148_v23 = vadd.f32 %v1139_v19, %v44_v50  ;;  %v5450_v16 = vld [vmem:[%s9061_s2 + $0x1a0] sm:$0xff] }
 0x1df   :  { %v1100_v40 = vpop.f32.mrf.mxu0  ;;  %v1141_v21 = vpop.f32.mrf.mxu1 }
 0x1e0   :  { %v5563_v34 = vmul.f32 -1.442695, %v1146_v33  ;;  %v1147_v41 = vadd.f32 %v1100_v40, %v42_v20  ;;  %v1149_v46 = vadd.f32 %v1141_v21, %v46_v49  ;;  %v5451_v33 = vld [vmem:[%s9061_s2 + $0x1a8] sm:$0xff] }
 0x1e1   :  { %v1102_v39 = vpop.f32.mrf.mxu0  ;;  %v1143_v42 = vpop.f32.mrf.mxu1 }
 0x1e2   :  { %6480 = vpow2.f32 %v5563_v34  ;;  %v5564_v44 = vmul.f32 -1.442695, %v1147_v41  ;;  %v5565_v54 = vmul.f32 -1.442695, %v1149_v46 }
 0x1e3   :  { %v1103_v43 = vpop.f32.mrf.mxu0  ;;  %v1144_v45 = vpop.f32.mrf.mxu1 }
 0x1e4   :  { %6482 = vpow2.f32 %v5564_v44  ;;  %v542_v45 = vsel %vm540_vm8, %v7242_v63, 0.0  ;;  %v5453_v63 = vld [vmem:[%s9061_s2 + $0x1b8] sm:$0xff] }
 0x1e5   :  { %6484 = vpow2.f32 %v5565_v54  ;;  %v1180_v54 = vpop.permute.xlu1 %1179 }
 0x1e6   :  { %vm1181_vm12 = vcmp.eq.s32.totalorder %v1180_v54, 1  ;;  %v7578_v54 = vld [vmem:[%s9063_s4 + $0xcc] ss:$16 sps:$4 sm:$0xff]  }
 0x1ef   :  { %v6481_v22 = vpop.eup %6480 }
 0x1f0   :  { %v1153_v59 = vadd.f32 1.0, %v6481_v22 }
 0x1f1   :  { %v6483_v25 = vpop.eup %6482 }
 0x1f2   :  { %6486 = vrcp.f32 %v1153_v59  ;;  %v1159_v37 = vadd.f32 1.0, %v6483_v25  ;;  %v6485_v40 = vpop.eup %6484 }
 0x1f3   :  { %6488 = vtanh.f32 %v1148_v23  ;;  %v1166_v49 = vadd.f32 1.0, %v6485_v40 }
 0x1f4   :  { %6490 = vrcp.f32 %v1159_v37 }
 0x1fd   :  { %v1419_v18 = vpop.f32.mrf.mxu0  ;;  %v1460_v20 = vpop.f32.mrf.mxu1 }
 0x1fe   :  { %v1467_v21 = vadd.f32 %v5450_v16, %v1419_v18 }
 0x1ff   :  { %v6487_v19 = vpop.eup %6486  ;;  %v1421_v34 = vpop.f32.mrf.mxu0 }
 0x200   :  { %v1462_v41 = vpop.f32.mrf.mxu1  ;;  %v6489_v39 = vpop.eup %6488  ;;  %v5600_v42 = vmul.f32 -1.442695, %v1467_v21  ;;  %v1468_v44 = vadd.f32 %v5451_v33, %v1421_v34  ;;  %v5452_v33 = vld [vmem:[%s9061_s2 + $0x1b0] sm:$0xff] }
 0x201   :  { %v6491_v43 = vpop.eup %6490  ;;  %v1423_v46 = vpop.f32.mrf.mxu0  ;;  %v1170_v23 = vmul.f32 %v6489_v39, %v6487_v19  ;;  %v1470_v15 = vadd.f32 %v5453_v63, %v1462_v41  ;;  %v1469_v19 = vadd.f32 %v5452_v33, %v1460_v20  ;;  %v7558_v20 = vld [vmem:[%s9063_s4 + $0xe0] ss:$16 sps:$4 sm:$0xff]   ;;  %v7616_v63 = vld [vmem:[%s9063_s4 + $0xa8] ss:$16 sps:$4 sm:$0xff]   ;;  %v7623_v33 = vld [vmem:[%s9063_s4 + $0x84] ss:$16 sps:$4 sm:$0xff]  }
 0x202   :  { %v1464_v50 = vpop.f32.mrf.mxu1  ;;  %v1169_v22 = vmul.f32 %v6491_v43, %v542_v45  ;;  %6492 = vpow2.f32 %v5600_v42  ;;  %v5601_v59 = vmul.f32 -1.442695, %v1468_v44  ;;  %v7563_v46 = vld [vmem:[%s9063_s4 + $0xe8] ss:$16 sps:$4 sm:$0xff]  }
 0x203   :  { %v1424_v25 = vpop.f32.mrf.mxu0  ;;  %v5602_v40 = vmul.f32 -1.442695, %v1470_v15  ;;  %v7573_v50 = vld [vmem:[%s9063_s4 + $0xc4] ss:$16 sps:$4 sm:$0xff]  }
 0x204   :  { %v1465_v37 = vpop.f32.mrf.mxu1  ;;  %v1171_v16 = vadd.f32 %v1170_v23, %v1169_v22  ;;  %6494 = vpow2.f32 %v5601_v59  ;;  %v7585_v22 = vld [vmem:[%s9063_s4 + $0xc0] ss:$16 sps:$4 sm:$0xff]   ;;  %v7590_v23 = vld [vmem:[%s9063_s4 + $0xc8] ss:$16 sps:$4 sm:$0xff]   ;;  %v7597_v59 = vld [vmem:[%s9063_s4 + $0xa4] ss:$16 sps:$4 sm:$0xff]  }
 0x205   :  { %6496 = vrcp.f32 %v1166_v49  ;;  %v7602_v25 = vld [vmem:[%s9063_s4 + $0xac] ss:$16 sps:$4 sm:$0xff]  }
 0x206   :  { %6498 = vtanh.f32 %v1171_v16  ;;  %v7542_v18 = vsel %vm1181_vm12, %v1171_v16, %v542_v45  ;;  %v7611_v16 = vld [vmem:[%s9063_s4 + $0xa0] ss:$16 sps:$4 sm:$0xff]  }
 0x207   :  { %6500 = vpow2.f32 %v5602_v40  ;;  %v7628_v40 = vld [vmem:[%s9063_s4 + $0x8c] ss:$16 sps:$4 sm:$0xff]  }
 0x20f   :  { %v6493_v21 = vpop.eup %6492 }
 0x210   :  { %v1474_v34 = vadd.f32 1.0, %v6493_v21 }
 0x211   :  { %v6495_v39 = vpop.eup %6494 }
 0x212   :  { %v6497_v42 = vpop.eup %6496  ;;  %6502 = vrcp.f32 %v1474_v34  ;;  %v1480_v44 = vadd.f32 1.0, %v6495_v39  ;;  %v862_v34 = vsel %vm860_vm10, %v7279_v38, 0.0  ;;  %v7650_v38 = vld [vmem:[%s9063_s4 + $0x64] ss:$16 sps:$4 sm:$0xff]  }
 0x213   :  { %v6499_v43 = vpop.eup %6498  ;;  %6504 = vtanh.f32 %v1469_v19 }
 0x214   :  { %v1173_v45 = vmul.f32 %v6499_v43, %v6497_v42  ;;  %6506 = vrcp.f32 %v1480_v44  ;;  %v6501_v37 = vpop.eup %6500  ;;  %v7638_v43 = vld [vmem:[%s9063_s4 + $0x80] ss:$16 sps:$4 sm:$0xff]  }
 0x215   :  { %v1487_v39 = vadd.f32 1.0, %v6501_v37  ;;  %v7662_v37 = vld [vmem:[%s9063_s4 + $0x60] ss:$16 sps:$4 sm:$0xff]  }
 0x216   :  { %v7552_v41 = vsel %vm1181_vm12, %v1173_v45, %v7259_v17  ;;  %v1184_v49 = vsel %vm1181_vm12, %v1173_v45, 0.0  ;;  %v7643_v45 = vld [vmem:[%s9063_s4 + $0x88] ss:$16 sps:$4 sm:$0xff]   ;;  %9143 = vst [vmem:[#allocation11_spill] sm:$0xff] %v7662_v37 }
 0x217   :  { %5567 = vst [vmem:[%s9064_s5 + $0x8] sm:$0xff] %v1184_v49  ;;  %v1513_v17 = vpack.c.bf16 %v7552_v41, %v7552_v41  ;;  %v1501_v49 = vpop.permute.xlu1 %1500  ;;  %6508 = vrcp.f32 %v1487_v39  ;;  %v7682_v39 = vld [vmem:[%s9063_s4 + $0x4c] ss:$16 sps:$4 sm:$0xff]  }
 0x218   :  { %vm1502_vm13 = vcmp.eq.s32.totalorder %v1501_v49, 1  ;;  %9146 = vst [vmem:[#allocation14_spill] sm:$0xff] %v7682_v39 }
 0x219   :  { %1739 = vmatmul.mubr.bf16.vlgmr.msra.gmra.mxu0 %v1513_v17  ;;  %1780 = vmatmul.mubr.bf16.vlgmr.msra.gmra.mxu1 %v1513_v17 }
 0x21a   :  { %2028 = vmatpush1.bf16.msra.mxu0 %v7558_v20  ;;  %2069 = vmatpush1.bf16.msra.mxu1 %v7563_v46 }
 0x21b   :  { %2029 = vmatprep.subr.bf16.mxu0 %v7573_v50  ;;  %2070 = vmatprep.subr.bf16.mxu1 %v7578_v54 }
 0x21c   :  { %2059 = vmatprep.mubr.bf16.mxu0 %v9130_v57  ;;  %2100 = vmatprep.mubr.bf16.mxu1 %v9130_v57 }
 0x21e   :  { %2030 = vmatpush1.bf16.msra.mxu0 %v7585_v22  ;;  %2071 = vmatpush1.bf16.msra.mxu1 %v7590_v23 }
 0x21f   :  { %v6503_v15 = vpop.eup %6502  ;;  %2031 = vmatprep.subr.bf16.mxu0 %v7597_v59  ;;  %2072 = vmatprep.subr.bf16.mxu1 %v7602_v25 }
 0x220   :  { %v6505_v21 = vpop.eup %6504 }
 0x221   :  { %v6507_v19 = vpop.eup %6506  ;;  %v1491_v42 = vmul.f32 %v6505_v21, %v6503_v15  ;;  %v7667_v15 = vld [vmem:[%s9063_s4 + $0x68] ss:$16 sps:$4 sm:$0xff]  }
 0x222   :  { %v1490_v44 = vmul.f32 %v6507_v19, %v862_v34  ;;  %2032 = vmatpush1.bf16.msra.mxu0 %v7611_v16  ;;  %2073 = vmatpush1.bf16.msra.mxu1 %v7616_v63  ;;  %9144 = vst [vmem:[#allocation9_spill] sm:$0xff] %v7667_v15  ;;  %v7677_v19 = vld [vmem:[%s9063_s4 + $0x44] ss:$16 sps:$4 sm:$0xff]  }
 0x223   :  { %2033 = vmatprep.subr.bf16.mxu0 %v7623_v33  ;;  %2074 = vmatprep.subr.bf16.mxu1 %v7628_v40  ;;  %9145 = vst [vmem:[#allocation10_spill] sm:$0xff] %v7677_v19 }
 0x224   :  { %v1492_v17 = vadd.f32 %v1491_v42, %v1490_v44  ;;  %v7694_v42 = vld [vmem:[%s9063_s4 + $0x48] ss:$16 sps:$4 sm:$0xff]   ;;  %v7701_v44 = vld [vmem:[%s9063_s4 + $0x24] ss:$16 sps:$4 sm:$0xff]  }
 0x225   :  { %9148 = vst [vmem:[#allocation13_spill] sm:$0xff] %v7694_v42  ;;  %9149 = vst [vmem:[#allocation17_spill] sm:$0xff] %v7701_v44 }
 0x226   :  { %6510 = vtanh.f32 %v1492_v17  ;;  %2034 = vmatpush1.bf16.msra.mxu0 %v7638_v43  ;;  %2075 = vmatpush1.bf16.msra.mxu1 %v7643_v45  ;;  %v7670_v21 = vsel %vm1502_vm13, %v1492_v17, %v862_v34  ;;  %v7689_v34 = vld [vmem:[%s9063_s4 + $0x40] ss:$16 sps:$4 sm:$0xff]   ;;  %v7706_v17 = vld [vmem:[%s9063_s4 + $0x2c] ss:$16 sps:$4 sm:$0xff]  }
 0x227   :  { %2035 = vmatprep.subr.bf16.mxu0 %v7650_v38  ;;  %2076 = vmatprep.subr.bf16.mxu1 %v7655_v24  ;;  %9147 = vst [vmem:[#allocation12_spill] sm:$0xff] %v7689_v34  ;;  %9150 = vst [vmem:[#allocation15_spill] sm:$0xff] %v7706_v17 }
 0x22a   :  { %2036 = vmatpush1.bf16.msra.mxu0 %v7662_v37  ;;  %2077 = vmatpush1.bf16.msra.mxu1 %v7667_v15  ;;  %v6509_v15 = vpop.eup %6508 }
 0x22b   :  { %2037 = vmatprep.subr.bf16.mxu0 %v7677_v19  ;;  %2078 = vmatprep.subr.bf16.mxu1 %v7682_v39  ;;  %v7713_v19 = vld [vmem:[%s9063_s4 + $0x20] ss:$16 sps:$4 sm:$0xff]   ;;  %v7718_v39 = vld [vmem:[%s9063_s4 + $0x28] ss:$16 sps:$4 sm:$0xff]  }
 0x22c   :  { %9151 = vst [vmem:[#allocation16_spill] sm:$0xff] %v7713_v19  ;;  %9152 = vst [vmem:[#allocation18_spill] sm:$0xff] %v7718_v39 }
 0x22e   :  { %2038 = vmatpush1.bf16.msra.mxu0 %v7689_v34  ;;  %2079 = vmatpush1.bf16.msra.mxu1 %v7694_v42  ;;  %v7725_v34 = vld [vmem:[%s9063_s4 + $0x4] ss:$16 sps:$4 sm:$0xff]   ;;  %v7730_v42 = vld [vmem:[%s9063_s4 + $0xc] ss:$16 sps:$4 sm:$0xff]  }
 0x22f   :  { %2039 = vmatprep.subr.bf16.mxu0 %v7701_v44  ;;  %2080 = vmatprep.subr.bf16.mxu1 %v7706_v17  ;;  %9153 = vst [vmem:[#allocation19_spill] sm:$0xff] %v7725_v34  ;;  %v7737_v44 = vld [vmem:[%s9063_s4] ss:$16 sps:$4 sm:$0xff]   ;;  %v7742_v17 = vld [vmem:[%s9063_s4 + $0x8] ss:$16 sps:$4 sm:$0xff]  }
 0x232   :  { %2040 = vmatpush1.bf16.msra.mxu0 %v7713_v19  ;;  %2081 = vmatpush1.bf16.msra.mxu1 %v7718_v39 }
 0x233   :  { %v6511_v37 = vpop.eup %6510  ;;  %2041 = vmatprep.subr.bf16.mxu0 %v7725_v34  ;;  %2082 = vmatprep.subr.bf16.mxu1 %v7730_v42 }
 0x234   :  { %v1494_v24 = vmul.f32 %v6511_v37, %v6509_v15 }
 0x236   :  { %2042 = vmatpush1.bf16.msra.mxu0 %v7737_v44  ;;  %2083 = vmatpush1.bf16.msra.mxu1 %v7742_v17  ;;  %v7750_v39 = vsel %vm1502_vm13, %v1494_v24, %v7305_v26  ;;  %v1505_v19 = vsel %vm1502_vm13, %v1494_v24, 0.0  ;;  %v48_v26 = vld [vmem:[%s9060_s1 + $0x80] sm:$0xff] }
 0x237   :  { %5604 = vst [vmem:[%s9065_s6 + $0x30] sm:$0xff] %v1505_v19  ;;  %v1834_v34 = vpack.c.bf16 %v7750_v39, %v7750_v39  ;;  %2348 = vmatprep.subr.bf16.mxu0 %v7319_v2  ;;  %2389 = vmatprep.subr.bf16.mxu1 %v7324_v56 }
 0x239   :  { %2060 = vmatmul.mubr.bf16.vlgmr.msra.gmra.mxu0 %v1834_v34  ;;  %2101 = vmatmul.mubr.bf16.vlgmr.msra.gmra.mxu1 %v1834_v34 }
 0x23a   :  { %2349 = vmatpush1.bf16.msra.mxu0 %v7329_v58  ;;  %2390 = vmatpush1.bf16.msra.mxu1 %v7334_v61  ;;  %v50_v58 = vld [vmem:[%s9060_s1 + $0x88] sm:$0xff] }
 0x23b   :  { %2350 = vmatprep.subr.bf16.mxu0 %v7343_v27  ;;  %2391 = vmatprep.subr.bf16.mxu1 %v7348_v28 }
 0x23c   :  { %2380 = vmatprep.mubr.bf16.mxu0 %v9130_v57  ;;  %2421 = vmatprep.mubr.bf16.mxu1 %v9130_v57 }
 0x23e   :  { %2351 = vmatpush1.bf16.msra.mxu0 %v7353_v29  ;;  %2392 = vmatpush1.bf16.msra.mxu1 %v7358_v30 }
 0x23f   :  { %2352 = vmatprep.subr.bf16.mxu0 %v7367_v31  ;;  %2393 = vmatprep.subr.bf16.mxu1 %v7382_v36 }
 0x242   :  { %2353 = vmatpush1.bf16.msra.mxu0 %v7372_v32  ;;  %2394 = vmatpush1.bf16.msra.mxu1 %v7377_v35 }
 0x243   :  { %2354 = vmatprep.subr.bf16.mxu0 %v7391_v47  ;;  %2395 = vmatprep.subr.bf16.mxu1 %v7396_v48  ;;  %v54_v48 = vld [vmem:[%s9060_s1 + $0x98] sm:$0xff] }
 0x246   :  { %2355 = vmatpush1.bf16.msra.mxu0 %v7401_v51  ;;  %2396 = vmatpush1.bf16.msra.mxu1 %v7406_v52  ;;  %v52_v52 = vld [vmem:[%s9060_s1 + $0x90] sm:$0xff] }
 0x247   :  { %2356 = vmatprep.subr.bf16.mxu0 %v7415_v53  ;;  %2397 = vmatprep.subr.bf16.mxu1 %v7420_v55 }
 0x24a   :  { %2357 = vmatpush1.bf16.msra.mxu0 %v7425_v60  ;;  %2398 = vmatpush1.bf16.msra.mxu1 %v7430_v62 }
 0x24b   :  { %2358 = vmatprep.subr.bf16.mxu0 %v7439_v0  ;;  %2399 = vmatprep.subr.bf16.mxu1 %v7444_v1 }
 0x24e   :  { %2359 = vmatpush1.bf16.msra.mxu0 %v7449_v3  ;;  %2400 = vmatpush1.bf16.msra.mxu1 %v7454_v4  ;;  %v5446_v3 = vld [vmem:[%s9061_s2 + $0x160] sm:$0xff] }
 0x24f   :  { %2360 = vmatprep.subr.bf16.mxu0 %v7463_v5  ;;  %2401 = vmatprep.subr.bf16.mxu1 %v7468_v6  ;;  %v5447_v6 = vld [vmem:[%s9061_s2 + $0x168] sm:$0xff] }
 0x252   :  { %2361 = vmatpush1.bf16.msra.mxu0 %v7473_v7  ;;  %2402 = vmatpush1.bf16.msra.mxu1 %v7478_v8 }
 0x253   :  { %2362 = vmatprep.subr.bf16.mxu0 %v7487_v9  ;;  %2403 = vmatprep.subr.bf16.mxu1 %v7492_v10 }
 0x256   :  { %2363 = vmatpush1.bf16.msra.mxu0 %v7497_v11  ;;  %2404 = vmatpush1.bf16.msra.mxu1 %v7502_v12 }
 0x257   :  { %2669 = vmatprep.subr.bf16.mxu0 %v7511_v13  ;;  %2710 = vmatprep.subr.bf16.mxu1 %v7516_v14 }
 0x2d9   :  { %v1740_v2 = vpop.f32.mrf.mxu0  ;;  %v1781_v56 = vpop.f32.mrf.mxu1 }
 0x2da   :  { %v1788_v61 = vadd.f32 %v1740_v2, %v48_v26  ;;  %v1790_v60 = vadd.f32 %v1781_v56, %v52_v52 }
 0x2db   :  { %v1742_v27 = vpop.f32.mrf.mxu0  ;;  %v1783_v28 = vpop.f32.mrf.mxu1 }
 0x2dc   :  { %v5637_v29 = vmul.f32 -1.442695, %v1788_v61  ;;  %v1789_v30 = vadd.f32 %v1742_v27, %v50_v58  ;;  %v1791_v51 = vadd.f32 %v1783_v28, %v54_v48  ;;  %v1822_v58 = vpop.permute.xlu0 %1821  ;;  %v5449_v27 = vld [vmem:[%s9061_s2 + $0x178] sm:$0xff] }
 0x2dd   :  { %v1744_v31 = vpop.f32.mrf.mxu0  ;;  %v1785_v32 = vpop.f32.mrf.mxu1  ;;  %vm1823_vm14 = vcmp.eq.s32.totalorder %v1822_v58, 1  ;;  %v7986_v58 = vld [vmem:[%s9062_s3 + $0x6c] ss:$16 sps:$4 sm:$0xff]  }
 0x2de   :  { %6512 = vpow2.f32 %v5637_v29  ;;  %v5638_v35 = vmul.f32 -1.442695, %v1789_v30  ;;  %v5639_v53 = vmul.f32 -1.442695, %v1791_v51  ;;  %v5448_v30 = vld [vmem:[%s9061_s2 + $0x170] sm:$0xff] }
 0x2df   :  { %v1745_v36 = vpop.f32.mrf.mxu0  ;;  %v1786_v47 = vpop.f32.mrf.mxu1 }
 0x2e0   :  { %6514 = vpow2.f32 %v5638_v35 }
 0x2e1   :  { %6516 = vpow2.f32 %v5639_v53 }
 0x2eb   :  { %v6513_v55 = vpop.eup %6512 }
 0x2ec   :  { %v1795_v62 = vadd.f32 1.0, %v6513_v55 }
 0x2ed   :  { %v6515_v0 = vpop.eup %6514 }
 0x2ee   :  { %6518 = vrcp.f32 %v1795_v62  ;;  %v1801_v1 = vadd.f32 1.0, %v6515_v0  ;;  %v6517_v7 = vpop.eup %6516 }
 0x2ef   :  { %6520 = vtanh.f32 %v1790_v60  ;;  %v1808_v49 = vadd.f32 1.0, %v6517_v7 }
 0x2f0   :  { %6522 = vrcp.f32 %v1801_v1  ;;  %v9159_v1 = vld [vmem:[#allocation12_spill] sm:$0xff] }
 0x2f9   :  { %v2061_v4 = vpop.f32.mrf.mxu0  ;;  %v2102_v5 = vpop.f32.mrf.mxu1 }
 0x2fa   :  { %v2109_v8 = vadd.f32 %v5446_v3, %v2061_v4  ;;  %v2111_v35 = vadd.f32 %v5448_v30, %v2102_v5  ;;  %v9164_v4 = vld [vmem:[#allocation18_spill] sm:$0xff]  ;;  %v8010_v30 = vld [vmem:[%s9062_s3 + $0x4c] ss:$16 sps:$4 sm:$0xff]  }
 0x2fb   :  { %v6519_v9 = vpop.eup %6518  ;;  %v2063_v10 = vpop.f32.mrf.mxu0 }
 0x2fc   :  { %v2104_v11 = vpop.f32.mrf.mxu1  ;;  %v6521_v12 = vpop.eup %6520  ;;  %v5674_v13 = vmul.f32 -1.442695, %v2109_v8  ;;  %v2110_v14 = vadd.f32 %v5447_v6, %v2063_v10  ;;  %v9165_v6 = vld [vmem:[#allocation19_spill] sm:$0xff] }
 0x2fd   :  { %v6523_v24 = vpop.eup %6522  ;;  %v2065_v37 = vpop.f32.mrf.mxu0  ;;  %v1812_v19 = vmul.f32 %v6521_v12, %v6519_v9  ;;  %v2112_v29 = vadd.f32 %v5449_v27, %v2104_v11  ;;  %v7909_v11 = vld [vmem:[%s9062_s3 + $0xc4] ss:$16 sps:$4 sm:$0xff]   ;;  %v7914_v12 = vld [vmem:[%s9062_s3 + $0xcc] ss:$16 sps:$4 sm:$0xff]   ;;  %v7996_v27 = vld [vmem:[%s9062_s3 + $0x68] ss:$16 sps:$4 sm:$0xff]  }
 0x2fe   :  { %v2106_v15 = vpop.f32.mrf.mxu1  ;;  %v1811_v34 = vmul.f32 %v6523_v24, %v7542_v18  ;;  %6524 = vpow2.f32 %v5674_v13  ;;  %v5675_v26 = vmul.f32 -1.442695, %v2110_v14  ;;  %v7919_v13 = vld [vmem:[%s9062_s3 + $0xc0] ss:$16 sps:$4 sm:$0xff]   ;;  %v7924_v14 = vld [vmem:[%s9062_s3 + $0xc8] ss:$16 sps:$4 sm:$0xff]  }
 0x2ff   :  { %v2066_v2 = vpop.f32.mrf.mxu0  ;;  %v5676_v31 = vmul.f32 -1.442695, %v2112_v29  ;;  %v7933_v24 = vld [vmem:[%s9062_s3 + $0xa4] ss:$16 sps:$4 sm:$0xff]   ;;  %v7943_v37 = vld [vmem:[%s9062_s3 + $0xa8] ss:$16 sps:$4 sm:$0xff]  }
 0x300   :  { %v2107_v56 = vpop.f32.mrf.mxu1  ;;  %v1813_v61 = vadd.f32 %v1812_v19, %v1811_v34  ;;  %6526 = vpow2.f32 %v5675_v26  ;;  %v7948_v15 = vld [vmem:[%s9062_s3 + $0xac] ss:$16 sps:$4 sm:$0xff]   ;;  %v7957_v19 = vld [vmem:[%s9062_s3 + $0x84] ss:$16 sps:$4 sm:$0xff]   ;;  %v7967_v26 = vld [vmem:[%s9062_s3 + $0x80] ss:$16 sps:$4 sm:$0xff]  }
 0x301   :  { %6528 = vrcp.f32 %v1808_v49  ;;  %v7938_v49 = vld [vmem:[%s9062_s3 + $0xa0] ss:$16 sps:$4 sm:$0xff]   ;;  %v7962_v34 = vld [vmem:[%s9062_s3 + $0x8c] ss:$16 sps:$4 sm:$0xff]   ;;  %v7972_v2 = vld [vmem:[%s9062_s3 + $0x88] ss:$16 sps:$4 sm:$0xff]  }
 0x302   :  { %6530 = vtanh.f32 %v1813_v61  ;;  %v7818_v28 = vsel %vm1823_vm14, %v1813_v61, %v7542_v18  ;;  %v7981_v56 = vld [vmem:[%s9062_s3 + $0x64] ss:$16 sps:$4 sm:$0xff]   ;;  %v7991_v61 = vld [vmem:[%s9062_s3 + $0x60] ss:$16 sps:$4 sm:$0xff]  }
 0x303   :  { %6532 = vpow2.f32 %v5676_v31  ;;  %v8005_v29 = vld [vmem:[%s9062_s3 + $0x44] ss:$16 sps:$4 sm:$0xff]   ;;  %v8015_v31 = vld [vmem:[%s9062_s3 + $0x40] ss:$16 sps:$4 sm:$0xff]  }
 0x30b   :  { %v6525_v32 = vpop.eup %6524 }
 0x30c   :  { %v2116_v36 = vadd.f32 1.0, %v6525_v32  ;;  %v8020_v32 = vld [vmem:[%s9062_s3 + $0x48] ss:$16 sps:$4 sm:$0xff]  }
 0x30d   :  { %v6527_v47 = vpop.eup %6526 }
 0x30e   :  { %v6529_v48 = vpop.eup %6528  ;;  %6534 = vrcp.f32 %v2116_v36  ;;  %v2122_v51 = vadd.f32 1.0, %v6527_v47  ;;  %v8034_v36 = vld [vmem:[%s9062_s3 + $0x2c] ss:$16 sps:$4 sm:$0xff]   ;;  %v8039_v47 = vld [vmem:[%s9062_s3 + $0x20] ss:$16 sps:$4 sm:$0xff]  }
 0x30f   :  { %v6531_v52 = vpop.eup %6530  ;;  %6536 = vtanh.f32 %v2111_v35  ;;  %v8029_v35 = vld [vmem:[%s9062_s3 + $0x24] ss:$16 sps:$4 sm:$0xff]  }
 0x310   :  { %6538 = vrcp.f32 %v2122_v51  ;;  %v1815_v53 = vmul.f32 %v6531_v52, %v6529_v48  ;;  %v8044_v48 = vld [vmem:[%s9062_s3 + $0x28] ss:$16 sps:$4 sm:$0xff]   ;;  %v8053_v51 = vld [vmem:[%s9062_s3 + $0x4] ss:$16 sps:$4 sm:$0xff]   ;;  %v8058_v52 = vld [vmem:[%s9062_s3 + $0xc] ss:$16 sps:$4 sm:$0xff]  }
 0x312   :  { %v7825_v18 = vsel %vm1823_vm14, %v1815_v53, %v7552_v41  ;;  %v1826_v55 = vsel %vm1823_vm14, %v1815_v53, 0.0  ;;  %v6533_v41 = vpop.eup %6532  ;;  %v8063_v53 = vld [vmem:[%s9062_s3] ss:$16 sps:$4 sm:$0xff]  }
 0x313   :  { %5641 = vst [vmem:[%s9064_s5 + $0x10] sm:$0xff] %v1826_v55  ;;  %v2155_v60 = vpack.c.bf16 %v7825_v18, %v7825_v18  ;;  %v2129_v0 = vadd.f32 1.0, %v6533_v41  ;;  %v8068_v55 = vld [vmem:[%s9062_s3 + $0x8] ss:$16 sps:$4 sm:$0xff]   ;;  %v8082_v41 = vld [vmem:[%s9063_s4 + $0xec] ss:$16 sps:$4 sm:$0xff]  }
 0x315   :  { %2381 = vmatmul.mubr.bf16.vlgmr.msra.gmra.mxu0 %v2155_v60  ;;  %2422 = vmatmul.mubr.bf16.vlgmr.msra.gmra.mxu1 %v2155_v60  ;;  %6540 = vrcp.f32 %v2129_v0  ;;  %v8077_v60 = vld [vmem:[%s9063_s4 + $0xe4] ss:$16 sps:$4 sm:$0xff]   ;;  %v58_v0 = vld [vmem:[%s9060_s1 + $0xc8] sm:$0xff] }
 0x316   :  { %2670 = vmatpush1.bf16.msra.mxu0 %v7558_v20  ;;  %2711 = vmatpush1.bf16.msra.mxu1 %v7563_v46 }
 0x317   :  { %2671 = vmatprep.subr.bf16.mxu0 %v7573_v50  ;;  %2712 = vmatprep.subr.bf16.mxu1 %v7578_v54 }
 0x318   :  { %2701 = vmatprep.mubr.bf16.mxu0 %v9130_v57  ;;  %2742 = vmatprep.mubr.bf16.mxu1 %v9130_v57 }
 0x31a   :  { %2672 = vmatpush1.bf16.msra.mxu0 %v7585_v22  ;;  %2713 = vmatpush1.bf16.msra.mxu1 %v7590_v23  ;;  %v2143_v22 = vpop.permute.xlu1 %2142 }
 0x31b   :  { %v6535_v62 = vpop.eup %6534  ;;  %2673 = vmatprep.subr.bf16.mxu0 %v7597_v59  ;;  %2714 = vmatprep.subr.bf16.mxu1 %v7602_v25  ;;  %vm2144_vm15 = vcmp.eq.s32.totalorder %v2143_v22, 1  ;;  %v9154_v25 = vld [vmem:[#allocation8_spill] sm:$0xff] }
 0x31c   :  { %v6537_v20 = vpop.eup %6536 }
 0x31d   :  { %v6539_v46 = vpop.eup %6538  ;;  %v2133_v50 = vmul.f32 %v6537_v20, %v6535_v62  ;;  %v56_v62 = vld [vmem:[%s9060_s1 + $0xc0] sm:$0xff] }
 0x31e   :  { %v2132_v54 = vmul.f32 %v6539_v46, %v7670_v21  ;;  %2674 = vmatpush1.bf16.msra.mxu0 %v7611_v16  ;;  %2715 = vmatpush1.bf16.msra.mxu1 %v7616_v63  ;;  %v9155_v16 = vld [vmem:[#allocation11_spill] sm:$0xff]  ;;  %v9156_v63 = vld [vmem:[#allocation9_spill] sm:$0xff] }
 0x31f   :  { %2675 = vmatprep.subr.bf16.mxu0 %v7623_v33  ;;  %2716 = vmatprep.subr.bf16.mxu1 %v7628_v40  ;;  %v9157_v33 = vld [vmem:[#allocation10_spill] sm:$0xff] }
 0x320   :  { %v2134_v23 = vadd.f32 %v2133_v50, %v2132_v54  ;;  %v9158_v40 = vld [vmem:[#allocation14_spill] sm:$0xff] }
 0x322   :  { %6542 = vtanh.f32 %v2134_v23  ;;  %2676 = vmatpush1.bf16.msra.mxu0 %v7638_v43  ;;  %2717 = vmatpush1.bf16.msra.mxu1 %v7643_v45  ;;  %v7852_v59 = vsel %vm2144_vm15, %v2134_v23, %v7670_v21  ;;  %v9160_v43 = vld [vmem:[#allocation13_spill] sm:$0xff]  ;;  %v9162_v21 = vld [vmem:[#allocation15_spill] sm:$0xff]  ;;  %v6541_v3 = vpop.eup %6540 }
 0x323   :  { %2677 = vmatprep.subr.bf16.mxu0 %v7650_v38  ;;  %2718 = vmatprep.subr.bf16.mxu1 %v9154_v25  ;;  %v9161_v45 = vld [vmem:[#allocation17_spill] sm:$0xff]  ;;  %v9163_v38 = vld [vmem:[#allocation16_spill] sm:$0xff] }
 0x326   :  { %2678 = vmatpush1.bf16.msra.mxu0 %v9155_v16  ;;  %2719 = vmatpush1.bf16.msra.mxu1 %v9156_v63 }
 0x327   :  { %2679 = vmatprep.subr.bf16.mxu0 %v9157_v33  ;;  %2720 = vmatprep.subr.bf16.mxu1 %v9158_v40 }
 0x32a   :  { %2680 = vmatpush1.bf16.msra.mxu0 %v9159_v1  ;;  %2721 = vmatpush1.bf16.msra.mxu1 %v9160_v43  ;;  %v62_v43 = vld [vmem:[%s9060_s1 + $0xd8] sm:$0xff] }
 0x32b   :  { %2681 = vmatprep.subr.bf16.mxu0 %v9161_v45  ;;  %2722 = vmatprep.subr.bf16.mxu1 %v9162_v21  ;;  %v60_v21 = vld [vmem:[%s9060_s1 + $0xd0] sm:$0xff] }
 0x32e   :  { %2682 = vmatpush1.bf16.msra.mxu0 %v9163_v38  ;;  %2723 = vmatpush1.bf16.msra.mxu1 %v9164_v4 }
 0x32f   :  { %v6543_v5 = vpop.eup %6542  ;;  %2683 = vmatprep.subr.bf16.mxu0 %v9165_v6  ;;  %2724 = vmatprep.subr.bf16.mxu1 %v7730_v42  ;;  %v7890_v42 = vld [vmem:[%s9062_s3 + $0xec] ss:$16 sps:$4 sm:$0xff]  }
 0x330   :  { %v2136_v7 = vmul.f32 %v6543_v5, %v6541_v3 }
 0x332   :  { %2684 = vmatpush1.bf16.msra.mxu0 %v7737_v44  ;;  %2725 = vmatpush1.bf16.msra.mxu1 %v7742_v17  ;;  %v7872_v8 = vsel %vm2144_vm15, %v2136_v7, %v7750_v39  ;;  %v2147_v9 = vsel %vm2144_vm15, %v2136_v7, 0.0  ;;  %v7885_v39 = vld [vmem:[%s9062_s3 + $0xe4] ss:$16 sps:$4 sm:$0xff]   ;;  %v7895_v44 = vld [vmem:[%s9062_s3 + $0xe0] ss:$16 sps:$4 sm:$0xff]  }
 0x333   :  { %5678 = vst [vmem:[%s9065_s6 + $0x28] sm:$0xff] %v2147_v9  ;;  %v2476_v10 = vpack.c.bf16 %v7872_v8, %v7872_v8  ;;  %v7900_v17 = vld [vmem:[%s9062_s3 + $0xe8] ss:$16 sps:$4 sm:$0xff]   ;;  %2990 = vmatprep.subr.bf16.mxu0 %v7885_v39  ;;  %3031 = vmatprep.subr.bf16.mxu1 %v7890_v42  ;;  %v5442_v9 = vld [vmem:[%s9061_s2 + $0x120] sm:$0xff] }
 0x335   :  { %2702 = vmatmul.mubr.bf16.vlgmr.msra.gmra.mxu0 %v2476_v10  ;;  %2743 = vmatmul.mubr.bf16.vlgmr.msra.gmra.mxu1 %v2476_v10 }
 0x336   :  { %3022 = vmatprep.mubr.bf16.mxu0 %v9130_v57  ;;  %3063 = vmatprep.mubr.bf16.mxu1 %v9130_v57 }
 0x337   :  { %2991 = vmatpush1.bf16.msra.mxu0 %v7895_v44  ;;  %3032 = vmatpush1.bf16.msra.mxu1 %v7900_v17 }
 0x338   :  { %2992 = vmatprep.subr.bf16.mxu0 %v7909_v11  ;;  %3033 = vmatprep.subr.bf16.mxu1 %v7914_v12 }
 0x33b   :  { %2993 = vmatpush1.bf16.msra.mxu0 %v7919_v13  ;;  %3034 = vmatpush1.bf16.msra.mxu1 %v7924_v14 }
 0x33c   :  { %2994 = vmatprep.subr.bf16.mxu0 %v7933_v24  ;;  %3035 = vmatprep.subr.bf16.mxu1 %v7948_v15 }
 0x33f   :  { %2995 = vmatpush1.bf16.msra.mxu0 %v7938_v49  ;;  %3036 = vmatpush1.bf16.msra.mxu1 %v7943_v37 }
 0x340   :  { %2996 = vmatprep.subr.bf16.mxu0 %v7957_v19  ;;  %3037 = vmatprep.subr.bf16.mxu1 %v7962_v34 }
 0x343   :  { %2997 = vmatpush1.bf16.msra.mxu0 %v7967_v26  ;;  %3038 = vmatpush1.bf16.msra.mxu1 %v7972_v2 }
 0x344   :  { %2998 = vmatprep.subr.bf16.mxu0 %v7981_v56  ;;  %3039 = vmatprep.subr.bf16.mxu1 %v7986_v58 }
 0x347   :  { %2999 = vmatpush1.bf16.msra.mxu0 %v7991_v61  ;;  %3040 = vmatpush1.bf16.msra.mxu1 %v7996_v27 }
 0x348   :  { %3000 = vmatprep.subr.bf16.mxu0 %v8005_v29  ;;  %3041 = vmatprep.subr.bf16.mxu1 %v8010_v30 }
 0x34b   :  { %3001 = vmatpush1.bf16.msra.mxu0 %v8015_v31  ;;  %3042 = vmatpush1.bf16.msra.mxu1 %v8020_v32 }
 0x34c   :  { %3002 = vmatprep.subr.bf16.mxu0 %v8029_v35  ;;  %3043 = vmatprep.subr.bf16.mxu1 %v8034_v36 }
 0x34f   :  { %3003 = vmatpush1.bf16.msra.mxu0 %v8039_v47  ;;  %3044 = vmatpush1.bf16.msra.mxu1 %v8044_v48 }
 0x350   :  { %3004 = vmatprep.subr.bf16.mxu0 %v8053_v51  ;;  %3045 = vmatprep.subr.bf16.mxu1 %v8058_v52 }
 0x353   :  { %3005 = vmatpush1.bf16.msra.mxu0 %v8063_v53  ;;  %3046 = vmatpush1.bf16.msra.mxu1 %v8068_v55 }
 0x354   :  { %3311 = vmatprep.subr.bf16.mxu0 %v8077_v60  ;;  %3352 = vmatprep.subr.bf16.mxu1 %v8082_v41 }
 0x3d5   :  { %v2382_v20 = vpop.f32.mrf.mxu0  ;;  %v2423_v46 = vpop.f32.mrf.mxu1 }
 0x3d6   :  { %v2430_v50 = vadd.f32 %v2382_v20, %v56_v62  ;;  %v2432_v4 = vadd.f32 %v2423_v46, %v60_v21  ;;  %v5443_v20 = vld [vmem:[%s9061_s2 + $0x128] sm:$0xff] }
 0x3d7   :  { %v2384_v54 = vpop.f32.mrf.mxu0  ;;  %v2425_v22 = vpop.f32.mrf.mxu1 }
 0x3d8   :  { %v5711_v23 = vmul.f32 -1.442695, %v2430_v50  ;;  %v2431_v25 = vadd.f32 %v2384_v54, %v58_v0  ;;  %v2433_v45 = vadd.f32 %v2425_v22, %v62_v43 }
 0x3d9   :  { %v2386_v16 = vpop.f32.mrf.mxu0  ;;  %v2427_v63 = vpop.f32.mrf.mxu1 }
 0x3da   :  { %6544 = vpow2.f32 %v5711_v23  ;;  %v5712_v33 = vmul.f32 -1.442695, %v2431_v25  ;;  %v5713_v3 = vmul.f32 -1.442695, %v2433_v45 }
 0x3db   :  { %v2387_v40 = vpop.f32.mrf.mxu0  ;;  %v2428_v1 = vpop.f32.mrf.mxu1 }
 0x3dc   :  { %6546 = vpow2.f32 %v5712_v33 }
 0x3dd   :  { %6548 = vpow2.f32 %v5713_v3 }
 0x3e7   :  { %v6545_v38 = vpop.eup %6544 }
 0x3e8   :  { %v2437_v5 = vadd.f32 1.0, %v6545_v38 }
 0x3e9   :  { %v6547_v6 = vpop.eup %6546 }
 0x3ea   :  { %6550 = vrcp.f32 %v2437_v5  ;;  %v2443_v7 = vadd.f32 1.0, %v6547_v6  ;;  %v6549_v0 = vpop.eup %6548  ;;  %v5445_v6 = vld [vmem:[%s9061_s2 + $0x138] sm:$0xff] }
 0x3eb   :  { %6552 = vtanh.f32 %v2432_v4  ;;  %v2450_v33 = vadd.f32 1.0, %v6549_v0  ;;  %v2464_v4 = vpop.permute.xlu0 %2463 }
 0x3ec   :  { %6554 = vrcp.f32 %v2443_v7  ;;  %vm2465_vm0 = vcmp.eq.s32.totalorder %v2464_v4, 1  ;;  %v8176_v4 = vld [vmem:[%s9063_s4 + $0xa0] ss:$16 sps:$4 sm:$0xff]  }
 0x3f5   :  { %v2703_v10 = vpop.f32.mrf.mxu0  ;;  %v2744_v62 = vpop.f32.mrf.mxu1 }
 0x3f6   :  { %v2751_v50 = vadd.f32 %v5442_v9, %v2703_v10  ;;  %v5444_v10 = vld [vmem:[%s9061_s2 + $0x130] sm:$0xff] }
 0x3f7   :  { %v6551_v46 = vpop.eup %6550  ;;  %v2705_v54 = vpop.f32.mrf.mxu0 }
 0x3f8   :  { %v2746_v22 = vpop.f32.mrf.mxu1  ;;  %v6553_v23 = vpop.eup %6552  ;;  %v5748_v25 = vmul.f32 -1.442695, %v2751_v50  ;;  %v2752_v16 = vadd.f32 %v5443_v20, %v2705_v54  ;;  %v2753_v50 = vadd.f32 %v5444_v10, %v2744_v62  ;;  %v8123_v62 = vld [vmem:[%s9063_s4 + $0xe0] ss:$16 sps:$4 sm:$0xff]   ;;  %v8193_v10 = vld [vmem:[%s9063_s4 + $0x8c] ss:$16 sps:$4 sm:$0xff]  }
 0x3f9   :  { %v6555_v63 = vpop.eup %6554  ;;  %v2707_v40 = vpop.f32.mrf.mxu0  ;;  %v2454_v43 = vmul.f32 %v6553_v23, %v6551_v46  ;;  %v2754_v9 = vadd.f32 %v5445_v6, %v2746_v22 }
 0x3fa   :  { %v2748_v1 = vpop.f32.mrf.mxu1  ;;  %v2453_v45 = vmul.f32 %v6555_v63, %v7818_v28  ;;  %6556 = vpow2.f32 %v5748_v25  ;;  %v5749_v21 = vmul.f32 -1.442695, %v2752_v16  ;;  %v8138_v40 = vld [vmem:[%s9063_s4 + $0xc4] ss:$16 sps:$4 sm:$0xff]  }
 0x3fb   :  { %v2708_v3 = vpop.f32.mrf.mxu0  ;;  %v5750_v20 = vmul.f32 -1.442695, %v2754_v9  ;;  %v8143_v1 = vld [vmem:[%s9063_s4 + $0xcc] ss:$16 sps:$4 sm:$0xff]   ;;  %v8188_v9 = vld [vmem:[%s9063_s4 + $0x84] ss:$16 sps:$4 sm:$0xff]  }
 0x3fc   :  { %v2749_v38 = vpop.f32.mrf.mxu1  ;;  %v2455_v5 = vadd.f32 %v2454_v43, %v2453_v45  ;;  %6558 = vpow2.f32 %v5749_v21  ;;  %v8150_v43 = vld [vmem:[%s9063_s4 + $0xc0] ss:$16 sps:$4 sm:$0xff]   ;;  %v8155_v45 = vld [vmem:[%s9063_s4 + $0xc8] ss:$16 sps:$4 sm:$0xff]   ;;  %v8162_v21 = vld [vmem:[%s9063_s4 + $0xa4] ss:$16 sps:$4 sm:$0xff]  }
 0x3fd   :  { %6560 = vrcp.f32 %v2450_v33  ;;  %v8128_v33 = vld [vmem:[%s9063_s4 + $0xe8] ss:$16 sps:$4 sm:$0xff]   ;;  %v8167_v3 = vld [vmem:[%s9063_s4 + $0xac] ss:$16 sps:$4 sm:$0xff]  }
 0x3fe   :  { %6562 = vtanh.f32 %v2455_v5  ;;  %v8110_v7 = vsel %vm2465_vm0, %v2455_v5, %v7818_v28  ;;  %v8181_v5 = vld [vmem:[%s9063_s4 + $0xa8] ss:$16 sps:$4 sm:$0xff]  }
 0x3ff   :  { %6564 = vpow2.f32 %v5750_v20 }
 0x407   :  { %v6557_v0 = vpop.eup %6556 }
 0x408   :  { %v2758_v46 = vadd.f32 1.0, %v6557_v0 }
 0x409   :  { %v6559_v54 = vpop.eup %6558 }
 0x40a   :  { %v6561_v23 = vpop.eup %6560  ;;  %6566 = vrcp.f32 %v2758_v46  ;;  %v2764_v25 = vadd.f32 1.0, %v6559_v54 }
 0x40b   :  { %v6563_v16 = vpop.eup %6562  ;;  %6568 = vtanh.f32 %v2753_v50 }
 0x40c   :  { %6570 = vrcp.f32 %v2764_v25  ;;  %v2457_v63 = vmul.f32 %v6563_v16, %v6561_v23  ;;  %v6565_v38 = vpop.eup %6564  ;;  %v8201_v23 = vld [vmem:[%s9063_s4 + $0x80] ss:$16 sps:$4 sm:$0xff]   ;;  %v8206_v25 = vld [vmem:[%s9063_s4 + $0x88] ss:$16 sps:$4 sm:$0xff]   ;;  %v8213_v16 = vld [vmem:[%s9063_s4 + $0x64] ss:$16 sps:$4 sm:$0xff]  }
 0x40d   :  { %v2771_v50 = vadd.f32 1.0, %v6565_v38  ;;  %v8225_v38 = vld [vmem:[%s9063_s4 + $0x60] ss:$16 sps:$4 sm:$0xff]  }
 0x40e   :  { %v8117_v28 = vsel %vm2465_vm0, %v2457_v63, %v7825_v18  ;;  %v2468_v22 = vsel %vm2465_vm0, %v2457_v63, 0.0  ;;  %v8218_v63 = vld [vmem:[%s9063_s4 + $0x6c] ss:$16 sps:$4 sm:$0xff]   ;;  %9167 = vst [vmem:[#allocation11_spill] sm:$0xff] %v8225_v38 }
 0x40f   :  { %5715 = vst [vmem:[%s9064_s5 + $0x18] sm:$0xff] %v2468_v22  ;;  %v2797_v18 = vpack.c.bf16 %v8117_v28, %v8117_v28  ;;  %9166 = vst [vmem:[#allocation8_spill] sm:$0xff] %v8218_v63  ;;  %v2785_v22 = vpop.permute.xlu1 %2784  ;;  %6572 = vrcp.f32 %v2771_v50  ;;  %v8246_v50 = vld [vmem:[%s9063_s4 + $0x4c] ss:$16 sps:$4 sm:$0xff]  }
 0x410   :  { %vm2786_vm1 = vcmp.eq.s32.totalorder %v2785_v22, 1  ;;  %9170 = vst [vmem:[#allocation14_spill] sm:$0xff] %v8246_v50 }
 0x411   :  { %3023 = vmatmul.mubr.bf16.vlgmr.msra.gmra.mxu0 %v2797_v18  ;;  %3064 = vmatmul.mubr.bf16.vlgmr.msra.gmra.mxu1 %v2797_v18 }
 0x412   :  { %3312 = vmatpush1.bf16.msra.mxu0 %v8123_v62  ;;  %3353 = vmatpush1.bf16.msra.mxu1 %v8128_v33 }
 0x413   :  { %3313 = vmatprep.subr.bf16.mxu0 %v8138_v40  ;;  %3354 = vmatprep.subr.bf16.mxu1 %v8143_v1 }
 0x414   :  { %3343 = vmatprep.mubr.bf16.mxu0 %v9130_v57  ;;  %3384 = vmatprep.mubr.bf16.mxu1 %v9130_v57 }
 0x416   :  { %3314 = vmatpush1.bf16.msra.mxu0 %v8150_v43  ;;  %3355 = vmatpush1.bf16.msra.mxu1 %v8155_v45 }
 0x417   :  { %v6567_v6 = vpop.eup %6566  ;;  %3315 = vmatprep.subr.bf16.mxu0 %v8162_v21  ;;  %3356 = vmatprep.subr.bf16.mxu1 %v8167_v3 }
 0x418   :  { %v6569_v20 = vpop.eup %6568 }
 0x419   :  { %v6571_v0 = vpop.eup %6570  ;;  %v2775_v46 = vmul.f32 %v6569_v20, %v6567_v6  ;;  %v8230_v6 = vld [vmem:[%s9063_s4 + $0x68] ss:$16 sps:$4 sm:$0xff]  }
 0x41a   :  { %v2774_v54 = vmul.f32 %v6571_v0, %v7852_v59  ;;  %3316 = vmatpush1.bf16.msra.mxu0 %v8176_v4  ;;  %3357 = vmatpush1.bf16.msra.mxu1 %v8181_v5  ;;  %9168 = vst [vmem:[#allocation9_spill] sm:$0xff] %v8230_v6  ;;  %v8241_v0 = vld [vmem:[%s9063_s4 + $0x44] ss:$16 sps:$4 sm:$0xff]  }
 0x41b   :  { %3317 = vmatprep.subr.bf16.mxu0 %v8188_v9  ;;  %3358 = vmatprep.subr.bf16.mxu1 %v8193_v10  ;;  %9169 = vst [vmem:[#allocation10_spill] sm:$0xff] %v8241_v0 }
 0x41c   :  { %v2776_v18 = vadd.f32 %v2775_v46, %v2774_v54  ;;  %v8258_v46 = vld [vmem:[%s9063_s4 + $0x48] ss:$16 sps:$4 sm:$0xff]   ;;  %v8265_v54 = vld [vmem:[%s9063_s4 + $0x24] ss:$16 sps:$4 sm:$0xff]  }
 0x41d   :  { %9172 = vst [vmem:[#allocation13_spill] sm:$0xff] %v8258_v46  ;;  %9173 = vst [vmem:[#allocation17_spill] sm:$0xff] %v8265_v54 }
 0x41e   :  { %6574 = vtanh.f32 %v2776_v18  ;;  %3318 = vmatpush1.bf16.msra.mxu0 %v8201_v23  ;;  %3359 = vmatpush1.bf16.msra.mxu1 %v8206_v25  ;;  %v8234_v20 = vsel %vm2786_vm1, %v2776_v18, %v7852_v59  ;;  %v8253_v59 = vld [vmem:[%s9063_s4 + $0x40] ss:$16 sps:$4 sm:$0xff]   ;;  %v8270_v18 = vld [vmem:[%s9063_s4 + $0x2c] ss:$16 sps:$4 sm:$0xff]  }
 0x41f   :  { %3319 = vmatprep.subr.bf16.mxu0 %v8213_v16  ;;  %3360 = vmatprep.subr.bf16.mxu1 %v8218_v63  ;;  %9171 = vst [vmem:[#allocation12_spill] sm:$0xff] %v8253_v59  ;;  %9174 = vst [vmem:[#allocation15_spill] sm:$0xff] %v8270_v18 }
 0x422   :  { %3320 = vmatpush1.bf16.msra.mxu0 %v8225_v38  ;;  %3361 = vmatpush1.bf16.msra.mxu1 %v8230_v6  ;;  %v6573_v6 = vpop.eup %6572 }
 0x423   :  { %3321 = vmatprep.subr.bf16.mxu0 %v8241_v0  ;;  %3362 = vmatprep.subr.bf16.mxu1 %v8246_v50  ;;  %v8277_v0 = vld [vmem:[%s9063_s4 + $0x20] ss:$16 sps:$4 sm:$0xff]   ;;  %v8282_v50 = vld [vmem:[%s9063_s4 + $0x28] ss:$16 sps:$4 sm:$0xff]  }
 0x424   :  { %9175 = vst [vmem:[#allocation16_spill] sm:$0xff] %v8277_v0  ;;  %9176 = vst [vmem:[#allocation18_spill] sm:$0xff] %v8282_v50 }
 0x426   :  { %3322 = vmatpush1.bf16.msra.mxu0 %v8253_v59  ;;  %3363 = vmatpush1.bf16.msra.mxu1 %v8258_v46  ;;  %v8289_v59 = vld [vmem:[%s9063_s4 + $0x4] ss:$16 sps:$4 sm:$0xff]   ;;  %v8294_v46 = vld [vmem:[%s9063_s4 + $0xc] ss:$16 sps:$4 sm:$0xff]  }
 0x427   :  { %3323 = vmatprep.subr.bf16.mxu0 %v8265_v54  ;;  %3364 = vmatprep.subr.bf16.mxu1 %v8270_v18  ;;  %9177 = vst [vmem:[#allocation19_spill] sm:$0xff] %v8289_v59  ;;  %v8301_v54 = vld [vmem:[%s9063_s4] ss:$16 sps:$4 sm:$0xff]   ;;  %v8306_v18 = vld [vmem:[%s9063_s4 + $0x8] ss:$16 sps:$4 sm:$0xff]  }
 0x42a   :  { %3324 = vmatpush1.bf16.msra.mxu0 %v8277_v0  ;;  %3365 = vmatpush1.bf16.msra.mxu1 %v8282_v50 }
 0x42b   :  { %v6575_v38 = vpop.eup %6574  ;;  %3325 = vmatprep.subr.bf16.mxu0 %v8289_v59  ;;  %3366 = vmatprep.subr.bf16.mxu1 %v8294_v46 }
 0x42c   :  { %v2778_v63 = vmul.f32 %v6575_v38, %v6573_v6 }
 0x42e   :  { %3326 = vmatpush1.bf16.msra.mxu0 %v8301_v54  ;;  %3367 = vmatpush1.bf16.msra.mxu1 %v8306_v18  ;;  %v8314_v50 = vsel %vm2786_vm1, %v2778_v63, %v7872_v8  ;;  %v2789_v0 = vsel %vm2786_vm1, %v2778_v63, 0.0  ;;  %v64_v8 = vld [vmem:[%s9060_s1 + $0x100] sm:$0xff] }
 0x42f   :  { %5752 = vst [vmem:[%s9065_s6 + $0x20] sm:$0xff] %v2789_v0  ;;  %v3118_v59 = vpack.c.bf16 %v8314_v50, %v8314_v50  ;;  %3632 = vmatprep.subr.bf16.mxu0 %v7885_v39  ;;  %3673 = vmatprep.subr.bf16.mxu1 %v7890_v42 }
 0x431   :  { %3344 = vmatmul.mubr.bf16.vlgmr.msra.gmra.mxu0 %v3118_v59  ;;  %3385 = vmatmul.mubr.bf16.vlgmr.msra.gmra.mxu1 %v3118_v59 }
 0x432   :  { %3633 = vmatpush1.bf16.msra.mxu0 %v7895_v44  ;;  %3674 = vmatpush1.bf16.msra.mxu1 %v7900_v17  ;;  %v66_v44 = vld [vmem:[%s9060_s1 + $0x108] sm:$0xff] }
 0x433   :  { %3634 = vmatprep.subr.bf16.mxu0 %v7909_v11  ;;  %3675 = vmatprep.subr.bf16.mxu1 %v7914_v12 }
 0x434   :  { %3664 = vmatprep.mubr.bf16.mxu0 %v9130_v57  ;;  %3705 = vmatprep.mubr.bf16.mxu1 %v9130_v57 }
 0x436   :  { %3635 = vmatpush1.bf16.msra.mxu0 %v7919_v13  ;;  %3676 = vmatpush1.bf16.msra.mxu1 %v7924_v14 }
 0x437   :  { %3636 = vmatprep.subr.bf16.mxu0 %v7933_v24  ;;  %3677 = vmatprep.subr.bf16.mxu1 %v7948_v15 }
 0x43a   :  { %3637 = vmatpush1.bf16.msra.mxu0 %v7938_v49  ;;  %3678 = vmatpush1.bf16.msra.mxu1 %v7943_v37 }
 0x43b   :  { %3638 = vmatprep.subr.bf16.mxu0 %v7957_v19  ;;  %3679 = vmatprep.subr.bf16.mxu1 %v7962_v34  ;;  %v70_v34 = vld [vmem:[%s9060_s1 + $0x118] sm:$0xff] }
 0x43e   :  { %3639 = vmatpush1.bf16.msra.mxu0 %v7967_v26  ;;  %3680 = vmatpush1.bf16.msra.mxu1 %v7972_v2  ;;  %v68_v2 = vld [vmem:[%s9060_s1 + $0x110] sm:$0xff] }
 0x43f   :  { %3640 = vmatprep.subr.bf16.mxu0 %v7981_v56  ;;  %3681 = vmatprep.subr.bf16.mxu1 %v7986_v58 }
 0x442   :  { %3641 = vmatpush1.bf16.msra.mxu0 %v7991_v61  ;;  %3682 = vmatpush1.bf16.msra.mxu1 %v7996_v27 }
 0x443   :  { %3642 = vmatprep.subr.bf16.mxu0 %v8005_v29  ;;  %3683 = vmatprep.subr.bf16.mxu1 %v8010_v30 }
 0x446   :  { %3643 = vmatpush1.bf16.msra.mxu0 %v8015_v31  ;;  %3684 = vmatpush1.bf16.msra.mxu1 %v8020_v32  ;;  %v5438_v31 = vld [vmem:[%s9061_s2 + $0xe0] sm:$0xff] }
 0x447   :  { %3644 = vmatprep.subr.bf16.mxu0 %v8029_v35  ;;  %3685 = vmatprep.subr.bf16.mxu1 %v8034_v36  ;;  %v5439_v36 = vld [vmem:[%s9061_s2 + $0xe8] sm:$0xff] }
 0x44a   :  { %3645 = vmatpush1.bf16.msra.mxu0 %v8039_v47  ;;  %3686 = vmatpush1.bf16.msra.mxu1 %v8044_v48 }
 0x44b   :  { %3646 = vmatprep.subr.bf16.mxu0 %v8053_v51  ;;  %3687 = vmatprep.subr.bf16.mxu1 %v8058_v52 }
 0x44e   :  { %3647 = vmatpush1.bf16.msra.mxu0 %v8063_v53  ;;  %3688 = vmatpush1.bf16.msra.mxu1 %v8068_v55 }
 0x44f   :  { %3953 = vmatprep.subr.bf16.mxu0 %v8077_v60  ;;  %3994 = vmatprep.subr.bf16.mxu1 %v8082_v41 }
 0x4d1   :  { %v3024_v39 = vpop.f32.mrf.mxu0  ;;  %v3065_v42 = vpop.f32.mrf.mxu1 }
 0x4d2   :  { %v3072_v17 = vadd.f32 %v3024_v39, %v64_v8  ;;  %v3074_v61 = vadd.f32 %v3065_v42, %v68_v2 }
 0x4d3   :  { %v3026_v11 = vpop.f32.mrf.mxu0  ;;  %v3067_v12 = vpop.f32.mrf.mxu1 }
 0x4d4   :  { %v5785_v13 = vmul.f32 -1.442695, %v3072_v17  ;;  %v3073_v14 = vadd.f32 %v3026_v11, %v66_v44  ;;  %v3075_v26 = vadd.f32 %v3067_v12, %v70_v34  ;;  %v3106_v44 = vpop.permute.xlu0 %3105  ;;  %v5441_v11 = vld [vmem:[%s9061_s2 + $0xf8] sm:$0xff] }
 0x4d5   :  { %v3028_v24 = vpop.f32.mrf.mxu0  ;;  %v3069_v49 = vpop.f32.mrf.mxu1  ;;  %vm3107_vm2 = vcmp.eq.s32.totalorder %v3106_v44, 1  ;;  %v8550_v44 = vld [vmem:[%s9062_s3 + $0x6c] ss:$16 sps:$4 sm:$0xff]  }
 0x4d6   :  { %6576 = vpow2.f32 %v5785_v13  ;;  %v5786_v37 = vmul.f32 -1.442695, %v3073_v14  ;;  %v5787_v56 = vmul.f32 -1.442695, %v3075_v26  ;;  %v5440_v14 = vld [vmem:[%s9061_s2 + $0xf0] sm:$0xff] }
 0x4d7   :  { %v3029_v15 = vpop.f32.mrf.mxu0  ;;  %v3070_v19 = vpop.f32.mrf.mxu1 }
 0x4d8   :  { %6578 = vpow2.f32 %v5786_v37 }
 0x4d9   :  { %6580 = vpow2.f32 %v5787_v56 }
 0x4e3   :  { %v6577_v58 = vpop.eup %6576 }
 0x4e4   :  { %v3079_v27 = vadd.f32 1.0, %v6577_v58 }
 0x4e5   :  { %v6579_v29 = vpop.eup %6578 }
 0x4e6   :  { %6582 = vrcp.f32 %v3079_v27  ;;  %v3085_v30 = vadd.f32 1.0, %v6579_v29  ;;  %v6581_v47 = vpop.eup %6580 }
 0x4e7   :  { %6584 = vtanh.f32 %v3074_v61  ;;  %v3092_v22 = vadd.f32 1.0, %v6581_v47 }
 0x4e8   :  { %6586 = vrcp.f32 %v3085_v30  ;;  %v9183_v30 = vld [vmem:[#allocation12_spill] sm:$0xff] }
 0x4f1   :  { %v3345_v32 = vpop.f32.mrf.mxu0  ;;  %v3386_v35 = vpop.f32.mrf.mxu1 }
 0x4f2   :  { %v3393_v48 = vadd.f32 %v5438_v31, %v3345_v32  ;;  %v3395_v37 = vadd.f32 %v5440_v14, %v3386_v35  ;;  %v9188_v32 = vld [vmem:[#allocation18_spill] sm:$0xff]  ;;  %v8574_v14 = vld [vmem:[%s9062_s3 + $0x4c] ss:$16 sps:$4 sm:$0xff]  }
 0x4f3   :  { %v6583_v51 = vpop.eup %6582  ;;  %v3347_v52 = vpop.f32.mrf.mxu0 }
 0x4f4   :  { %v3388_v53 = vpop.f32.mrf.mxu1  ;;  %v6585_v55 = vpop.eup %6584  ;;  %v5822_v60 = vmul.f32 -1.442695, %v3393_v48  ;;  %v3394_v41 = vadd.f32 %v5439_v36, %v3347_v52  ;;  %v9189_v36 = vld [vmem:[#allocation19_spill] sm:$0xff] }
 0x4f5   :  { %v6587_v63 = vpop.eup %6586  ;;  %v3349_v38 = vpop.f32.mrf.mxu0  ;;  %v3096_v0 = vmul.f32 %v6585_v55, %v6583_v51  ;;  %v3396_v13 = vadd.f32 %v5441_v11, %v3388_v53  ;;  %v8473_v53 = vld [vmem:[%s9062_s3 + $0xc4] ss:$16 sps:$4 sm:$0xff]   ;;  %v8478_v55 = vld [vmem:[%s9062_s3 + $0xcc] ss:$16 sps:$4 sm:$0xff]   ;;  %v8560_v11 = vld [vmem:[%s9062_s3 + $0x68] ss:$16 sps:$4 sm:$0xff]  }
 0x4f6   :  { %v3390_v6 = vpop.f32.mrf.mxu1  ;;  %v3095_v59 = vmul.f32 %v6587_v63, %v8110_v7  ;;  %6588 = vpow2.f32 %v5822_v60  ;;  %v5823_v8 = vmul.f32 -1.442695, %v3394_v41  ;;  %v8483_v60 = vld [vmem:[%s9062_s3 + $0xc0] ss:$16 sps:$4 sm:$0xff]   ;;  %v8488_v41 = vld [vmem:[%s9062_s3 + $0xc8] ss:$16 sps:$4 sm:$0xff]  }
 0x4f7   :  { %v3350_v39 = vpop.f32.mrf.mxu0  ;;  %v5824_v24 = vmul.f32 -1.442695, %v3396_v13  ;;  %v8497_v63 = vld [vmem:[%s9062_s3 + $0xa4] ss:$16 sps:$4 sm:$0xff]   ;;  %v8507_v38 = vld [vmem:[%s9062_s3 + $0xa8] ss:$16 sps:$4 sm:$0xff]  }
 0x4f8   :  { %v3391_v42 = vpop.f32.mrf.mxu1  ;;  %v3097_v17 = vadd.f32 %v3096_v0, %v3095_v59  ;;  %6590 = vpow2.f32 %v5823_v8  ;;  %v8512_v6 = vld [vmem:[%s9062_s3 + $0xac] ss:$16 sps:$4 sm:$0xff]   ;;  %v8521_v0 = vld [vmem:[%s9062_s3 + $0x84] ss:$16 sps:$4 sm:$0xff]   ;;  %v8531_v8 = vld [vmem:[%s9062_s3 + $0x80] ss:$16 sps:$4 sm:$0xff]  }
 0x4f9   :  { %6592 = vrcp.f32 %v3092_v22  ;;  %v8502_v22 = vld [vmem:[%s9062_s3 + $0xa0] ss:$16 sps:$4 sm:$0xff]   ;;  %v8526_v59 = vld [vmem:[%s9062_s3 + $0x8c] ss:$16 sps:$4 sm:$0xff]   ;;  %v8536_v39 = vld [vmem:[%s9062_s3 + $0x88] ss:$16 sps:$4 sm:$0xff]  }
 0x4fa   :  { %6594 = vtanh.f32 %v3097_v17  ;;  %v8382_v12 = vsel %vm3107_vm2, %v3097_v17, %v8110_v7  ;;  %v8545_v42 = vld [vmem:[%s9062_s3 + $0x64] ss:$16 sps:$4 sm:$0xff]   ;;  %v8555_v17 = vld [vmem:[%s9062_s3 + $0x60] ss:$16 sps:$4 sm:$0xff]  }
 0x4fb   :  { %6596 = vpow2.f32 %v5824_v24  ;;  %v8569_v13 = vld [vmem:[%s9062_s3 + $0x44] ss:$16 sps:$4 sm:$0xff]   ;;  %v8579_v24 = vld [vmem:[%s9062_s3 + $0x40] ss:$16 sps:$4 sm:$0xff]  }
 0x503   :  { %v6589_v49 = vpop.eup %6588 }
 0x504   :  { %v3400_v15 = vadd.f32 1.0, %v6589_v49  ;;  %v8584_v49 = vld [vmem:[%s9062_s3 + $0x48] ss:$16 sps:$4 sm:$0xff]  }
 0x505   :  { %v6591_v19 = vpop.eup %6590 }
 0x506   :  { %v6593_v34 = vpop.eup %6592  ;;  %6598 = vrcp.f32 %v3400_v15  ;;  %v3406_v26 = vadd.f32 1.0, %v6591_v19  ;;  %v8598_v15 = vld [vmem:[%s9062_s3 + $0x2c] ss:$16 sps:$4 sm:$0xff]   ;;  %v8603_v19 = vld [vmem:[%s9062_s3 + $0x20] ss:$16 sps:$4 sm:$0xff]  }
 0x507   :  { %v6595_v2 = vpop.eup %6594  ;;  %6600 = vtanh.f32 %v3395_v37  ;;  %v8593_v37 = vld [vmem:[%s9062_s3 + $0x24] ss:$16 sps:$4 sm:$0xff]  }
 0x508   :  { %6602 = vrcp.f32 %v3406_v26  ;;  %v3099_v56 = vmul.f32 %v6595_v2, %v6593_v34  ;;  %v8608_v34 = vld [vmem:[%s9062_s3 + $0x28] ss:$16 sps:$4 sm:$0xff]   ;;  %v8617_v26 = vld [vmem:[%s9062_s3 + $0x4] ss:$16 sps:$4 sm:$0xff]   ;;  %v8622_v2 = vld [vmem:[%s9062_s3 + $0xc] ss:$16 sps:$4 sm:$0xff]  }
 0x50a   :  { %v8389_v7 = vsel %vm3107_vm2, %v3099_v56, %v8117_v28  ;;  %v3110_v58 = vsel %vm3107_vm2, %v3099_v56, 0.0  ;;  %v6597_v28 = vpop.eup %6596  ;;  %v8627_v56 = vld [vmem:[%s9062_s3] ss:$16 sps:$4 sm:$0xff]  }
 0x50b   :  { %5789 = vst [vmem:[%s9064_s5 + $0x20] sm:$0xff] %v3110_v58  ;;  %v3439_v61 = vpack.c.bf16 %v8389_v7, %v8389_v7  ;;  %v3413_v29 = vadd.f32 1.0, %v6597_v28  ;;  %v8632_v58 = vld [vmem:[%s9062_s3 + $0x8] ss:$16 sps:$4 sm:$0xff]   ;;  %v8646_v28 = vld [vmem:[%s9063_s4 + $0xec] ss:$16 sps:$4 sm:$0xff]  }
 0x50d   :  { %3665 = vmatmul.mubr.bf16.vlgmr.msra.gmra.mxu0 %v3439_v61  ;;  %3706 = vmatmul.mubr.bf16.vlgmr.msra.gmra.mxu1 %v3439_v61  ;;  %6604 = vrcp.f32 %v3413_v29  ;;  %v8641_v61 = vld [vmem:[%s9063_s4 + $0xe4] ss:$16 sps:$4 sm:$0xff]   ;;  %v74_v29 = vld [vmem:[%s9060_s1 + $0x148] sm:$0xff] }
 0x50e   :  { %3954 = vmatpush1.bf16.msra.mxu0 %v8123_v62  ;;  %3995 = vmatpush1.bf16.msra.mxu1 %v8128_v33 }
 0x50f   :  { %3955 = vmatprep.subr.bf16.mxu0 %v8138_v40  ;;  %3996 = vmatprep.subr.bf16.mxu1 %v8143_v1 }
 0x510   :  { %3985 = vmatprep.mubr.bf16.mxu0 %v9130_v57  ;;  %4026 = vmatprep.mubr.bf16.mxu1 %v9130_v57 }
 0x512   :  { %3956 = vmatpush1.bf16.msra.mxu0 %v8150_v43  ;;  %3997 = vmatpush1.bf16.msra.mxu1 %v8155_v45  ;;  %v3427_v43 = vpop.permute.xlu1 %3426 }
 0x513   :  { %v6599_v27 = vpop.eup %6598  ;;  %3957 = vmatprep.subr.bf16.mxu0 %v8162_v21  ;;  %3998 = vmatprep.subr.bf16.mxu1 %v8167_v3  ;;  %vm3428_vm3 = vcmp.eq.s32.totalorder %v3427_v43, 1  ;;  %v9178_v3 = vld [vmem:[#allocation8_spill] sm:$0xff] }
 0x514   :  { %v6601_v62 = vpop.eup %6600 }
 0x515   :  { %v6603_v33 = vpop.eup %6602  ;;  %v3417_v40 = vmul.f32 %v6601_v62, %v6599_v27  ;;  %v72_v27 = vld [vmem:[%s9060_s1 + $0x140] sm:$0xff] }
 0x516   :  { %v3416_v1 = vmul.f32 %v6603_v33, %v8234_v20  ;;  %3958 = vmatpush1.bf16.msra.mxu0 %v8176_v4  ;;  %3999 = vmatpush1.bf16.msra.mxu1 %v8181_v5  ;;  %v9179_v4 = vld [vmem:[#allocation11_spill] sm:$0xff]  ;;  %v9180_v5 = vld [vmem:[#allocation9_spill] sm:$0xff] }
 0x517   :  { %3959 = vmatprep.subr.bf16.mxu0 %v8188_v9  ;;  %4000 = vmatprep.subr.bf16.mxu1 %v8193_v10  ;;  %v9181_v9 = vld [vmem:[#allocation10_spill] sm:$0xff] }
 0x518   :  { %v3418_v45 = vadd.f32 %v3417_v40, %v3416_v1  ;;  %v9182_v10 = vld [vmem:[#allocation14_spill] sm:$0xff] }
 0x51a   :  { %6606 = vtanh.f32 %v3418_v45  ;;  %3960 = vmatpush1.bf16.msra.mxu0 %v8201_v23  ;;  %4001 = vmatpush1.bf16.msra.mxu1 %v8206_v25  ;;  %v8416_v21 = vsel %vm3428_vm3, %v3418_v45, %v8234_v20  ;;  %v9184_v23 = vld [vmem:[#allocation13_spill] sm:$0xff]  ;;  %v9186_v20 = vld [vmem:[#allocation15_spill] sm:$0xff]  ;;  %v6605_v31 = vpop.eup %6604 }
 0x51b   :  { %3961 = vmatprep.subr.bf16.mxu0 %v8213_v16  ;;  %4002 = vmatprep.subr.bf16.mxu1 %v9178_v3  ;;  %v9185_v25 = vld [vmem:[#allocation17_spill] sm:$0xff]  ;;  %v9187_v16 = vld [vmem:[#allocation16_spill] sm:$0xff] }
 0x51e   :  { %3962 = vmatpush1.bf16.msra.mxu0 %v9179_v4  ;;  %4003 = vmatpush1.bf16.msra.mxu1 %v9180_v5 }
 0x51f   :  { %3963 = vmatprep.subr.bf16.mxu0 %v9181_v9  ;;  %4004 = vmatprep.subr.bf16.mxu1 %v9182_v10 }
 0x522   :  { %3964 = vmatpush1.bf16.msra.mxu0 %v9183_v30  ;;  %4005 = vmatpush1.bf16.msra.mxu1 %v9184_v23  ;;  %v78_v23 = vld [vmem:[%s9060_s1 + $0x158] sm:$0xff] }
 0x523   :  { %3965 = vmatprep.subr.bf16.mxu0 %v9185_v25  ;;  %4006 = vmatprep.subr.bf16.mxu1 %v9186_v20  ;;  %v76_v20 = vld [vmem:[%s9060_s1 + $0x150] sm:$0xff] }
 0x526   :  { %3966 = vmatpush1.bf16.msra.mxu0 %v9187_v16  ;;  %4007 = vmatpush1.bf16.msra.mxu1 %v9188_v32 }
 0x527   :  { %v6607_v35 = vpop.eup %6606  ;;  %3967 = vmatprep.subr.bf16.mxu0 %v9189_v36  ;;  %4008 = vmatprep.subr.bf16.mxu1 %v8294_v46  ;;  %v8454_v46 = vld [vmem:[%s9062_s3 + $0xec] ss:$16 sps:$4 sm:$0xff]  }
 0x528   :  { %v3420_v47 = vmul.f32 %v6607_v35, %v6605_v31 }
 0x52a   :  { %3968 = vmatpush1.bf16.msra.mxu0 %v8301_v54  ;;  %4009 = vmatpush1.bf16.msra.mxu1 %v8306_v18  ;;  %v8436_v48 = vsel %vm3428_vm3, %v3420_v47, %v8314_v50  ;;  %v3431_v51 = vsel %vm3428_vm3, %v3420_v47, 0.0  ;;  %v8449_v50 = vld [vmem:[%s9062_s3 + $0xe4] ss:$16 sps:$4 sm:$0xff]   ;;  %v8459_v54 = vld [vmem:[%s9062_s3 + $0xe0] ss:$16 sps:$4 sm:$0xff]  }
 0x52b   :  { %5826 = vst [vmem:[%s9065_s6 + $0x18] sm:$0xff] %v3431_v51  ;;  %v3760_v52 = vpack.c.bf16 %v8436_v48, %v8436_v48  ;;  %v8464_v18 = vld [vmem:[%s9062_s3 + $0xe8] ss:$16 sps:$4 sm:$0xff]   ;;  %4274 = vmatprep.subr.bf16.mxu0 %v8449_v50  ;;  %4315 = vmatprep.subr.bf16.mxu1 %v8454_v46  ;;  %v5434_v51 = vld [vmem:[%s9061_s2 + $0xa0] sm:$0xff] }
 0x52d   :  { %3986 = vmatmul.mubr.bf16.vlgmr.msra.gmra.mxu0 %v3760_v52  ;;  %4027 = vmatmul.mubr.bf16.vlgmr.msra.gmra.mxu1 %v3760_v52 }
 0x52e   :  { %4306 = vmatprep.mubr.bf16.mxu0 %v9130_v57  ;;  %4347 = vmatprep.mubr.bf16.mxu1 %v9130_v57 }
 0x52f   :  { %4275 = vmatpush1.bf16.msra.mxu0 %v8459_v54  ;;  %4316 = vmatpush1.bf16.msra.mxu1 %v8464_v18 }
 0x530   :  { %4276 = vmatprep.subr.bf16.mxu0 %v8473_v53  ;;  %4317 = vmatprep.subr.bf16.mxu1 %v8478_v55 }
 0x533   :  { %4277 = vmatpush1.bf16.msra.mxu0 %v8483_v60  ;;  %4318 = vmatpush1.bf16.msra.mxu1 %v8488_v41 }
 0x534   :  { %4278 = vmatprep.subr.bf16.mxu0 %v8497_v63  ;;  %4319 = vmatprep.subr.bf16.mxu1 %v8512_v6 }
 0x537   :  { %4279 = vmatpush1.bf16.msra.mxu0 %v8502_v22  ;;  %4320 = vmatpush1.bf16.msra.mxu1 %v8507_v38 }
 0x538   :  { %4280 = vmatprep.subr.bf16.mxu0 %v8521_v0  ;;  %4321 = vmatprep.subr.bf16.mxu1 %v8526_v59 }
 0x53b   :  { %4281 = vmatpush1.bf16.msra.mxu0 %v8531_v8  ;;  %4322 = vmatpush1.bf16.msra.mxu1 %v8536_v39 }
 0x53c   :  { %4282 = vmatprep.subr.bf16.mxu0 %v8545_v42  ;;  %4323 = vmatprep.subr.bf16.mxu1 %v8550_v44 }
 0x53f   :  { %4283 = vmatpush1.bf16.msra.mxu0 %v8555_v17  ;;  %4324 = vmatpush1.bf16.msra.mxu1 %v8560_v11 }
 0x540   :  { %4284 = vmatprep.subr.bf16.mxu0 %v8569_v13  ;;  %4325 = vmatprep.subr.bf16.mxu1 %v8574_v14 }
 0x543   :  { %4285 = vmatpush1.bf16.msra.mxu0 %v8579_v24  ;;  %4326 = vmatpush1.bf16.msra.mxu1 %v8584_v49 }
 0x544   :  { %4286 = vmatprep.subr.bf16.mxu0 %v8593_v37  ;;  %4327 = vmatprep.subr.bf16.mxu1 %v8598_v15 }
 0x547   :  { %4287 = vmatpush1.bf16.msra.mxu0 %v8603_v19  ;;  %4328 = vmatpush1.bf16.msra.mxu1 %v8608_v34 }
 0x548   :  { %4288 = vmatprep.subr.bf16.mxu0 %v8617_v26  ;;  %4329 = vmatprep.subr.bf16.mxu1 %v8622_v2 }
 0x54b   :  { %4289 = vmatpush1.bf16.msra.mxu0 %v8627_v56  ;;  %4330 = vmatpush1.bf16.msra.mxu1 %v8632_v58 }
 0x54c   :  { %4595 = vmatprep.subr.bf16.mxu0 %v8641_v61  ;;  %4636 = vmatprep.subr.bf16.mxu1 %v8646_v28 }
 0x5cd   :  { %v3666_v62 = vpop.f32.mrf.mxu0  ;;  %v3707_v33 = vpop.f32.mrf.mxu1 }
 0x5ce   :  { %v3714_v40 = vadd.f32 %v3666_v62, %v72_v27  ;;  %v3716_v32 = vadd.f32 %v3707_v33, %v76_v20  ;;  %v5435_v62 = vld [vmem:[%s9061_s2 + $0xa8] sm:$0xff] }
 0x5cf   :  { %v3668_v1 = vpop.f32.mrf.mxu0  ;;  %v3709_v43 = vpop.f32.mrf.mxu1 }
 0x5d0   :  { %v5859_v45 = vmul.f32 -1.442695, %v3714_v40  ;;  %v3715_v3 = vadd.f32 %v3668_v1, %v74_v29  ;;  %v3717_v25 = vadd.f32 %v3709_v43, %v78_v23 }
 0x5d1   :  { %v3670_v4 = vpop.f32.mrf.mxu0  ;;  %v3711_v5 = vpop.f32.mrf.mxu1 }
 0x5d2   :  { %6608 = vpow2.f32 %v5859_v45  ;;  %v5860_v9 = vmul.f32 -1.442695, %v3715_v3  ;;  %v5861_v31 = vmul.f32 -1.442695, %v3717_v25 }
 0x5d3   :  { %v3671_v10 = vpop.f32.mrf.mxu0  ;;  %v3712_v30 = vpop.f32.mrf.mxu1 }
 0x5d4   :  { %6610 = vpow2.f32 %v5860_v9 }
 0x5d5   :  { %6612 = vpow2.f32 %v5861_v31 }
 0x5df   :  { %v6609_v16 = vpop.eup %6608 }
 0x5e0   :  { %v3721_v35 = vadd.f32 1.0, %v6609_v16 }
 0x5e1   :  { %v6611_v36 = vpop.eup %6610 }
 0x5e2   :  { %6614 = vrcp.f32 %v3721_v35  ;;  %v3727_v47 = vadd.f32 1.0, %v6611_v36  ;;  %v6613_v29 = vpop.eup %6612  ;;  %v5437_v36 = vld [vmem:[%s9061_s2 + $0xb8] sm:$0xff] }
 0x5e3   :  { %6616 = vtanh.f32 %v3716_v32  ;;  %v3734_v9 = vadd.f32 1.0, %v6613_v29  ;;  %v3748_v32 = vpop.permute.xlu0 %3747 }
 0x5e4   :  { %6618 = vrcp.f32 %v3727_v47  ;;  %vm3749_vm4 = vcmp.eq.s32.totalorder %v3748_v32, 1  ;;  %v8740_v32 = vld [vmem:[%s9063_s4 + $0xa0] ss:$16 sps:$4 sm:$0xff]  }
 0x5ed   :  { %v3987_v52 = vpop.f32.mrf.mxu0  ;;  %v4028_v27 = vpop.f32.mrf.mxu1 }
 0x5ee   :  { %v4035_v40 = vadd.f32 %v5434_v51, %v3987_v52  ;;  %v5436_v52 = vld [vmem:[%s9061_s2 + $0xb0] sm:$0xff] }
 0x5ef   :  { %v6615_v33 = vpop.eup %6614  ;;  %v3989_v1 = vpop.f32.mrf.mxu0 }
 0x5f0   :  { %v4030_v43 = vpop.f32.mrf.mxu1  ;;  %v6617_v45 = vpop.eup %6616  ;;  %v5896_v3 = vmul.f32 -1.442695, %v4035_v40  ;;  %v4036_v4 = vadd.f32 %v5435_v62, %v3989_v1  ;;  %v4037_v40 = vadd.f32 %v5436_v52, %v4028_v27  ;;  %v8687_v27 = vld [vmem:[%s9063_s4 + $0xe0] ss:$16 sps:$4 sm:$0xff]   ;;  %v8757_v52 = vld [vmem:[%s9063_s4 + $0x8c] ss:$16 sps:$4 sm:$0xff]  }
 0x5f1   :  { %v6619_v5 = vpop.eup %6618  ;;  %v3991_v10 = vpop.f32.mrf.mxu0  ;;  %v3738_v23 = vmul.f32 %v6617_v45, %v6615_v33  ;;  %v4038_v51 = vadd.f32 %v5437_v36, %v4030_v43 }
 0x5f2   :  { %v4032_v30 = vpop.f32.mrf.mxu1  ;;  %v3737_v25 = vmul.f32 %v6619_v5, %v8382_v12  ;;  %6620 = vpow2.f32 %v5896_v3  ;;  %v5897_v20 = vmul.f32 -1.442695, %v4036_v4  ;;  %v8702_v10 = vld [vmem:[%s9063_s4 + $0xc4] ss:$16 sps:$4 sm:$0xff]  }
 0x5f3   :  { %v3992_v31 = vpop.f32.mrf.mxu0  ;;  %v5898_v62 = vmul.f32 -1.442695, %v4038_v51  ;;  %v8707_v30 = vld [vmem:[%s9063_s4 + $0xcc] ss:$16 sps:$4 sm:$0xff]   ;;  %v8752_v51 = vld [vmem:[%s9063_s4 + $0x84] ss:$16 sps:$4 sm:$0xff]  }
 0x5f4   :  { %v4033_v16 = vpop.f32.mrf.mxu1  ;;  %v3739_v35 = vadd.f32 %v3738_v23, %v3737_v25  ;;  %6622 = vpow2.f32 %v5897_v20  ;;  %v8714_v23 = vld [vmem:[%s9063_s4 + $0xc0] ss:$16 sps:$4 sm:$0xff]   ;;  %v8719_v25 = vld [vmem:[%s9063_s4 + $0xc8] ss:$16 sps:$4 sm:$0xff]   ;;  %v8726_v20 = vld [vmem:[%s9063_s4 + $0xa4] ss:$16 sps:$4 sm:$0xff]  }
 0x5f5   :  { %6624 = vrcp.f32 %v3734_v9  ;;  %v8692_v9 = vld [vmem:[%s9063_s4 + $0xe8] ss:$16 sps:$4 sm:$0xff]   ;;  %v8731_v31 = vld [vmem:[%s9063_s4 + $0xac] ss:$16 sps:$4 sm:$0xff]  }
 0x5f6   :  { %6626 = vtanh.f32 %v3739_v35  ;;  %v8674_v47 = vsel %vm3749_vm4, %v3739_v35, %v8382_v12  ;;  %v8745_v35 = vld [vmem:[%s9063_s4 + $0xa8] ss:$16 sps:$4 sm:$0xff]  }
 0x5f7   :  { %6628 = vpow2.f32 %v5898_v62 }
 0x5ff   :  { %v6621_v29 = vpop.eup %6620 }
 0x600   :  { %v4042_v33 = vadd.f32 1.0, %v6621_v29 }
 0x601   :  { %v6623_v1 = vpop.eup %6622 }
 0x602   :  { %v6625_v45 = vpop.eup %6624  ;;  %6630 = vrcp.f32 %v4042_v33  ;;  %v4048_v3 = vadd.f32 1.0, %v6623_v1 }
 0x603   :  { %v6627_v4 = vpop.eup %6626  ;;  %6632 = vtanh.f32 %v4037_v40 }
 0x604   :  { %6634 = vrcp.f32 %v4048_v3  ;;  %v3741_v5 = vmul.f32 %v6627_v4, %v6625_v45  ;;  %v6629_v16 = vpop.eup %6628  ;;  %v8765_v45 = vld [vmem:[%s9063_s4 + $0x80] ss:$16 sps:$4 sm:$0xff]   ;;  %v8770_v3 = vld [vmem:[%s9063_s4 + $0x88] ss:$16 sps:$4 sm:$0xff]   ;;  %v8777_v4 = vld [vmem:[%s9063_s4 + $0x64] ss:$16 sps:$4 sm:$0xff]  }
 0x605   :  { %v4055_v40 = vadd.f32 1.0, %v6629_v16  ;;  %v8789_v16 = vld [vmem:[%s9063_s4 + $0x60] ss:$16 sps:$4 sm:$0xff]  }
 0x606   :  { %v8681_v12 = vsel %vm3749_vm4, %v3741_v5, %v8389_v7  ;;  %v3752_v43 = vsel %vm3749_vm4, %v3741_v5, 0.0  ;;  %v8782_v5 = vld [vmem:[%s9063_s4 + $0x6c] ss:$16 sps:$4 sm:$0xff]   ;;  %9191 = vst [vmem:[#allocation11_spill] sm:$0xff] %v8789_v16 }
 0x607   :  { %5863 = vst [vmem:[%s9064_s5 + $0x28] sm:$0xff] %v3752_v43  ;;  %v4081_v7 = vpack.c.bf16 %v8681_v12, %v8681_v12  ;;  %9190 = vst [vmem:[#allocation8_spill] sm:$0xff] %v8782_v5  ;;  %v4069_v43 = vpop.permute.xlu1 %4068  ;;  %6636 = vrcp.f32 %v4055_v40  ;;  %v8810_v40 = vld [vmem:[%s9063_s4 + $0x4c] ss:$16 sps:$4 sm:$0xff]  }
 0x608   :  { %vm4070_vm5 = vcmp.eq.s32.totalorder %v4069_v43, 1  ;;  %9194 = vst [vmem:[#allocation14_spill] sm:$0xff] %v8810_v40 }
 0x609   :  { %4307 = vmatmul.mubr.bf16.vlgmr.msra.gmra.mxu0 %v4081_v7  ;;  %4348 = vmatmul.mubr.bf16.vlgmr.msra.gmra.mxu1 %v4081_v7 }
 0x60a   :  { %4596 = vmatpush1.bf16.msra.mxu0 %v8687_v27  ;;  %4637 = vmatpush1.bf16.msra.mxu1 %v8692_v9 }
 0x60b   :  { %4597 = vmatprep.subr.bf16.mxu0 %v8702_v10  ;;  %4638 = vmatprep.subr.bf16.mxu1 %v8707_v30 }
 0x60c   :  { %4627 = vmatprep.mubr.bf16.mxu0 %v9130_v57  ;;  %4668 = vmatprep.mubr.bf16.mxu1 %v9130_v57 }
 0x60e   :  { %4598 = vmatpush1.bf16.msra.mxu0 %v8714_v23  ;;  %4639 = vmatpush1.bf16.msra.mxu1 %v8719_v25 }
 0x60f   :  { %v6631_v36 = vpop.eup %6630  ;;  %4599 = vmatprep.subr.bf16.mxu0 %v8726_v20  ;;  %4640 = vmatprep.subr.bf16.mxu1 %v8731_v31 }
 0x610   :  { %v6633_v62 = vpop.eup %6632 }
 0x611   :  { %v6635_v29 = vpop.eup %6634  ;;  %v4059_v33 = vmul.f32 %v6633_v62, %v6631_v36  ;;  %v8794_v36 = vld [vmem:[%s9063_s4 + $0x68] ss:$16 sps:$4 sm:$0xff]  }
 0x612   :  { %v4058_v1 = vmul.f32 %v6635_v29, %v8416_v21  ;;  %4600 = vmatpush1.bf16.msra.mxu0 %v8740_v32  ;;  %4641 = vmatpush1.bf16.msra.mxu1 %v8745_v35  ;;  %9192 = vst [vmem:[#allocation9_spill] sm:$0xff] %v8794_v36  ;;  %v8805_v29 = vld [vmem:[%s9063_s4 + $0x44] ss:$16 sps:$4 sm:$0xff]  }
 0x613   :  { %4601 = vmatprep.subr.bf16.mxu0 %v8752_v51  ;;  %4642 = vmatprep.subr.bf16.mxu1 %v8757_v52  ;;  %9193 = vst [vmem:[#allocation10_spill] sm:$0xff] %v8805_v29 }
 0x614   :  { %v4060_v7 = vadd.f32 %v4059_v33, %v4058_v1  ;;  %v8822_v33 = vld [vmem:[%s9063_s4 + $0x48] ss:$16 sps:$4 sm:$0xff]   ;;  %v8829_v1 = vld [vmem:[%s9063_s4 + $0x24] ss:$16 sps:$4 sm:$0xff]  }
 0x615   :  { %9196 = vst [vmem:[#allocation13_spill] sm:$0xff] %v8822_v33  ;;  %9197 = vst [vmem:[#allocation17_spill] sm:$0xff] %v8829_v1 }
 0x616   :  { %6638 = vtanh.f32 %v4060_v7  ;;  %4602 = vmatpush1.bf16.msra.mxu0 %v8765_v45  ;;  %4643 = vmatpush1.bf16.msra.mxu1 %v8770_v3  ;;  %v8798_v62 = vsel %vm4070_vm5, %v4060_v7, %v8416_v21  ;;  %v8817_v21 = vld [vmem:[%s9063_s4 + $0x40] ss:$16 sps:$4 sm:$0xff]   ;;  %v8834_v7 = vld [vmem:[%s9063_s4 + $0x2c] ss:$16 sps:$4 sm:$0xff]  }
 0x617   :  { %4603 = vmatprep.subr.bf16.mxu0 %v8777_v4  ;;  %4644 = vmatprep.subr.bf16.mxu1 %v8782_v5  ;;  %9195 = vst [vmem:[#allocation12_spill] sm:$0xff] %v8817_v21  ;;  %9198 = vst [vmem:[#allocation15_spill] sm:$0xff] %v8834_v7 }
 0x61a   :  { %4604 = vmatpush1.bf16.msra.mxu0 %v8789_v16  ;;  %4645 = vmatpush1.bf16.msra.mxu1 %v8794_v36  ;;  %v6637_v36 = vpop.eup %6636 }
 0x61b   :  { %4605 = vmatprep.subr.bf16.mxu0 %v8805_v29  ;;  %4646 = vmatprep.subr.bf16.mxu1 %v8810_v40  ;;  %v8841_v29 = vld [vmem:[%s9063_s4 + $0x20] ss:$16 sps:$4 sm:$0xff]   ;;  %v8846_v40 = vld [vmem:[%s9063_s4 + $0x28] ss:$16 sps:$4 sm:$0xff]  }
 0x61c   :  { %9199 = vst [vmem:[#allocation16_spill] sm:$0xff] %v8841_v29  ;;  %9200 = vst [vmem:[#allocation18_spill] sm:$0xff] %v8846_v40 }
 0x61e   :  { %4606 = vmatpush1.bf16.msra.mxu0 %v8817_v21  ;;  %4647 = vmatpush1.bf16.msra.mxu1 %v8822_v33  ;;  %v8853_v21 = vld [vmem:[%s9063_s4 + $0x4] ss:$16 sps:$4 sm:$0xff]   ;;  %v8858_v33 = vld [vmem:[%s9063_s4 + $0xc] ss:$16 sps:$4 sm:$0xff]  }
 0x61f   :  { %4607 = vmatprep.subr.bf16.mxu0 %v8829_v1  ;;  %4648 = vmatprep.subr.bf16.mxu1 %v8834_v7  ;;  %9201 = vst [vmem:[#allocation19_spill] sm:$0xff] %v8853_v21  ;;  %v8865_v1 = vld [vmem:[%s9063_s4] ss:$16 sps:$4 sm:$0xff]   ;;  %v8870_v7 = vld [vmem:[%s9063_s4 + $0x8] ss:$16 sps:$4 sm:$0xff]  }
 0x622   :  { %4608 = vmatpush1.bf16.msra.mxu0 %v8841_v29  ;;  %4649 = vmatpush1.bf16.msra.mxu1 %v8846_v40 }
 0x623   :  { %v6639_v16 = vpop.eup %6638  ;;  %4609 = vmatprep.subr.bf16.mxu0 %v8853_v21  ;;  %4650 = vmatprep.subr.bf16.mxu1 %v8858_v33 }
 0x624   :  { %v4062_v5 = vmul.f32 %v6639_v16, %v6637_v36 }
 0x626   :  { %4610 = vmatpush1.bf16.msra.mxu0 %v8865_v1  ;;  %4651 = vmatpush1.bf16.msra.mxu1 %v8870_v7  ;;  %v8878_v40 = vsel %vm4070_vm5, %v4062_v5, %v8436_v48  ;;  %v4073_v29 = vsel %vm4070_vm5, %v4062_v5, 0.0  ;;  %v80_v48 = vld [vmem:[%s9060_s1 + $0x180] sm:$0xff] }
 0x627   :  { %5900 = vst [vmem:[%s9065_s6 + $0x10] sm:$0xff] %v4073_v29  ;;  %v4402_v21 = vpack.c.bf16 %v8878_v40, %v8878_v40  ;;  %4916 = vmatprep.subr.bf16.mxu0 %v8449_v50  ;;  %4957 = vmatprep.subr.bf16.mxu1 %v8454_v46 }
 0x629   :  { %4628 = vmatmul.mubr.bf16.vlgmr.msra.gmra.mxu0 %v4402_v21  ;;  %4669 = vmatmul.mubr.bf16.vlgmr.msra.gmra.mxu1 %v4402_v21 }
 0x62a   :  { %4917 = vmatpush1.bf16.msra.mxu0 %v8459_v54  ;;  %4958 = vmatpush1.bf16.msra.mxu1 %v8464_v18  ;;  %v82_v54 = vld [vmem:[%s9060_s1 + $0x188] sm:$0xff] }
 0x62b   :  { %4918 = vmatprep.subr.bf16.mxu0 %v8473_v53  ;;  %4959 = vmatprep.subr.bf16.mxu1 %v8478_v55 }
 0x62c   :  { %4948 = vmatprep.mubr.bf16.mxu0 %v9130_v57  ;;  %4989 = vmatprep.mubr.bf16.mxu1 %v9130_v57 }
 0x62e   :  { %4919 = vmatpush1.bf16.msra.mxu0 %v8483_v60  ;;  %4960 = vmatpush1.bf16.msra.mxu1 %v8488_v41 }
 0x62f   :  { %4920 = vmatprep.subr.bf16.mxu0 %v8497_v63  ;;  %4961 = vmatprep.subr.bf16.mxu1 %v8512_v6 }
 0x632   :  { %4921 = vmatpush1.bf16.msra.mxu0 %v8502_v22  ;;  %4962 = vmatpush1.bf16.msra.mxu1 %v8507_v38 }
 0x633   :  { %4922 = vmatprep.subr.bf16.mxu0 %v8521_v0  ;;  %4963 = vmatprep.subr.bf16.mxu1 %v8526_v59  ;;  %v86_v59 = vld [vmem:[%s9060_s1 + $0x198] sm:$0xff] }
 0x636   :  { %4923 = vmatpush1.bf16.msra.mxu0 %v8531_v8  ;;  %4964 = vmatpush1.bf16.msra.mxu1 %v8536_v39  ;;  %v84_v39 = vld [vmem:[%s9060_s1 + $0x190] sm:$0xff] }
 0x637   :  { %4924 = vmatprep.subr.bf16.mxu0 %v8545_v42  ;;  %4965 = vmatprep.subr.bf16.mxu1 %v8550_v44 }
 0x63a   :  { %4925 = vmatpush1.bf16.msra.mxu0 %v8555_v17  ;;  %4966 = vmatpush1.bf16.msra.mxu1 %v8560_v11 }
 0x63b   :  { %4926 = vmatprep.subr.bf16.mxu0 %v8569_v13  ;;  %4967 = vmatprep.subr.bf16.mxu1 %v8574_v14 }
 0x63e   :  { %4927 = vmatpush1.bf16.msra.mxu0 %v8579_v24  ;;  %4968 = vmatpush1.bf16.msra.mxu1 %v8584_v49  ;;  %v5430_v24 = vld [vmem:[%s9061_s2 + $0x60] sm:$0xff] }
 0x63f   :  { %4928 = vmatprep.subr.bf16.mxu0 %v8593_v37  ;;  %4969 = vmatprep.subr.bf16.mxu1 %v8598_v15  ;;  %v5431_v15 = vld [vmem:[%s9061_s2 + $0x68] sm:$0xff] }
 0x642   :  { %4929 = vmatpush1.bf16.msra.mxu0 %v8603_v19  ;;  %4970 = vmatpush1.bf16.msra.mxu1 %v8608_v34 }
 0x643   :  { %4930 = vmatprep.subr.bf16.mxu0 %v8617_v26  ;;  %4971 = vmatprep.subr.bf16.mxu1 %v8622_v2 }
 0x646   :  { %4931 = vmatpush1.bf16.msra.mxu0 %v8627_v56  ;;  %4972 = vmatpush1.bf16.msra.mxu1 %v8632_v58 }
 0x647   :  { %5236 = vmatprep.subr.bf16.mxu0 %v8641_v61  ;;  %5277 = vmatprep.subr.bf16.mxu1 %v8646_v28 }
 0x6c9   :  { %v4308_v50 = vpop.f32.mrf.mxu0  ;;  %v4349_v46 = vpop.f32.mrf.mxu1 }
 0x6ca   :  { %v4356_v18 = vadd.f32 %v4308_v50, %v80_v48  ;;  %v4358_v17 = vadd.f32 %v4349_v46, %v84_v39 }
 0x6cb   :  { %v4310_v53 = vpop.f32.mrf.mxu0  ;;  %v4351_v55 = vpop.f32.mrf.mxu1 }
 0x6cc   :  { %v5933_v60 = vmul.f32 -1.442695, %v4356_v18  ;;  %v4357_v41 = vadd.f32 %v4310_v53, %v82_v54  ;;  %v4359_v8 = vadd.f32 %v4351_v55, %v86_v59  ;;  %v4390_v54 = vpop.permute.xlu0 %4389  ;;  %v5433_v53 = vld [vmem:[%s9061_s2 + $0x78] sm:$0xff] }
 0x6cd   :  { %v4312_v63 = vpop.f32.mrf.mxu0  ;;  %v4353_v22 = vpop.f32.mrf.mxu1  ;;  %vm4391_vm6 = vcmp.eq.s32.totalorder %v4390_v54, 1 }
 0x6ce   :  { %6640 = vpow2.f32 %v5933_v60  ;;  %v5934_v38 = vmul.f32 -1.442695, %v4357_v41  ;;  %v5935_v42 = vmul.f32 -1.442695, %v4359_v8  ;;  %v5432_v41 = vld [vmem:[%s9061_s2 + $0x70] sm:$0xff] }
 0x6cf   :  { %v4313_v6 = vpop.f32.mrf.mxu0  ;;  %v4354_v0 = vpop.f32.mrf.mxu1 }
 0x6d0   :  { %6642 = vpow2.f32 %v5934_v38 }
 0x6d1   :  { %6644 = vpow2.f32 %v5935_v42 }
 0x6db   :  { %v6641_v44 = vpop.eup %6640 }
 0x6dc   :  { %v4363_v11 = vadd.f32 1.0, %v6641_v44 }
 0x6dd   :  { %v6643_v13 = vpop.eup %6642 }
 0x6de   :  { %6646 = vrcp.f32 %v4363_v11  ;;  %v4369_v14 = vadd.f32 1.0, %v6643_v13  ;;  %v6645_v19 = vpop.eup %6644 }
 0x6df   :  { %6648 = vtanh.f32 %v4358_v17  ;;  %v4376_v43 = vadd.f32 1.0, %v6645_v19 }
 0x6e0   :  { %6650 = vrcp.f32 %v4369_v14 }
 0x6e9   :  { %v4629_v49 = vpop.f32.mrf.mxu0  ;;  %v4670_v37 = vpop.f32.mrf.mxu1 }
 0x6ea   :  { %v4677_v34 = vadd.f32 %v5430_v24, %v4629_v49  ;;  %v4679_v38 = vadd.f32 %v5432_v41, %v4670_v37  ;;  %v9212_v24 = vld [vmem:[#allocation18_spill] sm:$0xff]  ;;  %v9213_v37 = vld [vmem:[#allocation19_spill] sm:$0xff] }
 0x6eb   :  { %v6647_v26 = vpop.eup %6646  ;;  %v4631_v2 = vpop.f32.mrf.mxu0 }
 0x6ec   :  { %v4672_v56 = vpop.f32.mrf.mxu1  ;;  %v6649_v58 = vpop.eup %6648  ;;  %v5970_v61 = vmul.f32 -1.442695, %v4677_v34  ;;  %v4678_v28 = vadd.f32 %v5431_v15, %v4631_v2 }
 0x6ed   :  { %v6651_v5 = vpop.eup %6650  ;;  %v4633_v16 = vpop.f32.mrf.mxu0  ;;  %v4380_v29 = vmul.f32 %v6649_v58, %v6647_v26  ;;  %v4680_v60 = vadd.f32 %v5433_v53, %v4672_v56 }
 0x6ee   :  { %v4674_v36 = vpop.f32.mrf.mxu1  ;;  %v4379_v21 = vmul.f32 %v6651_v5, %v8674_v47  ;;  %6652 = vpow2.f32 %v5970_v61  ;;  %v5971_v48 = vmul.f32 -1.442695, %v4678_v28 }
 0x6ef   :  { %v4634_v50 = vpop.f32.mrf.mxu0  ;;  %v5972_v63 = vmul.f32 -1.442695, %v4680_v60 }
 0x6f0   :  { %v4675_v46 = vpop.f32.mrf.mxu1  ;;  %v4381_v18 = vadd.f32 %v4380_v29, %v4379_v21  ;;  %6654 = vpow2.f32 %v5971_v48  ;;  %v94_v21 = vld [vmem:[%s9060_s1 + $0x1d8] sm:$0xff]  ;;  %v92_v50 = vld [vmem:[%s9060_s1 + $0x1d0] sm:$0xff] }
 0x6f1   :  { %6656 = vrcp.f32 %v4376_v43 }
 0x6f2   :  { %6658 = vtanh.f32 %v4381_v18  ;;  %v8946_v55 = vsel %vm4391_vm6, %v4381_v18, %v8674_v47 }
 0x6f3   :  { %6660 = vpow2.f32 %v5972_v63  ;;  %v5426_v63 = vld [vmem:[%s9061_s2 + $0x20] sm:$0xff] }
 0x6fb   :  { %v6653_v22 = vpop.eup %6652 }
 0x6fc   :  { %v4684_v6 = vadd.f32 1.0, %v6653_v22 }
 0x6fd   :  { %v6655_v0 = vpop.eup %6654 }
 0x6fe   :  { %v6657_v59 = vpop.eup %6656  ;;  %6662 = vrcp.f32 %v4684_v6  ;;  %v4690_v8 = vadd.f32 1.0, %v6655_v0  ;;  %v5427_v6 = vld [vmem:[%s9061_s2 + $0x28] sm:$0xff] }
 0x6ff   :  { %v6659_v39 = vpop.eup %6658  ;;  %6664 = vtanh.f32 %v4679_v38 }
 0x700   :  { %6666 = vrcp.f32 %v4690_v8  ;;  %v4383_v42 = vmul.f32 %v6659_v39, %v6657_v59 }
 0x702   :  { %v8953_v47 = vsel %vm4391_vm6, %v4383_v42, %v8681_v12  ;;  %v4394_v44 = vsel %vm4391_vm6, %v4383_v42, 0.0  ;;  %v6661_v12 = vpop.eup %6660 }
 0x703   :  { %5937 = vst [vmem:[%s9064_s5 + $0x30] sm:$0xff] %v4394_v44  ;;  %v4723_v17 = vpack.c.bf16 %v8953_v47, %v8953_v47  ;;  %v4697_v13 = vadd.f32 1.0, %v6661_v12 }
 0x705   :  { %4949 = vmatmul.mubr.bf16.vlgmr.msra.gmra.mxu0 %v4723_v17  ;;  %4990 = vmatmul.mubr.bf16.vlgmr.msra.gmra.mxu1 %v4723_v17  ;;  %6668 = vrcp.f32 %v4697_v13 }
 0x706   :  { %5237 = vmatpush1.bf16.msra.mxu0 %v8687_v27  ;;  %5278 = vmatpush1.bf16.msra.mxu1 %v8692_v9 }
 0x707   :  { %5238 = vmatprep.subr.bf16.mxu0 %v8702_v10  ;;  %5279 = vmatprep.subr.bf16.mxu1 %v8707_v30 }
 0x708   :  { %5268 = vmatprep.mubr.bf16.mxu0 %v9130_v57  ;;  %5309 = vmatprep.mubr.bf16.mxu1 %v9130_v57  ;;  %v4711_v57 = vpop.permute.xlu1 %4710 }
 0x709   :  { %vm4712_vm7 = vcmp.eq.s32.totalorder %v4711_v57, 1 }
 0x70a   :  { %5239 = vmatpush1.bf16.msra.mxu0 %v8714_v23  ;;  %5280 = vmatpush1.bf16.msra.mxu1 %v8719_v25 }
 0x70b   :  { %v6663_v11 = vpop.eup %6662  ;;  %5240 = vmatprep.subr.bf16.mxu0 %v8726_v20  ;;  %5281 = vmatprep.subr.bf16.mxu1 %v8731_v31  ;;  %v9202_v20 = vld [vmem:[#allocation8_spill] sm:$0xff]  ;;  %v9203_v31 = vld [vmem:[#allocation11_spill] sm:$0xff] }
 0x70c   :  { %v6665_v27 = vpop.eup %6664 }
 0x70d   :  { %v6667_v9 = vpop.eup %6666  ;;  %v4701_v10 = vmul.f32 %v6665_v27, %v6663_v11 }
 0x70e   :  { %v4700_v30 = vmul.f32 %v6667_v9, %v8798_v62  ;;  %5241 = vmatpush1.bf16.msra.mxu0 %v8740_v32  ;;  %5282 = vmatpush1.bf16.msra.mxu1 %v8745_v35  ;;  %v9204_v32 = vld [vmem:[#allocation9_spill] sm:$0xff]  ;;  %v9205_v35 = vld [vmem:[#allocation10_spill] sm:$0xff] }
 0x70f   :  { %5242 = vmatprep.subr.bf16.mxu0 %v8752_v51  ;;  %5283 = vmatprep.subr.bf16.mxu1 %v8757_v52  ;;  %v9206_v51 = vld [vmem:[#allocation14_spill] sm:$0xff]  ;;  %v9207_v52 = vld [vmem:[#allocation12_spill] sm:$0xff] }
 0x710   :  { %v4702_v23 = vadd.f32 %v4701_v10, %v4700_v30  ;;  %v5032_v10 = vpop.permute.xlu0 %5031 }
 0x711   :  { %vm5033_vm8 = vcmp.eq.s32.totalorder %v5032_v10, 1 }
 0x712   :  { %6670 = vtanh.f32 %v4702_v23  ;;  %5243 = vmatpush1.bf16.msra.mxu0 %v8765_v45  ;;  %5284 = vmatpush1.bf16.msra.mxu1 %v8770_v3  ;;  %v8980_v25 = vsel %vm4712_vm7, %v4702_v23, %v8798_v62  ;;  %v9208_v45 = vld [vmem:[#allocation13_spill] sm:$0xff]  ;;  %v9210_v62 = vld [vmem:[#allocation15_spill] sm:$0xff]  ;;  %v6669_v14 = vpop.eup %6668 }
 0x713   :  { %5244 = vmatprep.subr.bf16.mxu0 %v8777_v4  ;;  %5285 = vmatprep.subr.bf16.mxu1 %v9202_v20  ;;  %v9209_v3 = vld [vmem:[#allocation17_spill] sm:$0xff]  ;;  %v9211_v4 = vld [vmem:[#allocation16_spill] sm:$0xff] }
 0x716   :  { %5245 = vmatpush1.bf16.msra.mxu0 %v9203_v31  ;;  %5286 = vmatpush1.bf16.msra.mxu1 %v9204_v32 }
 0x717   :  { %5246 = vmatprep.subr.bf16.mxu0 %v9205_v35  ;;  %5287 = vmatprep.subr.bf16.mxu1 %v9206_v51  ;;  %v5429_v51 = vld [vmem:[%s9061_s2 + $0x38] sm:$0xff] }
 0x71a   :  { %5247 = vmatpush1.bf16.msra.mxu0 %v9207_v52  ;;  %5288 = vmatpush1.bf16.msra.mxu1 %v9208_v45  ;;  %v5428_v45 = vld [vmem:[%s9061_s2 + $0x30] sm:$0xff] }
 0x71b   :  { %5248 = vmatprep.subr.bf16.mxu0 %v9209_v3  ;;  %5289 = vmatprep.subr.bf16.mxu1 %v9210_v62 }
 0x71e   :  { %5249 = vmatpush1.bf16.msra.mxu0 %v9211_v4  ;;  %5290 = vmatpush1.bf16.msra.mxu1 %v9212_v24 }
 0x71f   :  { %v6671_v49 = vpop.eup %6670  ;;  %5250 = vmatprep.subr.bf16.mxu0 %v9213_v37  ;;  %5291 = vmatprep.subr.bf16.mxu1 %v8858_v33  ;;  %v88_v33 = vld [vmem:[%s9060_s1 + $0x1c0] sm:$0xff] }
 0x720   :  { %v4704_v15 = vmul.f32 %v6671_v49, %v6669_v14 }
 0x722   :  { %5251 = vmatpush1.bf16.msra.mxu0 %v8865_v1  ;;  %5292 = vmatpush1.bf16.msra.mxu1 %v8870_v7  ;;  %v9000_v19 = vsel %vm4712_vm7, %v4704_v15, %v8878_v40  ;;  %v4715_v34 = vsel %vm4712_vm7, %v4704_v15, 0.0  ;;  %v90_v40 = vld [vmem:[%s9060_s1 + $0x1c8] sm:$0xff] }
 0x723   :  { %5974 = vst [vmem:[%s9065_s6 + $0x8] sm:$0xff] %v4715_v34  ;;  %v5043_v26 = vpack.c.bf16 %v9000_v19, %v9000_v19 }
 0x725   :  { %5269 = vmatmul.mubr.bf16.vlgmr.msra.gmra.mxu0 %v5043_v26  ;;  %5310 = vmatmul.mubr.bf16.vlgmr.msra.gmra.mxu1 %v5043_v26 }
 0x7c5   :  { %v4950_v1 = vpop.f32.mrf.mxu0  ;;  %v4991_v7 = vpop.f32.mrf.mxu1 }
 0x7c6   :  { %v4998_v2 = vadd.f32 %v4950_v1, %v88_v33  ;;  %v5000_v18 = vadd.f32 %v4991_v7, %v92_v50 }
 0x7c7   :  { %v4952_v56 = vpop.f32.mrf.mxu0  ;;  %v4993_v58 = vpop.f32.mrf.mxu1 }
 0x7c8   :  { %v6007_v61 = vmul.f32 -1.442695, %v4998_v2  ;;  %v4999_v28 = vadd.f32 %v4952_v56, %v90_v40  ;;  %v5001_v48 = vadd.f32 %v4993_v58, %v94_v21  ;;  %v5351_v56 = vpop.permute.xlu1 %5350 }
 0x7c9   :  { %v4954_v5 = vpop.f32.mrf.mxu0  ;;  %v4995_v43 = vpop.f32.mrf.mxu1  ;;  %vm5352_vm9 = vcmp.eq.s32.totalorder %v5351_v56, 1 }
 0x7ca   :  { %6672 = vpow2.f32 %v6007_v61  ;;  %v6008_v16 = vmul.f32 -1.442695, %v4999_v28  ;;  %v6009_v46 = vmul.f32 -1.442695, %v5001_v48 }
 0x7cb   :  { %v4955_v36 = vpop.f32.mrf.mxu0  ;;  %v4996_v29 = vpop.f32.mrf.mxu1 }
 0x7cc   :  { %6674 = vpow2.f32 %v6008_v16 }
 0x7cd   :  { %6676 = vpow2.f32 %v6009_v46 }
 0x7d7   :  { %v6673_v54 = vpop.eup %6672 }
 0x7d8   :  { %v5005_v53 = vadd.f32 1.0, %v6673_v54 }
 0x7d9   :  { %v6675_v60 = vpop.eup %6674 }
 0x7da   :  { %6678 = vrcp.f32 %v5005_v53  ;;  %v5011_v41 = vadd.f32 1.0, %v6675_v60  ;;  %v6677_v0 = vpop.eup %6676 }
 0x7db   :  { %6680 = vtanh.f32 %v5000_v18  ;;  %v5018_v27 = vadd.f32 1.0, %v6677_v0 }
 0x7dc   :  { %6682 = vrcp.f32 %v5011_v41 }
 0x7e5   :  { %v5270_v22 = vpop.f32.mrf.mxu0  ;;  %v5311_v38 = vpop.f32.mrf.mxu1 }
 0x7e6   :  { %v5318_v59 = vadd.f32 %v5426_v63, %v5270_v22  ;;  %v5320_v14 = vadd.f32 %v5428_v45, %v5311_v38 }
 0x7e7   :  { %v6679_v8 = vpop.eup %6678  ;;  %v5272_v39 = vpop.f32.mrf.mxu0 }
 0x7e8   :  { %v5313_v42 = vpop.f32.mrf.mxu1  ;;  %v6681_v44 = vpop.eup %6680  ;;  %v6044_v17 = vmul.f32 -1.442695, %v5318_v59  ;;  %v5319_v12 = vadd.f32 %v5427_v6, %v5272_v39 }
 0x7e9   :  { %v6683_v11 = vpop.eup %6682  ;;  %v5274_v9 = vpop.f32.mrf.mxu0  ;;  %v5022_v30 = vmul.f32 %v6681_v44, %v6679_v8  ;;  %v5321_v52 = vadd.f32 %v5429_v51, %v5313_v42 }
 0x7ea   :  { %v5315_v13 = vpop.f32.mrf.mxu1  ;;  %v5021_v57 = vmul.f32 %v6683_v11, %v8946_v55  ;;  %6684 = vpow2.f32 %v6044_v17  ;;  %v6045_v23 = vmul.f32 -1.442695, %v5319_v12 }
 0x7eb   :  { %v5275_v20 = vpop.f32.mrf.mxu0  ;;  %v6046_v3 = vmul.f32 -1.442695, %v5321_v52 }
 0x7ec   :  { %v5316_v31 = vpop.f32.mrf.mxu1  ;;  %v5023_v32 = vadd.f32 %v5022_v30, %v5021_v57  ;;  %6686 = vpow2.f32 %v6045_v23 }
 0x7ed   :  { %6688 = vrcp.f32 %v5018_v27 }
 0x7ee   :  { %6690 = vtanh.f32 %v5023_v32  ;;  %v5035_v35 = vsel %vm5033_vm8, %v5023_v32, %v8946_v55 }
 0x7ef   :  { %5365 = vst [vmem:[%s9067_s8] sm:$0xff] %v5035_v35  ;;  %6692 = vpow2.f32 %v6046_v3 }
 0x7f7   :  { %v6685_v62 = vpop.eup %6684 }
 0x7f8   :  { %v5325_v4 = vadd.f32 1.0, %v6685_v62 }
 0x7f9   :  { %v6687_v24 = vpop.eup %6686 }
 0x7fa   :  { %v6689_v55 = vpop.eup %6688  ;;  %6694 = vrcp.f32 %v5325_v4  ;;  %v5331_v49 = vadd.f32 1.0, %v6687_v24 }
 0x7fb   :  { %v6691_v37 = vpop.eup %6690  ;;  %6696 = vtanh.f32 %v5320_v14 }
 0x7fc   :  { %v5025_v15 = vmul.f32 %v6691_v37, %v6689_v55  ;;  %6698 = vrcp.f32 %v5331_v49  ;;  %v6693_v33 = vpop.eup %6692 }
 0x7fd   :  { %v5338_v2 = vadd.f32 1.0, %v6693_v33 }
 0x7fe   :  { %v5034_v34 = vsel %vm5033_vm8, %v5025_v15, %v8953_v47  ;;  %v5036_v26 = vsel %vm5033_vm8, %v5025_v15, 0.0 }
 0x7ff   :  { %6011 = vst [vmem:[%s9064_s5 + $0x38] sm:$0xff] %v5036_v26  ;;  %5364 = vst [vmem:[%s9066_s7] sm:$0xff] %v5034_v34  ;;  %6700 = vrcp.f32 %v5338_v2 }
 0x807   :  { %v6695_v1 = vpop.eup %6694 }
 0x808   :  { %v6697_v7 = vpop.eup %6696 }
 0x809   :  { %v6699_v40 = vpop.eup %6698  ;;  %v5342_v58 = vmul.f32 %v6697_v7, %v6695_v1 }
 0x80a   :  { %v5341_v61 = vmul.f32 %v6699_v40, %v8980_v25 }
 0x80c   :  { %v5343_v47 = vadd.f32 %v5342_v58, %v5341_v61  ;;  %v6701_v5 = vpop.eup %6700 }
 0x80e   :  { %6702 = vtanh.f32 %v5343_v47  ;;  %v5354_v28 = vsel %vm5352_vm9, %v5343_v47, %v8980_v25 }
 0x80f   :  { %5367 = vst [vmem:[%s9069_s10] sm:$0xff] %v5354_v28 }
 0x81b   :  { %v6703_v43 = vpop.eup %6702 }
 0x81c   :  { %v5345_v16 = vmul.f32 %v6703_v43, %v6701_v5 }
 0x81e   :  { %v5353_v36 = vsel %vm5352_vm9, %v5345_v16, %v9000_v19  ;;  %v5355_v29 = vsel %vm5352_vm9, %v5345_v16, 0.0 }
 0x81f   :  { %5356 = vst [vmem:[%s9065_s6] sm:$0xff] %v5355_v29  ;;  %5366 = vst [vmem:[%s9068_s9] sm:$0xff] %v5353_v36 }

</bundles_post_ra>
